<compile_context>
chip_gen: v5e
topology: v5e:2x2
jax: 0.10.0
libtpu: 0.0.40
codegen_flags: <defaults>
</compile_context>

<pallas_src>
import numpy as np
from functools import partial

import jax
import jax.numpy as jnp
from jax.experimental import pallas as pl
from jax.experimental.pallas import tpu as pltpu

NEG_SLOPE = 0.01  # F.leaky_relu default


def _conv_out_hw(H, W, K, stride):
    return (H - K) // stride + 1, (W - K) // stride + 1


def _fold_conv(w, H, W, stride, *, in_channel_major, out_channel_major):
    """Fold a VALID conv (w: (Cout, Cin, K, K), f32 numpy) into a dense matrix
    B (in_features, out_features) so that  y_flat = x_flat @ B  reproduces it.

    in_channel_major:  x_flat index = c*H*W + h*W + w      (native NCHW flatten)
                  else              = (h*W + w)*Cin + c    (spatial-major)
    out_channel_major: y_flat index = d*OH*OW + oh*OW + ow (PyTorch flatten)
                  else              = (oh*OW + ow)*Cout + d (feeds next layer)
    """
    Cout, Cin, K, _ = w.shape
    OH, OW = _conv_out_hw(H, W, K, stride)
    B = np.zeros((Cin * H * W, Cout * OH * OW), np.float32)
    c_idx = np.arange(Cin)
    d_idx = np.arange(Cout)
    for i in range(K):
        for j in range(K):
            w_tap = np.ascontiguousarray(w[:, :, i, j].T)  # (Cin, Cout)
            for oh in range(OH):
                for ow in range(OW):
                    ih, iw = oh * stride + i, ow * stride + j
                    if in_channel_major:
                        rows = c_idx * (H * W) + (ih * W + iw)
                    else:
                        rows = (ih * W + iw) * Cin + c_idx
                    if out_channel_major:
                        cols = d_idx * (OH * OW) + (oh * OW + ow)
                    else:
                        cols = (oh * OW + ow) * Cout + d_idx
                    B[np.ix_(rows, cols)] += w_tap
    return B, OH, OW


def _fold_bias(b, OH, OW, out_channel_major):
    if out_channel_major:
        return np.repeat(b, OH * OW)   # index d*OH*OW + r  -> b[d]
    return np.tile(b, OH * OW)         # index r*Cout + d   -> b[d]


def _cnet_fused_kernel(x_ref, B1_ref, c1_ref, B2_ref, c2_ref, B3_ref, c3_ref,
                       o_ref):
    def layer(a_bf16, B_ref, c_ref):
        # one MXU matmul per layer (bf16 operands, f32 accumulation)
        y = jnp.dot(a_bf16, B_ref[...], preferred_element_type=jnp.float32)
        y = y + c_ref[...]                              # f32 bias (VPU)
        return jnp.where(y >= 0.0, y, NEG_SLOPE * y)    # f32 leaky_relu

    bb = x_ref.shape[0]
    a = x_ref[...].reshape(bb, -1)                      # (Bb, Cin*H*W) bf16
    a = layer(a, B1_ref, c1_ref).astype(jnp.bfloat16)   # (Bb, R1*16)
    a = layer(a, B2_ref, c2_ref).astype(jnp.bfloat16)   # (Bb, R2*32)
    y = layer(a, B3_ref, c3_ref)                        # (Bb, 64*R3) f32, torch order
    o_ref[...] = y.reshape(o_ref.shape)


def _pick_batch_block(N):
    """Batch is the MXU M dim.  Keep >=2 grid steps when N>=2 so the 'parallel'
    axis shards across both TensorCores on v7x; sublane-align when affordable."""
    if N == 1:
        return 1
    bb = -(-N // 2)                     # cdiv(N, 2)
    if bb >= 8:
        bb = ((bb + 7) // 8) * 8        # multiple of 8 for sublane packing
    return bb


@partial(jax.jit, static_argnames=("batch_block",))
def _cnet_forward(x, B1, c1, B2, c2, B3, c3, batch_block):
    N = x.shape[0]
    F0 = B1.shape[0]
    F3 = B3.shape[1]
    # native NCHW flatten consumed directly by B1 -> no transpose, one cheap cast
    x_flat = x.reshape(N, 1, F0).astype(jnp.bfloat16)
    bb = batch_block
    grid = -(-N // bb)
    n_pad = grid * bb
    if n_pad != N:
        x_flat = jnp.pad(x_flat, ((0, n_pad - N), (0, 0), (0, 0)))
    consts = (B1, c1, B2, c2, B3, c3)
    out = pl.pallas_call(
        _cnet_fused_kernel,
        out_shape=jax.ShapeDtypeStruct((n_pad, 1, F3), jnp.float32),
        grid=(grid,),
        in_specs=[pl.BlockSpec((bb, 1, F0), lambda n: (n, 0, 0))]
                + [pl.BlockSpec(a.shape, lambda n, nd=a.ndim: (0,) * nd)
                   for a in consts],           # full-array resident constants
        out_specs=pl.BlockSpec((bb, 1, F3), lambda n: (n, 0, 0)),
        compiler_params=pltpu.CompilerParams(
            dimension_semantics=("parallel",)),  # batch blocks -> both TCs on v7x
    )(x_flat, *consts)
    out = out.reshape(n_pad, F3)
    return out[:N] if n_pad != N else out


class CNetPallas:
    """Pallas equivalent of CNet: conv(4,s2)->lrelu, conv(4,s1)->lrelu,
    conv(4,s1)->lrelu, flatten — fused into a single TPU kernel with the
    im2col gathers folded into the weights (one matmul per layer)."""

    def __init__(self, input_shape, key):
        C, H, W = input_shape
        keys = jax.random.split(key, 6)

        def init_conv(kw_, kb_, cin, cout, ks):
            # deterministic PyTorch-style uniform(-1/sqrt(fan_in), 1/sqrt(fan_in))
            fan_in = cin * ks * ks
            bound = 1.0 / np.sqrt(fan_in)
            w = jax.random.uniform(kw_, (cout, cin, ks, ks), jnp.float32, -bound, bound)
            b = jax.random.uniform(kb_, (cout,), jnp.float32, -bound, bound)
            return w, b

        self.w1, self.b1 = init_conv(keys[0], keys[1], C, 16, 4)
        self.w2, self.b2 = init_conv(keys[2], keys[3], 16, 32, 4)
        self.w3, self.b3 = init_conv(keys[4], keys[5], 32, 64, 4)

        # Fold im2col gather + conv weights into ONE dense matrix per layer.
        # Folds are done host-side in f32 and cast to bf16 exactly once.
        B1, H1, W1_ = _fold_conv(np.asarray(self.w1), H, W, 2,
                                 in_channel_major=True, out_channel_major=False)
        B2, H2, W2_ = _fold_conv(np.asarray(self.w2), H1, W1_, 1,
                                 in_channel_major=False, out_channel_major=False)
        B3, H3, W3_ = _fold_conv(np.asarray(self.w3), H2, W2_, 1,
                                 in_channel_major=False, out_channel_major=True)
        self.B1 = jnp.asarray(B1, jnp.bfloat16)
        self.B2 = jnp.asarray(B2, jnp.bfloat16)
        self.B3 = jnp.asarray(B3, jnp.bfloat16)
        # Biases broadcast to the folded output layout, kept f32 (v5e-safe epilogue).
        self.c1 = jnp.asarray(_fold_bias(np.asarray(self.b1), H1, W1_, False)[None, :],
                              jnp.float32)
        self.c2 = jnp.asarray(_fold_bias(np.asarray(self.b2), H2, W2_, False)[None, :],
                              jnp.float32)
        self.c3 = jnp.asarray(_fold_bias(np.asarray(self.b3), H3, W3_, True)[None, :],
                              jnp.float32)
        self.output_shape = (64 * H3 * W3_,)

    def __call__(self, x):
        bb = _pick_batch_block(x.shape[0])
        return _cnet_forward(x, self.B1, self.c1, self.B2, self.c2,
                             self.B3, self.c3, batch_block=bb)


def _reference_forward(x, net):
    """Pure-JAX f32 reference (lax.conv) for correctness checking."""
    def conv(x, w, b, stride):
        out = jax.lax.conv_general_dilated(
            x, w, window_strides=(stride, stride), padding="VALID",
            dimension_numbers=("NCHW", "OIHW", "NCHW"))
        out = out + b[None, :, None, None]
        return jnp.where(out >= 0, out, NEG_SLOPE * out)

    y = conv(x, net.w1, net.b1, 2)
    y = conv(y, net.w2, net.b2, 1)
    y = conv(y, net.w3, net.b3, 1)
    return y.reshape(x.shape[0], -1)   # PyTorch channel-major flatten


if __name__ == "__main__":
    key = jax.random.PRNGKey(0)
    k_in, k_net, k_in2, k_net2 = jax.random.split(key, 4)

    # Case 1: (N,C,H,W)=(2,4,16,16) -> (16,7,7) -> (32,4,4) -> (64,1,1) -> 64
    x = jax.random.normal(k_in, (2, 4, 16, 16), dtype=jnp.float32)
    net = CNetPallas((4, 16, 16), k_net)
    y = jax.block_until_ready(net(x))
    assert y.shape == (2, 64), y.shape
    y_ref = jax.block_until_ready(_reference_forward(x, net))
    # MXU operands are bf16 (accumulation/bias/lrelu stay f32) -> loosened tol.
    np.testing.assert_allclose(np.asarray(y), np.asarray(y_ref), rtol=2e-2, atol=2e-2)

    # Case 2: exercises the r3>1 PyTorch channel-major flatten baked into B3.
    # (N,C,H,W)=(2,3,18,18) -> (16,8,8) -> (32,5,5) -> (64,2,2) -> 256
    x2 = jax.random.normal(k_in2, (2, 3, 18, 18), dtype=jnp.float32)
    net2 = CNetPallas((3, 18, 18), k_net2)
    y2 = jax.block_until_ready(net2(x2))
    assert y2.shape == (2, 256), y2.shape
    y2_ref = jax.block_until_ready(_reference_forward(x2, net2))
    np.testing.assert_allclose(np.asarray(y2), np.asarray(y2_ref), rtol=2e-2, atol=2e-2)

    print("KERNEL_OK")
</pallas_src>

<mosaic_0001>
module attributes {stable_mosaic.version = 11 : i64} {
  func.func @_cnet_fused_kernel(%arg0: i32, %arg1: memref<1x1x1024xbf16, #tpu.memory_space<vmem>>, %arg2: memref<1024x784xbf16, #tpu.memory_space<vmem>>, %arg3: memref<1x784xf32, #tpu.memory_space<vmem>>, %arg4: memref<784x512xbf16, #tpu.memory_space<vmem>>, %arg5: memref<1x512xf32, #tpu.memory_space<vmem>>, %arg6: memref<512x64xbf16, #tpu.memory_space<vmem>>, %arg7: memref<1x64xf32, #tpu.memory_space<vmem>>, %arg8: memref<1x1x64xf32, #tpu.memory_space<vmem>>) attributes {dimension_semantics = [#tpu.dimension_semantics<parallel>], iteration_bounds = array<i64: 2>, scalar_prefetch = 0 : i64, scratch_operands = 0 : i64, tpu.core_type = #tpu.core_type<tc>, window_params = [{transform_indices = @transform_0, window_bounds = array<i64: 1, 1, 1024>}, {pipeline_mode = #tpu.pipeline_mode<synchronous>, transform_indices = @transform_1, window_bounds = array<i64: 1024, 784>}, {pipeline_mode = #tpu.pipeline_mode<synchronous>, transform_indices = @transform_2, window_bounds = array<i64: 1, 784>}, {pipeline_mode = #tpu.pipeline_mode<synchronous>, transform_indices = @transform_3, window_bounds = array<i64: 784, 512>}, {pipeline_mode = #tpu.pipeline_mode<synchronous>, transform_indices = @transform_4, window_bounds = array<i64: 1, 512>}, {pipeline_mode = #tpu.pipeline_mode<synchronous>, transform_indices = @transform_5, window_bounds = array<i64: 512, 64>}, {pipeline_mode = #tpu.pipeline_mode<synchronous>, transform_indices = @transform_6, window_bounds = array<i64: 1, 64>}, {transform_indices = @transform_7, window_bounds = array<i64: 1, 1, 64>}]} {
    %c0 = arith.constant 0 : index
    %c0_0 = arith.constant 0 : index
    %c0_1 = arith.constant 0 : index
    %0 = vector.load %arg1[%c0, %c0_0, %c0_1] : memref<1x1x1024xbf16, #tpu.memory_space<vmem>>, vector<1x1x1024xbf16>
    %1 = vector.shape_cast %0 : vector<1x1x1024xbf16> to vector<1x1024xbf16>
    %c0_2 = arith.constant 0 : index
    %c0_3 = arith.constant 0 : index
    %2 = vector.load %arg2[%c0_2, %c0_3] : memref<1024x784xbf16, #tpu.memory_space<vmem>>, vector<1024x784xbf16>
    %cst = arith.constant dense<0.000000e+00> : vector<1x784xf32>
    %3 = tpu.matmul %1, %2, %cst {dimension_numbers = #tpu.dot_dimension_numbers<[1], [0], [0], [1], [0, 0, 1, 1], [], []>} : vector<1x1024xbf16>, vector<1024x784xbf16>, vector<1x784xf32> -> vector<1x784xf32>
    %c0_4 = arith.constant 0 : index
    %c0_5 = arith.constant 0 : index
    %4 = vector.load %arg3[%c0_4, %c0_5] : memref<1x784xf32, #tpu.memory_space<vmem>>, vector<1x784xf32>
    %5 = arith.addf %3, %4 : vector<1x784xf32>
    %cst_6 = arith.constant 0.000000e+00 : f32
    %6 = vector.broadcast %cst_6 : f32 to vector<1x784xf32>
    %7 = arith.cmpf oge, %5, %6 : vector<1x784xf32>
    %cst_7 = arith.constant 0.00999999977 : f32
    %8 = vector.broadcast %cst_7 : f32 to vector<1x784xf32>
    %9 = arith.mulf %8, %5 : vector<1x784xf32>
    %10 = arith.select %7, %5, %9 : vector<1x784xi1>, vector<1x784xf32>
    %11 = arith.truncf %10 : vector<1x784xf32> to vector<1x784xbf16>
    %c0_8 = arith.constant 0 : index
    %c0_9 = arith.constant 0 : index
    %12 = vector.load %arg4[%c0_8, %c0_9] : memref<784x512xbf16, #tpu.memory_space<vmem>>, vector<784x512xbf16>
    %cst_10 = arith.constant dense<0.000000e+00> : vector<1x512xf32>
    %13 = tpu.matmul %11, %12, %cst_10 {dimension_numbers = #tpu.dot_dimension_numbers<[1], [0], [0], [1], [0, 0, 1, 1], [], []>} : vector<1x784xbf16>, vector<784x512xbf16>, vector<1x512xf32> -> vector<1x512xf32>
    %c0_11 = arith.constant 0 : index
    %c0_12 = arith.constant 0 : index
    %14 = vector.load %arg5[%c0_11, %c0_12] : memref<1x512xf32, #tpu.memory_space<vmem>>, vector<1x512xf32>
    %15 = arith.addf %13, %14 : vector<1x512xf32>
    %cst_13 = arith.constant 0.000000e+00 : f32
    %16 = vector.broadcast %cst_13 : f32 to vector<1x512xf32>
    %17 = arith.cmpf oge, %15, %16 : vector<1x512xf32>
    %cst_14 = arith.constant 0.00999999977 : f32
    %18 = vector.broadcast %cst_14 : f32 to vector<1x512xf32>
    %19 = arith.mulf %18, %15 : vector<1x512xf32>
    %20 = arith.select %17, %15, %19 : vector<1x512xi1>, vector<1x512xf32>
    %21 = arith.truncf %20 : vector<1x512xf32> to vector<1x512xbf16>
    %c0_15 = arith.constant 0 : index
    %c0_16 = arith.constant 0 : index
    %22 = vector.load %arg6[%c0_15, %c0_16] : memref<512x64xbf16, #tpu.memory_space<vmem>>, vector<512x64xbf16>
    %cst_17 = arith.constant dense<0.000000e+00> : vector<1x64xf32>
    %23 = tpu.matmul %21, %22, %cst_17 {dimension_numbers = #tpu.dot_dimension_numbers<[1], [0], [0], [1], [0, 0, 1, 1], [], []>} : vector<1x512xbf16>, vector<512x64xbf16>, vector<1x64xf32> -> vector<1x64xf32>
    %c0_18 = arith.constant 0 : index
    %c0_19 = arith.constant 0 : index
    %24 = vector.load %arg7[%c0_18, %c0_19] : memref<1x64xf32, #tpu.memory_space<vmem>>, vector<1x64xf32>
    %25 = arith.addf %23, %24 : vector<1x64xf32>
    %cst_20 = arith.constant 0.000000e+00 : f32
    %26 = vector.broadcast %cst_20 : f32 to vector<1x64xf32>
    %27 = arith.cmpf oge, %25, %26 : vector<1x64xf32>
    %cst_21 = arith.constant 0.00999999977 : f32
    %28 = vector.broadcast %cst_21 : f32 to vector<1x64xf32>
    %29 = arith.mulf %28, %25 : vector<1x64xf32>
    %30 = arith.select %27, %25, %29 : vector<1x64xi1>, vector<1x64xf32>
    %31 = vector.shape_cast %30 : vector<1x64xf32> to vector<1x1x64xf32>
    %c0_22 = arith.constant 0 : index
    %c0_23 = arith.constant 0 : index
    %c0_24 = arith.constant 0 : index
    %32 = vector.load %arg8[%c0_22, %c0_23, %c0_24] : memref<1x1x64xf32, #tpu.memory_space<vmem>>, vector<1x1x64xf32>
    tpu.vector_store %arg8[%c0_22, %c0_23, %c0_24], %31 {strides = array<i32>} : memref<1x1x64xf32, #tpu.memory_space<vmem>>, vector<1x1x64xf32>,
    return
  }
  func.func @transform_0(%arg0: i32) -> (i32, i32, i32) {
    %c0_i32 = arith.constant 0 : i32
    %c0_i32_0 = arith.constant 0 : i32
    %c0_i32_1 = arith.constant 0 : i32
    return %arg0, %c0_i32, %c0_i32_0 : i32, i32, i32
  }
  func.func @transform_1(%arg0: i32) -> (i32, i32) {
    %c0_i32 = arith.constant 0 : i32
    %c0_i32_0 = arith.constant 0 : i32
    %c0_i32_1 = arith.constant 0 : i32
    return %c0_i32, %c0_i32_0 : i32, i32
  }
  func.func @transform_2(%arg0: i32) -> (i32, i32) {
    %c0_i32 = arith.constant 0 : i32
    %c0_i32_0 = arith.constant 0 : i32
    %c0_i32_1 = arith.constant 0 : i32
    return %c0_i32, %c0_i32_0 : i32, i32
  }
  func.func @transform_3(%arg0: i32) -> (i32, i32) {
    %c0_i32 = arith.constant 0 : i32
    %c0_i32_0 = arith.constant 0 : i32
    %c0_i32_1 = arith.constant 0 : i32
    return %c0_i32, %c0_i32_0 : i32, i32
  }
  func.func @transform_4(%arg0: i32) -> (i32, i32) {
    %c0_i32 = arith.constant 0 : i32
    %c0_i32_0 = arith.constant 0 : i32
    %c0_i32_1 = arith.constant 0 : i32
    return %c0_i32, %c0_i32_0 : i32, i32
  }
  func.func @transform_5(%arg0: i32) -> (i32, i32) {
    %c0_i32 = arith.constant 0 : i32
    %c0_i32_0 = arith.constant 0 : i32
    %c0_i32_1 = arith.constant 0 : i32
    return %c0_i32, %c0_i32_0 : i32, i32
  }
  func.func @transform_6(%arg0: i32) -> (i32, i32) {
    %c0_i32 = arith.constant 0 : i32
    %c0_i32_0 = arith.constant 0 : i32
    %c0_i32_1 = arith.constant 0 : i32
    return %c0_i32, %c0_i32_0 : i32, i32
  }
  func.func @transform_7(%arg0: i32) -> (i32, i32, i32) {
    %c0_i32 = arith.constant 0 : i32
    %c0_i32_0 = arith.constant 0 : i32
    %c0_i32_1 = arith.constant 0 : i32
    return %arg0, %c0_i32, %c0_i32_0 : i32, i32, i32
  }
}

</mosaic_0001>

<bundles_post_ra>
// kernel: _cnet_forward.1
= control target key start
LH: loop header
LB: loop body
LE: loop exit
PB: predicated region body
PF: predicated region fallthrough
CT: control target
= control target key end

     0   :  { %12 = vsyncpa [#allocation3], 0  ;;  %s13727_s0 = inlined_call_operand.vmem [shape: bf16[2,1,1024], index: 0, kind: input, shape index: {}]   ;;  %s13728_s1 = inlined_call_operand.vmem [shape: bf16[1024,784], index: 1, kind: input, shape index: {}]   ;;  %s13729_s2 = inlined_call_operand.vmem [shape: f32[1,784], index: 2, kind: input, shape index: {}]   ;;  %s13730_s3 = inlined_call_operand.vmem [shape: bf16[784,512], index: 3, kind: input, shape index: {}]   ;;  %s13731_s4 = inlined_call_operand.vmem [shape: f32[1,512], index: 4, kind: input, shape index: {}]   ;;  %s13732_s5 = inlined_call_operand.vmem [shape: bf16[512,64], index: 5, kind: input, shape index: {}]   ;;  %s13733_s6 = inlined_call_operand.vmem [shape: f32[1,64], index: 6, kind: input, shape index: {}]   ;;  %s13734_s7 = inlined_call_operand.hbm [shape: f32[2,1,64], index: 7, kind: output, shape index: {}]  }
   0x1   :  { %14 = vsyncpa [#allocation3 + $0x1], 0  ;;  %s9389_s24 = smov 0   ;;  %s9391_s25 = smov 0  }
   0x2   :  { %s9393_s26 = smov 0   ;;  %s9395_s27 = smov 0  }
   0x3 LB: > { %s9410_s28 = sadd.s32 4294967295, %s9347_s27   ;;  %s5833_s29 = sadd.s32 4294967294, %s9347_s27   ;;  %s9347_s27 = sphi %s9395_s27, %s13740_s27   ;;  %s9343_s26 = sphi %s9393_s26, %s13739_s26   ;;  %s9339_s25 = sphi %s9391_s25, %s13738_s25   ;;  %s9335_s24 = sphi %s9389_s24, %s13737_s24  }
   0x4   : > { %s9414_s30 = sadd.s32 1, %s9347_s27   ;;  %s179_s8 = sadd.s32 1, %s9343_s26 }
   0x5   : > { %s176_s9 = ssub.s32 %s9347_s27, %s9414_s30  ;;  %p189_p0 = scmp.ne.s32.totalorder %s9343_s26, %s9339_s25 }
   0x6   : > { %p177_p1 = scmp.eq.s32.totalorder %s176_s9, 0  ;;  %p190_p2 = scmp.eq.s32.totalorder %s9410_s28, 1 }
   0x7   : > { %p195_p3 = scmp.ne.s32.totalorder %s9339_s25, %s9335_s24  ;;  %p196_p4 = scmp.eq.s32.totalorder %s5833_s29, 1 }
   0x8   : > { %s9425_s10 = scalar_select %p177_p1, %s9343_s26, %s179_s8  }
   0x9   : > { %p9427_p5 = por %p190_p2, %p189_p0  ;;  %p9431_p6 = por %p196_p4, %p195_p3 }
   0xa   : > { %p5836_p7 = scmp.ge.s32.totalorder %s9347_s27, 1  ;;  %p239_p8 = scmp.lt.s32.totalorder %s9347_s27, 3 }
   0xc   : > { %p240_p9 = pnand %p5836_p7, %p239_p8 }
   0xd   : > { %p269_p10 = scmp.lt.s32.totalorder (!%p240_p9), %s9410_s28, 1  ;;  %s267_s23 = sand.u32 (!%p240_p9), 1, %s9339_s25  }
   0xe   : > { %243 = sbr.rel (%p240_p9) target bundleno = 1019 (0x3fb), region = 48  ;;  %s268_s9 = scalar_lea.vmem (!%p240_p9), [#allocation2], %s267_s23 }
   0xf   : > { %s5776_s13 = sshll.u32 (!%p240_p9), %s268_s9, 4  ;;  %s5766_s16 = scalar_lea.sflag (!%p240_p9), [#allocation3], %s267_s23  ;;  %s5777_s13 = int_to_ptr.vmem [resolvable:$true] %s5776_s13 }
  0x10   : > { %s9305_s19 = scalar_lea.hbm (!%p240_p9), %s13734_s7, 2 }
  0x13   : > { %v6036_v0 = vld [vmem:[%s13728_s1 + $0x188] sm:$0xf]  ;;  %v8600_v1 = vld [vmem:[%s13728_s1 + $0x1a0] sm:$0xf0]  ;;  %v6008_v11 = vld [vmem:[%s13728_s1 + $0x150] sm:$0xf] }
  0x14   : > { %v6260_v2 = vld [vmem:[%s13728_s1 + $0x348] sm:$0xf]  ;;  %v6037_v3 = vor.u32 %v8600_v1, %v6036_v0  ;;  %v8656_v4 = vld [vmem:[%s13728_s1 + $0x360] sm:$0xf0]  ;;  %v8593_v13 = vld [vmem:[%s13728_s1 + $0x168] sm:$0xf0] }
  0x15   : > { %v6484_v5 = vld [vmem:[%s13728_s1 + $0x508] sm:$0xf]  ;;  %v8712_v6 = vld [vmem:[%s13728_s1 + $0x520] sm:$0xf0]  ;;  %v6261_v7 = vor.u32 %v8656_v4, %v6260_v2  ;;  %v6232_v14 = vld [vmem:[%s13728_s1 + $0x310] sm:$0xf]  ;;  %v6009_v16 = vor.u32 %v8593_v13, %v6008_v11 }
  0x16   : > { %v6485_v8 = vor.u32 %v8712_v6, %v6484_v5  ;;  %v6708_v9 = vld [vmem:[%s13728_s1 + $0x6c8] sm:$0xf]  ;;  %v8768_v10 = vld [vmem:[%s13728_s1 + $0x6e0] sm:$0xf0]  ;;  %3125 = vmatpush.bf16.msra.mxu0 %v6037_v3  ;;  %v8649_v15 = vld [vmem:[%s13728_s1 + $0x328] sm:$0xf0] }
  0x17   : > { %v6709_v12 = vor.u32 %v8768_v10, %v6708_v9  ;;  %3138 = vmatpush.bf16.msra.mxu1 %v6261_v7  ;;  %v6233_v17 = vor.u32 %v8649_v15, %v6232_v14  ;;  %v6456_v18 = vld [vmem:[%s13728_s1 + $0x4d0] sm:$0xf]  ;;  %v8705_v19 = vld [vmem:[%s13728_s1 + $0x4e8] sm:$0xf0]  ;;  %v5980_v23 = vld [vmem:[%s13728_s1 + $0x118] sm:$0xf] }
  0x18   : > { %3151 = vmatpush.bf16.msra.mxu2 %v6485_v8  ;;  %v6680_v20 = vld [vmem:[%s13728_s1 + $0x690] sm:$0xf]  ;;  %v6457_v21 = vor.u32 %v8705_v19, %v6456_v18  ;;  %v8761_v22 = vld [vmem:[%s13728_s1 + $0x6a8] sm:$0xf0]  ;;  %v8586_v24 = vld [vmem:[%s13728_s1 + $0x130] sm:$0xf0] }
  0x19   : > { %3164 = vmatpush.bf16.msra.mxu3 %v6709_v12  ;;  %v6681_v25 = vor.u32 %v8761_v22, %v6680_v20  ;;  %v6204_v26 = vld [vmem:[%s13728_s1 + $0x2d8] sm:$0xf]  ;;  %v8642_v27 = vld [vmem:[%s13728_s1 + $0x2f0] sm:$0xf0]  ;;  %v5981_v29 = vor.u32 %v8586_v24, %v5980_v23  ;;  %v5952_v35 = vld [vmem:[%s13728_s1 + $0xe0] sm:$0xf] }
  0x1a   : > { %v6428_v28 = vld [vmem:[%s13728_s1 + $0x498] sm:$0xf]  ;;  %3126 = vmatpush.bf16.msra.mxu0 %v6009_v16  ;;  %v8698_v30 = vld [vmem:[%s13728_s1 + $0x4b0] sm:$0xf0]  ;;  %v6205_v33 = vor.u32 %v8642_v27, %v6204_v26  ;;  %v8579_v36 = vld [vmem:[%s13728_s1 + $0xf8] sm:$0xf0] }
  0x1b   : > { %v6652_v31 = vld [vmem:[%s13728_s1 + $0x658] sm:$0xf]  ;;  %v8754_v32 = vld [vmem:[%s13728_s1 + $0x670] sm:$0xf0]  ;;  %3139 = vmatpush.bf16.msra.mxu1 %v6233_v17  ;;  %v6429_v34 = vor.u32 %v8698_v30, %v6428_v28  ;;  %v6176_v37 = vld [vmem:[%s13728_s1 + $0x2a0] sm:$0xf]  ;;  %v5953_v44 = vor.u32 %v8579_v36, %v5952_v35 }
  0x1c   : > { %3152 = vmatpush.bf16.msra.mxu2 %v6457_v21  ;;  %v6653_v38 = vor.u32 %v8754_v32, %v6652_v31  ;;  %v8635_v39 = vld [vmem:[%s13728_s1 + $0x2b8] sm:$0xf0]  ;;  %v6400_v40 = vld [vmem:[%s13728_s1 + $0x460] sm:$0xf]  ;;  %v5924_v47 = vld [vmem:[%s13728_s1 + $0xa8] sm:$0xf] }
  0x1d   : > { %3165 = vmatpush.bf16.msra.mxu3 %v6681_v25  ;;  %v8691_v41 = vld [vmem:[%s13728_s1 + $0x478] sm:$0xf0]  ;;  %v6624_v42 = vld [vmem:[%s13728_s1 + $0x620] sm:$0xf]  ;;  %v6177_v45 = vor.u32 %v8635_v39, %v6176_v37  ;;  %v8572_v48 = vld [vmem:[%s13728_s1 + $0xc0] sm:$0xf0] }
  0x1e   : > { %v8747_v43 = vld [vmem:[%s13728_s1 + $0x638] sm:$0xf0]  ;;  %3127 = vmatpush.bf16.msra.mxu0 %v5981_v29  ;;  %v6401_v46 = vor.u32 %v8691_v41, %v6400_v40  ;;  %v6148_v49 = vld [vmem:[%s13728_s1 + $0x268] sm:$0xf]  ;;  %v8628_v51 = vld [vmem:[%s13728_s1 + $0x280] sm:$0xf0]  ;;  %v5925_v56 = vor.u32 %v8572_v48, %v5924_v47 }
  0x1f   : > { %3140 = vmatpush.bf16.msra.mxu1 %v6205_v33  ;;  %v6625_v50 = vor.u32 %v8747_v43, %v6624_v42  ;;  %v6372_v52 = vld [vmem:[%s13728_s1 + $0x428] sm:$0xf]  ;;  %v8684_v53 = vld [vmem:[%s13728_s1 + $0x440] sm:$0xf0]  ;;  %v6149_v57 = vor.u32 %v8628_v51, %v6148_v49  ;;  %v5896_v59 = vld [vmem:[%s13728_s1 + $0x70] sm:$0xf] }
  0x20   : > { %3153 = vmatpush.bf16.msra.mxu2 %v6429_v34  ;;  %v6596_v54 = vld [vmem:[%s13728_s1 + $0x5e8] sm:$0xf]  ;;  %v8740_v55 = vld [vmem:[%s13728_s1 + $0x600] sm:$0xf0]  ;;  %v6373_v58 = vor.u32 %v8684_v53, %v6372_v52  ;;  %v8565_v60 = vld [vmem:[%s13728_s1 + $0x88] sm:$0xf0] }
  0x21   : > { %3166 = vmatpush.bf16.msra.mxu3 %v6653_v38  ;;  %v6120_v61 = vld [vmem:[%s13728_s1 + $0x230] sm:$0xf]  ;;  %v6597_v62 = vor.u32 %v8740_v55, %v6596_v54  ;;  %v8621_v63 = vld [vmem:[%s13728_s1 + $0x248] sm:$0xf0]  ;;  %v5897_v4 = vor.u32 %v8565_v60, %v5896_v59  ;;  %v5868_v7 = vld [vmem:[%s13728_s1 + $0x38] sm:$0xf] }
  0x22   : > { %3128 = vmatpush.bf16.msra.mxu0 %v5953_v44  ;;  %v6344_v0 = vld [vmem:[%s13728_s1 + $0x3f0] sm:$0xf]  ;;  %v8677_v1 = vld [vmem:[%s13728_s1 + $0x408] sm:$0xf0]  ;;  %v6121_v5 = vor.u32 %v8621_v63, %v6120_v61  ;;  %v8558_v8 = vld [vmem:[%s13728_s1 + $0x50] sm:$0xf0] }
  0x23   : > { %3141 = vmatpush.bf16.msra.mxu1 %v6177_v45  ;;  %v6568_v2 = vld [vmem:[%s13728_s1 + $0x5b0] sm:$0xf]  ;;  %v8733_v3 = vld [vmem:[%s13728_s1 + $0x5c8] sm:$0xf0]  ;;  %v6345_v6 = vor.u32 %v8677_v1, %v6344_v0  ;;  %v6092_v9 = vld [vmem:[%s13728_s1 + $0x1f8] sm:$0xf]  ;;  %v5869_v16 = vor.u32 %v8558_v8, %v5868_v7 }
  0x24   : > { %3154 = vmatpush.bf16.msra.mxu2 %v6401_v46  ;;  %v6569_v10 = vor.u32 %v8733_v3, %v6568_v2  ;;  %v8614_v11 = vld [vmem:[%s13728_s1 + $0x210] sm:$0xf0]  ;;  %v6316_v12 = vld [vmem:[%s13728_s1 + $0x3b8] sm:$0xf]  ;;  %v5840_v17 = vld [vmem:[%s13728_s1] sm:$0xf] }
  0x25   : > { %3167 = vmatpush.bf16.msra.mxu3 %v6625_v50  ;;  %v8670_v13 = vld [vmem:[%s13728_s1 + $0x3d0] sm:$0xf0]  ;;  %v6540_v14 = vld [vmem:[%s13728_s1 + $0x578] sm:$0xf]  ;;  %v8551_v18 = vld [vmem:[%s13728_s1 + $0x18] sm:$0xf0]  ;;  %v6093_v19 = vor.u32 %v8614_v11, %v6092_v9 }
  0x26   : > { %3129 = vmatpush.bf16.msra.mxu0 %v5925_v56  ;;  %v8726_v15 = vld [vmem:[%s13728_s1 + $0x590] sm:$0xf0]  ;;  %v6317_v20 = vor.u32 %v8670_v13, %v6316_v12  ;;  %v6064_v21 = vld [vmem:[%s13728_s1 + $0x1c0] sm:$0xf]  ;;  %v8607_v22 = vld [vmem:[%s13728_s1 + $0x1d8] sm:$0xf0]  ;;  %v5841_v31 = vor.u32 %v8551_v18, %v5840_v17 }
  0x27   : > { %3142 = vmatpush.bf16.msra.mxu1 %v6149_v57  ;;  %v6288_v23 = vld [vmem:[%s13728_s1 + $0x380] sm:$0xf]  ;;  %v6541_v24 = vor.u32 %v8726_v15, %v6540_v14  ;;  %v8663_v25 = vld [vmem:[%s13728_s1 + $0x398] sm:$0xf0]  ;;  %v6932_v28 = vld [vmem:[%s13728_s1 + $0x888] sm:$0xf]  ;;  %v6065_v35 = vor.u32 %v8607_v22, %v6064_v21 }
  0x28   : > { %3155 = vmatpush.bf16.msra.mxu2 %v6373_v58  ;;  %v6512_v26 = vld [vmem:[%s13728_s1 + $0x540] sm:$0xf]  ;;  %v8719_v27 = vld [vmem:[%s13728_s1 + $0x558] sm:$0xf0]  ;;  %v8824_v29 = vld [vmem:[%s13728_s1 + $0x8a0] sm:$0xf0]  ;;  %v6289_v36 = vor.u32 %v8663_v25, %v6288_v23 }
  0x29   : > { %3168 = vmatpush.bf16.msra.mxu3 %v6597_v62  ;;  %v7156_v30 = vld [vmem:[%s13728_s1 + $0xa48] sm:$0xf]  ;;  %v8880_v32 = vld [vmem:[%s13728_s1 + $0xa60] sm:$0xf0]  ;;  %v6513_v39 = vor.u32 %v8719_v27, %v6512_v26  ;;  %v6933_v40 = vor.u32 %v8824_v29, %v6932_v28  ;;  %v6904_v43 = vld [vmem:[%s13728_s1 + $0x850] sm:$0xf] }
  0x2a   : > { %3130 = vmatpush.bf16.msra.mxu0 %v5897_v4  ;;  %v7380_v33 = vld [vmem:[%s13728_s1 + $0xc08] sm:$0xf]  ;;  %v8936_v34 = vld [vmem:[%s13728_s1 + $0xc20] sm:$0xf0]  ;;  %v7157_v41 = vor.u32 %v8880_v32, %v7156_v30  ;;  %v8817_v44 = vld [vmem:[%s13728_s1 + $0x868] sm:$0xf0] }
  0x2b   : > { %3143 = vmatpush.bf16.msra.mxu1 %v6121_v5  ;;  %v7604_v37 = vld [vmem:[%s13728_s1 + $0xdc8] sm:$0xf]  ;;  %v8992_v38 = vld [vmem:[%s13728_s1 + $0xde0] sm:$0xf0]  ;;  %v7381_v42 = vor.u32 %v8936_v34, %v7380_v33  ;;  %v7128_v45 = vld [vmem:[%s13728_s1 + $0xa10] sm:$0xf]  ;;  %v6905_v52 = vor.u32 %v8817_v44, %v6904_v43 }
  0x2c   : > { %3156 = vmatpush.bf16.msra.mxu2 %v6345_v6  ;;  %v7605_v46 = vor.u32 %v8992_v38, %v7604_v37  ;;  %v8873_v47 = vld [vmem:[%s13728_s1 + $0xa28] sm:$0xf0]  ;;  %v7352_v48 = vld [vmem:[%s13728_s1 + $0xbd0] sm:$0xf]  ;;  %v6876_v53 = vld [vmem:[%s13728_s1 + $0x818] sm:$0xf] }
  0x2d   : > { %3169 = vmatpush.bf16.msra.mxu3 %v6569_v10  ;;  %v8929_v49 = vld [vmem:[%s13728_s1 + $0xbe8] sm:$0xf0]  ;;  %v7576_v50 = vld [vmem:[%s13728_s1 + $0xd90] sm:$0xf]  ;;  %v7129_v54 = vor.u32 %v8873_v47, %v7128_v45  ;;  %v8810_v56 = vld [vmem:[%s13728_s1 + $0x830] sm:$0xf0] }
  0x2e   : > { %3131 = vmatpush.bf16.msra.mxu0 %v5869_v16  ;;  %v8985_v51 = vld [vmem:[%s13728_s1 + $0xda8] sm:$0xf0]  ;;  %v7353_v55 = vor.u32 %v8929_v49, %v7352_v48  ;;  %v7100_v57 = vld [vmem:[%s13728_s1 + $0x9d8] sm:$0xf]  ;;  %v8866_v59 = vld [vmem:[%s13728_s1 + $0x9f0] sm:$0xf0]  ;;  %v6877_v0 = vor.u32 %v8810_v56, %v6876_v53 }
  0x2f   : > { %3144 = vmatpush.bf16.msra.mxu1 %v6093_v19  ;;  %v7577_v58 = vor.u32 %v8985_v51, %v7576_v50  ;;  %v7324_v60 = vld [vmem:[%s13728_s1 + $0xb98] sm:$0xf]  ;;  %v8922_v61 = vld [vmem:[%s13728_s1 + $0xbb0] sm:$0xf0]  ;;  %s270_s21 = scalar_select %p269_p10, %s9410_s28, 1  ;;  %v7101_v2 = vor.u32 %v8866_v59, %v7100_v57  ;;  %vm5067_vm7 = vcmask 130048  }
  0x30   : > { %3157 = vmatpush.bf16.msra.mxu2 %v6317_v20  ;;  %v7548_v62 = vld [vmem:[%s13728_s1 + $0xd58] sm:$0xf]  ;;  %v8978_v63 = vld [vmem:[%s13728_s1 + $0xd70] sm:$0xf0]  ;;  %v6848_v1 = vld [vmem:[%s13728_s1 + $0x7e0] sm:$0xf]  ;;  %v7325_v3 = vor.u32 %v8922_v61, %v7324_v60 }
  0x31   : > { %3170 = vmatpush.bf16.msra.mxu3 %v6541_v24  ;;  %v8803_v4 = vld [vmem:[%s13728_s1 + $0x7f8] sm:$0xf0]  ;;  %v7072_v5 = vld [vmem:[%s13728_s1 + $0x9a0] sm:$0xf]  ;;  %s5837_s14 = sshll.u32 %s270_s21, 3  ;;  %v7549_v6 = vor.u32 %v8978_v63, %v7548_v62  ;;  %s5774_s21 = scalar_lea.hbm %s13734_s7, %s9410_s28  ;;  %vm5763_vm13 = vcmask 516096  }
  0x32   : > { %3132 = vmatpush.bf16.msra.mxu0 %v5841_v31  ;;  %v8859_v7 = vld [vmem:[%s13728_s1 + $0x9b8] sm:$0xf0]  ;;  %v7296_v8 = vld [vmem:[%s13728_s1 + $0xb60] sm:$0xf]  ;;  %s272_s29 = scalar_lea.vmem %s13727_s0, %s5837_s14  ;;  %v6849_v13 = vor.u32 %v8803_v4, %v6848_v1  ;;  %v6820_v16 = vld [vmem:[%s13728_s1 + $0x7a8] sm:$0xf] }
  0x33   : > { %3145 = vmatpush.bf16.msra.mxu1 %v6065_v35  ;;  %v8915_v9 = vld [vmem:[%s13728_s1 + $0xb78] sm:$0xf0]  ;;  %v7520_v10 = vld [vmem:[%s13728_s1 + $0xd20] sm:$0xf]  ;;  %v7073_v14 = vor.u32 %v8859_v7, %v7072_v5  ;;  %v8796_v17 = vld [vmem:[%s13728_s1 + $0x7c0] sm:$0xf0] }
  0x34   : > { %3158 = vmatpush.bf16.msra.mxu2 %v6289_v36  ;;  %v8971_v11 = vld [vmem:[%s13728_s1 + $0xd38] sm:$0xf0]  ;;  %v274_v12 = vld [vmem:[%s272_s29] sm:$0xff]  ;;  %v7297_v15 = vor.u32 %v8915_v9, %v7296_v8  ;;  %v7044_v18 = vld [vmem:[%s13728_s1 + $0x968] sm:$0xf]  ;;  %v6821_v25 = vor.u32 %v8796_v17, %v6820_v16  ;;  %s5778_s15 = sshll.u32 %s5774_s21, 4  ;;  %s5779_s15 = int_to_ptr.hbm [resolvable:$true] %s5778_s15 }
  0x35   : > { %3171 = vmatpush.bf16.msra.mxu3 %v6513_v39  ;;  %789 = vst [vmem:[#allocation1] ss:$9 sm:$0xff] %v274_v12  ;;  %v7521_v19 = vor.u32 %v8971_v11, %v7520_v10  ;;  %v8852_v20 = vld [vmem:[%s13728_s1 + $0x980] sm:$0xf0]  ;;  %v7268_v21 = vld [vmem:[%s13728_s1 + $0xb28] sm:$0xf] }
  0x36   : > { %3177 = vmatpush.bf16.msrb.mxu0 %v6933_v40  ;;  %v8908_v22 = vld [vmem:[%s13728_s1 + $0xb40] sm:$0xf0]  ;;  %v7492_v23 = vld [vmem:[%s13728_s1 + $0xce8] sm:$0xf]  ;;  %v6792_v26 = vld [vmem:[%s13728_s1 + $0x770] sm:$0xf]  ;;  %v7045_v27 = vor.u32 %v8852_v20, %v7044_v18 }
  0x37   : > { %3190 = vmatpush.bf16.msrb.mxu1 %v7157_v41  ;;  %v8964_v24 = vld [vmem:[%s13728_s1 + $0xd00] sm:$0xf0]  ;;  %v7269_v28 = vor.u32 %v8908_v22, %v7268_v21  ;;  %v8789_v29 = vld [vmem:[%s13728_s1 + $0x788] sm:$0xf0]  ;;  %v7016_v30 = vld [vmem:[%s13728_s1 + $0x930] sm:$0xf] }
  0x38   : > { %3203 = vmatpush.bf16.msrb.mxu2 %v7381_v42  ;;  %v8845_v31 = vld [vmem:[%s13728_s1 + $0x948] sm:$0xf0]  ;;  %v7493_v32 = vor.u32 %v8964_v24, %v7492_v23  ;;  %v7240_v33 = vld [vmem:[%s13728_s1 + $0xaf0] sm:$0xf]  ;;  %v6793_v39 = vor.u32 %v8789_v29, %v6792_v26  ;;  %v6764_v44 = vld [vmem:[%s13728_s1 + $0x738] sm:$0xf] }
  0x39   : > { %3216 = vmatpush.bf16.msrb.mxu3 %v7605_v46  ;;  %v8901_v34 = vld [vmem:[%s13728_s1 + $0xb08] sm:$0xf0]  ;;  %v7464_v35 = vld [vmem:[%s13728_s1 + $0xcb0] sm:$0xf]  ;;  %v7017_v42 = vor.u32 %v8845_v31, %v7016_v30  ;;  %v8782_v45 = vld [vmem:[%s13728_s1 + $0x750] sm:$0xf0] }
  0x3a   : > { %3178 = vmatpush.bf16.msrb.mxu0 %v6905_v52  ;;  %v8957_v37 = vld [vmem:[%s13728_s1 + $0xcc8] sm:$0xf0]  ;;  %v7241_v43 = vor.u32 %v8901_v34, %v7240_v33  ;;  %v6988_v46 = vld [vmem:[%s13728_s1 + $0x8f8] sm:$0xf]  ;;  %v8838_v48 = vld [vmem:[%s13728_s1 + $0x910] sm:$0xf0]  ;;  %v6765_v53 = vor.u32 %v8782_v45, %v6764_v44 }
  0x3b   : > { %3191 = vmatpush.bf16.msrb.mxu1 %v7129_v54  ;;  %v7465_v47 = vor.u32 %v8957_v37, %v7464_v35  ;;  %v7212_v49 = vld [vmem:[%s13728_s1 + $0xab8] sm:$0xf]  ;;  %v8894_v50 = vld [vmem:[%s13728_s1 + $0xad0] sm:$0xf0]  ;;  %v6736_v54 = vld [vmem:[%s13728_s1 + $0x700] sm:$0xf]  ;;  %v6989_v56 = vor.u32 %v8838_v48, %v6988_v46 }
  0x3c   : > { %3204 = vmatpush.bf16.msrb.mxu2 %v7353_v55  ;;  %v9775_v36 = vld [vmem:[#allocation1 + $0x12] sm:$0xff]  ;;  %v9780_v38 = vld [vmem:[#allocation1] sm:$0xff]  ;;  %v9785_v41 = vld [vmem:[#allocation1 + $0x9] sm:$0xff]  ;;  %v7213_v57 = vor.u32 %v8894_v50, %v7212_v49  ;;  %s9299_s14 = sshra.s32 %s5779_s15, 4  ;;  %s9300_s14 = int_to_ptr.hbm [resolvable:$true] %s9299_s14 }
  0x3d   : > { %3217 = vmatpush.bf16.msrb.mxu3 %v7577_v58  ;;  %3159 = vmatmul.bf16.vlgmr.msra.gmra.mxu2 %v9775_v36  ;;  %v9783_v40 = vld [vmem:[#allocation1 + $0x1b] sm:$0xff]  ;;  %v8950_v52 = vld [vmem:[%s13728_s1 + $0xc90] sm:$0xf0]  ;;  %v8597_v1 = vld [vmem:[%s13728_s1 + $0x18c] sm:$0xf]  ;;  %s9301_s17 = scalar_lea.hbm %s9300_s14, 1  ;;  %p9306_p0 = scmp.lt.s32.totalorder %s9300_s14, %s13734_s7 }
  0x3e   : > { %3179 = vmatpush.bf16.msrb.mxu0 %v6877_v0  ;;  %3172 = vmatmul.bf16.vlgmr.msra.gmra.mxu3 %v9783_v40  ;;  %v7436_v51 = vld [vmem:[%s13728_s1 + $0xc78] sm:$0xf]  ;;  %v8775_v55 = vld [vmem:[%s13728_s1 + $0x718] sm:$0xf0]  ;;  %v6960_v58 = vld [vmem:[%s13728_s1 + $0x8c0] sm:$0xf]  ;;  %p9302_p11 = scmp.ne.s32.totalorder %s9300_s14, %s9301_s17  ;;  %p9307_p1 = scmp.lt.s32.totalorder %s9305_s19, %s9301_s17 }
  0x3f   : > { %3192 = vmatpush.bf16.msrb.mxu1 %v7101_v2  ;;  %3133 = vmatmul.bf16.vlgmr.msra.gmra.mxu0 %v9780_v38  ;;  %v8831_v59 = vld [vmem:[%s13728_s1 + $0x8d8] sm:$0xf0]  ;;  %v7184_v60 = vld [vmem:[%s13728_s1 + $0xa80] sm:$0xf]  ;;  %v7437_v61 = vor.u32 %v8950_v52, %v7436_v51  ;;  %v6038_v2 = vld [vmem:[%s13728_s1 + $0x1a4] sm:$0xf0]  ;;  %v6737_v4 = vor.u32 %v8775_v55, %v6736_v54 }
  0x40   : > { %3205 = vmatpush.bf16.msrb.mxu2 %v7325_v3  ;;  %3146 = vmatmul.bf16.vlgmr.msra.gmra.mxu1 %v9785_v41  ;;  %v8887_v62 = vld [vmem:[%s13728_s1 + $0xa98] sm:$0xf0]  ;;  %v7408_v63 = vld [vmem:[%s13728_s1 + $0xc40] sm:$0xf]  ;;  %v8653_v3 = vld [vmem:[%s13728_s1 + $0x34c] sm:$0xf]  ;;  %v6961_v8 = vor.u32 %v8831_v59, %v6960_v58  ;;  %p9303_p12 = pnand %p9302_p11, %p9427_p5  ;;  %p9308_p2 = por %p9307_p1, %p9306_p0 }
  0x41   : > { %3218 = vmatpush.bf16.msrb.mxu3 %v7549_v6  ;;  %v8943_v0 = vld [vmem:[%s13728_s1 + $0xc58] sm:$0xf0]  ;;  %v6262_v5 = vld [vmem:[%s13728_s1 + $0x364] sm:$0xf0]  ;;  %v8709_v6 = vld [vmem:[%s13728_s1 + $0x50c] sm:$0xf]  ;;  %v7185_v9 = vor.u32 %v8887_v62, %v7184_v60 }
  0x42   : > { %3180 = vmatpush.bf16.msrb.mxu0 %v6849_v13  ;;  %v6486_v7 = vld [vmem:[%s13728_s1 + $0x524] sm:$0xf0]  ;;  %v8765_v10 = vld [vmem:[%s13728_s1 + $0x6cc] sm:$0xf]  ;;  %v7409_v12 = vor.u32 %v8943_v0, %v7408_v63  ;;  %v6041_v13 = vor.u32 %v8597_v1, %v6038_v2  ;;  %v8590_v16 = vld [vmem:[%s13728_s1 + $0x154] sm:$0xf]  ;;  %p9304_p13 = pneg %p9303_p12 }
  0x43   : > { %3193 = vmatpush.bf16.msrb.mxu1 %v7073_v14  ;;  %v6710_v11 = vld [vmem:[%s13728_s1 + $0x6e4] sm:$0xf0]  ;;  %v6265_v14 = vor.u32 %v8653_v3, %v6262_v5  ;;  %v6010_v17 = vld [vmem:[%s13728_s1 + $0x16c] sm:$0xf0]  ;;  %v8646_v18 = vld [vmem:[%s13728_s1 + $0x314] sm:$0xf] }
  0x44   : > { %3206 = vmatpush.bf16.msrb.mxu2 %v7297_v15  ;;  %v6489_v15 = vor.u32 %v8709_v6, %v6486_v7  ;;  %v6234_v20 = vld [vmem:[%s13728_s1 + $0x32c] sm:$0xf0]  ;;  %v8702_v21 = vld [vmem:[%s13728_s1 + $0x4d4] sm:$0xf]  ;;  %v6013_v26 = vor.u32 %v8590_v16, %v6010_v17  ;;  %v8583_v29 = vld [vmem:[%s13728_s1 + $0x11c] sm:$0xf]  ;;  %p9309_p3 = pnand %p9308_p2, %p9304_p13 }
  0x45   : > { %3219 = vmatpush.bf16.msrb.mxu3 %v7521_v19  ;;  %v6713_v19 = vor.u32 %v8765_v10, %v6710_v11  ;;  %v6458_v22 = vld [vmem:[%s13728_s1 + $0x4ec] sm:$0xf0]  ;;  %v8758_v23 = vld [vmem:[%s13728_s1 + $0x694] sm:$0xf]  ;;  %v5982_v30 = vld [vmem:[%s13728_s1 + $0x134] sm:$0xf0] }
  0x46   : > { %3181 = vmatpush.bf16.msrb.mxu0 %v6821_v25  ;;  %v6682_v24 = vld [vmem:[%s13728_s1 + $0x6ac] sm:$0xf0]  ;;  %v9886_v25 = vld [vmem:[#allocation1 + $0x36] sm:$0xff]  ;;  %v9907_v37 = vld [vmem:[#allocation1 + $0x24] sm:$0xff]  ;;  %v5985_v44 = vor.u32 %v8583_v29, %v5982_v30 }
  0x47   : > { %3194 = vmatpush.bf16.msrb.mxu1 %v7045_v27  ;;  %v6237_v27 = vor.u32 %v8646_v18, %v6234_v20  ;;  %v8639_v31 = vld [vmem:[%s13728_s1 + $0x2dc] sm:$0xf]  ;;  %v6206_v33 = vld [vmem:[%s13728_s1 + $0x2f4] sm:$0xf0]  ;;  %v9917_v45 = vld [vmem:[#allocation1 + $0x2d] sm:$0xff] }
  0x48   : > { %3207 = vmatpush.bf16.msrb.mxu2 %v7269_v28  ;;  %v6461_v28 = vor.u32 %v8702_v21, %v6458_v22  ;;  %v8695_v34 = vld [vmem:[%s13728_s1 + $0x49c] sm:$0xf]  ;;  %v6430_v35 = vld [vmem:[%s13728_s1 + $0x4b4] sm:$0xf0]  ;;  %v6209_v46 = vor.u32 %v8639_v31, %v6206_v33  ;;  %v8576_v48 = vld [vmem:[%s13728_s1 + $0xe4] sm:$0xf] }
  0x49   : > { %3220 = vmatpush.bf16.msrb.mxu3 %v7493_v32  ;;  %v6685_v32 = vor.u32 %v8758_v23, %v6682_v24  ;;  %v5954_v49 = vld [vmem:[%s13728_s1 + $0xfc] sm:$0xf0]  ;;  %v8632_v50 = vld [vmem:[%s13728_s1 + $0x2a4] sm:$0xf]  ;;  %v8569_v60 = vld [vmem:[%s13728_s1 + $0xac] sm:$0xf] }
  0x4a   : > { %3182 = vmatpush.bf16.msrb.mxu0 %v6793_v39  ;;  %v8751_v39 = vld [vmem:[%s13728_s1 + $0x65c] sm:$0xf]  ;;  %v6178_v52 = vld [vmem:[%s13728_s1 + $0x2bc] sm:$0xf0]  ;;  %v8744_v55 = vld [vmem:[%s13728_s1 + $0x624] sm:$0xf] }
  0x4b   : > { %3195 = vmatpush.bf16.msrb.mxu1 %v7017_v42  ;;  %v6654_v42 = vld [vmem:[%s13728_s1 + $0x674] sm:$0xf0]  ;;  %v6402_v54 = vld [vmem:[%s13728_s1 + $0x47c] sm:$0xf0]  ;;  %v6181_v58 = vor.u32 %v8632_v50, %v6178_v52  ;;  %v8625_v62 = vld [vmem:[%s13728_s1 + $0x26c] sm:$0xf] }
  0x4c   : > { %3208 = vmatpush.bf16.msrb.mxu2 %v7241_v43  ;;  %v9915_v43 = vld [vmem:[#allocation1 + $0x3f] sm:$0xff]  ;;  %v6657_v51 = vor.u32 %v8751_v39, %v6654_v42  ;;  %v6150_v0 = vld [vmem:[%s13728_s1 + $0x284] sm:$0xf0]  ;;  %v8681_v1 = vld [vmem:[%s13728_s1 + $0x42c] sm:$0xf] }
  0x4d   : > { %3221 = vmatpush.bf16.msrb.mxu3 %v7465_v47  ;;  %v6433_v47 = vor.u32 %v8695_v34, %v6430_v35  ;;  %v6374_v2 = vld [vmem:[%s13728_s1 + $0x444] sm:$0xf0]  ;;  %v8737_v3 = vld [vmem:[%s13728_s1 + $0x5ec] sm:$0xf]  ;;  %v6153_v6 = vor.u32 %v8625_v62, %v6150_v0  ;;  %v8618_v10 = vld [vmem:[%s13728_s1 + $0x234] sm:$0xf] }
  0x4e   : > { %3183 = vmatpush.bf16.msrb.mxu0 %v6765_v53  ;;  %v8688_v53 = vld [vmem:[%s13728_s1 + $0x464] sm:$0xf]  ;;  %v6377_v7 = vor.u32 %v8681_v1, %v6374_v2  ;;  %v6570_v16 = vld [vmem:[%s13728_s1 + $0x5cc] sm:$0xf0]  ;;  %v8555_v20 = vld [vmem:[%s13728_s1 + $0x3c] sm:$0xf] }
  0x4f   : > { %3196 = vmatpush.bf16.msrb.mxu1 %v6989_v56  ;;  %v6626_v56 = vld [vmem:[%s13728_s1 + $0x63c] sm:$0xf0]  ;;  %v6405_v59 = vor.u32 %v8688_v53, %v6402_v54  ;;  %v5870_v21 = vld [vmem:[%s13728_s1 + $0x54] sm:$0xf0]  ;;  %v8611_v22 = vld [vmem:[%s13728_s1 + $0x1fc] sm:$0xf] }
  0x50   : > { %3209 = vmatpush.bf16.msrb.mxu2 %v7213_v57  ;;  %v5957_v57 = vor.u32 %v8576_v48, %v5954_v49  ;;  %v6629_v63 = vor.u32 %v8744_v55, %v6626_v56  ;;  %v6094_v24 = vld [vmem:[%s13728_s1 + $0x214] sm:$0xf0]  ;;  %v5873_v30 = vor.u32 %v8555_v20, %v5870_v21  ;;  %v8548_v31 = vld [vmem:[%s13728_s1 + $0x4] sm:$0xf]  ;;  %v6066_v39 = vld [vmem:[%s13728_s1 + $0x1dc] sm:$0xf0] }
  0x51   : > { %3222 = vmatpush.bf16.msrb.mxu3 %v7437_v61  ;;  %v5926_v61 = vld [vmem:[%s13728_s1 + $0xc4] sm:$0xf0]  ;;  %v6542_v29 = vld [vmem:[%s13728_s1 + $0x594] sm:$0xf0]  ;;  %v6097_v33 = vor.u32 %v8611_v22, %v6094_v24  ;;  %v8604_v35 = vld [vmem:[%s13728_s1 + $0x1c4] sm:$0xf] }
  0x52   : > { %3184 = vmatpush.bf16.msrb.mxu0 %v6737_v4  ;;  %v6598_v4 = vld [vmem:[%s13728_s1 + $0x604] sm:$0xf0]  ;;  %v5929_v5 = vor.u32 %v8569_v60, %v5926_v61  ;;  %v8660_v42 = vld [vmem:[%s13728_s1 + $0x384] sm:$0xf]  ;;  %v6514_v48 = vld [vmem:[%s13728_s1 + $0x55c] sm:$0xf0]  ;;  %v6069_v56 = vor.u32 %v8604_v35, %v6066_v39 }
  0x53   : > { %3197 = vmatpush.bf16.msrb.mxu1 %v6961_v8  ;;  %v8562_v8 = vld [vmem:[%s13728_s1 + $0x74] sm:$0xf]  ;;  %v6601_v11 = vor.u32 %v8737_v3, %v6598_v4  ;;  %v8821_v49 = vld [vmem:[%s13728_s1 + $0x88c] sm:$0xf]  ;;  %v6934_v50 = vld [vmem:[%s13728_s1 + $0x8a4] sm:$0xf0] }
  0x54   : > { %3210 = vmatpush.bf16.msrb.mxu2 %v7185_v9  ;;  %v5898_v9 = vld [vmem:[%s13728_s1 + $0x8c] sm:$0xf0]  ;;  %v7158_v53 = vld [vmem:[%s13728_s1 + $0xa64] sm:$0xf0]  ;;  %v8933_v54 = vld [vmem:[%s13728_s1 + $0xc0c] sm:$0xf]  ;;  %v6937_v61 = vor.u32 %v8821_v49, %v6934_v50 }
  0x55   : > { %3223 = vmatpush.bf16.msrb.mxu3 %v7409_v12  ;;  %3185 = vmatmul.bf16.vlgmr.msrb.gmra.mxu0 %v9907_v37  ;;  %v6122_v12 = vld [vmem:[%s13728_s1 + $0x24c] sm:$0xf0]  ;;  %v5901_v17 = vor.u32 %v8562_v8, %v5898_v9  ;;  %v7382_v55 = vld [vmem:[%s13728_s1 + $0xc24] sm:$0xf0]  ;;  %v8814_v0 = vld [vmem:[%s13728_s1 + $0x854] sm:$0xf] }
  0x56   : > { %3229 = vmatpush.bf16.msra.mxu0 %v6041_v13  ;;  %3198 = vmatmul.bf16.vlgmr.msrb.gmra.mxu1 %v9917_v45  ;;  %v8674_v13 = vld [vmem:[%s13728_s1 + $0x3f4] sm:$0xf]  ;;  %v6125_v18 = vor.u32 %v8618_v10, %v6122_v12  ;;  %v6906_v1 = vld [vmem:[%s13728_s1 + $0x86c] sm:$0xf0]  ;;  %v8807_v12 = vld [vmem:[%s13728_s1 + $0x81c] sm:$0xf] }
  0x57   : > { %3242 = vmatpush.bf16.msra.mxu1 %v6265_v14  ;;  %3211 = vmatmul.bf16.vlgmr.msrb.gmra.mxu2 %v9886_v25  ;;  %v6346_v14 = vld [vmem:[%s13728_s1 + $0x40c] sm:$0xf0]  ;;  %v8870_v2 = vld [vmem:[%s13728_s1 + $0xa14] sm:$0xf]  ;;  %v6909_v9 = vor.u32 %v8814_v0, %v6906_v1  ;;  %v7550_v20 = vld [vmem:[%s13728_s1 + $0xd74] sm:$0xf0] }
  0x58   : > { %3255 = vmatpush.bf16.msra.mxu2 %v6489_v15  ;;  %3224 = vmatmul.bf16.vlgmr.msrb.gmra.mxu3 %v9915_v43  ;;  %v8730_v15 = vld [vmem:[%s13728_s1 + $0x5b4] sm:$0xf]  ;;  %v7130_v4 = vld [vmem:[%s13728_s1 + $0xa2c] sm:$0xf0]  ;;  %v8800_v24 = vld [vmem:[%s13728_s1 + $0x7e4] sm:$0xf] }
  0x59   : > { %3268 = vmatpush.bf16.msra.mxu3 %v6713_v19  ;;  %v6349_v19 = vor.u32 %v8674_v13, %v6346_v14  ;;  %v6573_v23 = vor.u32 %v8730_v15, %v6570_v16  ;;  %v7578_v8 = vld [vmem:[%s13728_s1 + $0xdac] sm:$0xf0]  ;;  %v7133_v10 = vor.u32 %v8870_v2, %v7130_v4  ;;  %v6878_v13 = vld [vmem:[%s13728_s1 + $0x834] sm:$0xf0]  ;;  %v8863_v14 = vld [vmem:[%s13728_s1 + $0x9dc] sm:$0xf] }
  0x5a   : > { %3230 = vmatpush.bf16.msra.mxu0 %v6013_v26  ;;  %v8667_v26 = vld [vmem:[%s13728_s1 + $0x3bc] sm:$0xf]  ;;  %v7102_v16 = vld [vmem:[%s13728_s1 + $0x9f4] sm:$0xf0]  ;;  %v6881_v21 = vor.u32 %v8807_v12, %v6878_v13  ;;  %v8905_v49 = vld [vmem:[%s13728_s1 + $0xb2c] sm:$0xf] }
  0x5b   : > { %3243 = vmatpush.bf16.msra.mxu1 %v6237_v27  ;;  %v6318_v27 = vld [vmem:[%s13728_s1 + $0x3d4] sm:$0xf0]  ;;  %v7105_v22 = vor.u32 %v8863_v14, %v7102_v16  ;;  %v7270_v50 = vld [vmem:[%s13728_s1 + $0xb44] sm:$0xf0]  ;;  %v7466_v0 = vld [vmem:[%s13728_s1 + $0xccc] sm:$0xf0] }
  0x5c   : > { %3256 = vmatpush.bf16.msra.mxu2 %v6461_v28  ;;  %v8723_v28 = vld [vmem:[%s13728_s1 + $0x57c] sm:$0xf]  ;;  %v6321_v34 = vor.u32 %v8667_v26, %v6318_v27  ;;  %v6850_v26 = vld [vmem:[%s13728_s1 + $0x7fc] sm:$0xf0]  ;;  %v8856_v27 = vld [vmem:[%s13728_s1 + $0x9a4] sm:$0xf] }
  0x5d   : > { %3269 = vmatpush.bf16.msra.mxu3 %v6685_v32  ;;  %v5842_v32 = vld [vmem:[%s13728_s1 + $0x1c] sm:$0xf0]  ;;  %v8779_v4 = vld [vmem:[%s13728_s1 + $0x73c] sm:$0xf]  ;;  %v7438_v12 = vld [vmem:[%s13728_s1 + $0xc94] sm:$0xf0] }
  0x5e   : > { %3231 = vmatpush.bf16.msra.mxu0 %v5985_v44  ;;  %v6545_v44 = vor.u32 %v8723_v28, %v6542_v29  ;;  %v5845_v52 = vor.u32 %v8548_v31, %v5842_v32  ;;  %v7074_v29 = vld [vmem:[%s13728_s1 + $0x9bc] sm:$0xf0]  ;;  %v8968_v32 = vld [vmem:[%s13728_s1 + $0xd24] sm:$0xf] }
  0x5f   : > { %3244 = vmatpush.bf16.msra.mxu1 %v6209_v46  ;;  %v6290_v46 = vld [vmem:[%s13728_s1 + $0x39c] sm:$0xf0]  ;;  %v7077_v35 = vor.u32 %v8856_v27, %v7074_v29  ;;  %v8772_v14 = vld [vmem:[%s13728_s1 + $0x704] sm:$0xf]  ;;  %v8601_v27 = vld [vmem:[%s13728_s1 + $0x1a8] sm:$0xf0] }
  0x60   : > { %3257 = vmatpush.bf16.msra.mxu2 %v6433_v47  ;;  %v8716_v47 = vld [vmem:[%s13728_s1 + $0x544] sm:$0xf]  ;;  %v7298_v31 = vld [vmem:[%s13728_s1 + $0xb7c] sm:$0xf0] }
  0x61   : > { %3270 = vmatpush.bf16.msra.mxu3 %v6657_v51  ;;  %v8877_v51 = vld [vmem:[%s13728_s1 + $0xa4c] sm:$0xf]  ;;  %v6517_v60 = vor.u32 %v8716_v47, %v6514_v48  ;;  %v7046_v48 = vld [vmem:[%s13728_s1 + $0x984] sm:$0xf0] }
  0x62   : > { %3232 = vmatpush.bf16.msra.mxu0 %v5957_v57  ;;  %v6293_v57 = vor.u32 %v8660_v42, %v6290_v46  ;;  %v7161_v62 = vor.u32 %v8877_v51, %v7158_v53  ;;  %v8793_v42 = vld [vmem:[%s13728_s1 + $0x7ac] sm:$0xf] }
  0x63   : > { %3245 = vmatpush.bf16.msra.mxu1 %v6181_v58  ;;  %v8989_v58 = vld [vmem:[%s13728_s1 + $0xdcc] sm:$0xf] }
  0x64   : > { %3258 = vmatpush.bf16.msra.mxu2 %v6405_v59  ;;  %v7606_v59 = vld [vmem:[%s13728_s1 + $0xde4] sm:$0xf0]  ;;  %v8849_v46 = vld [vmem:[%s13728_s1 + $0x96c] sm:$0xf] }
  0x65   : > { %3271 = vmatpush.bf16.msra.mxu3 %v6629_v63  ;;  %v7385_v63 = vor.u32 %v8933_v54, %v7382_v55  ;;  %v7609_v3 = vor.u32 %v8989_v58, %v7606_v59  ;;  %v8961_v51 = vld [vmem:[%s13728_s1 + $0xcec] sm:$0xf]  ;;  %v7049_v54 = vor.u32 %v8849_v46, %v7046_v48  ;;  %v7273_v55 = vor.u32 %v8905_v49, %v7270_v50  ;;  %v8842_v58 = vld [vmem:[%s13728_s1 + $0x934] sm:$0xf]  ;;  %v6016_v48 = vld [vmem:[%s13728_s1 + $0x158] sm:$0xf] }
  0x66   : > { %3233 = vmatpush.bf16.msra.mxu0 %v5929_v5  ;;  %v8926_v5 = vld [vmem:[%s13728_s1 + $0xbd4] sm:$0xf]  ;;  %v6240_v50 = vld [vmem:[%s13728_s1 + $0x318] sm:$0xf] }
  0x67   : > { %3246 = vmatpush.bf16.msra.mxu1 %v6153_v6  ;;  %v7354_v6 = vld [vmem:[%s13728_s1 + $0xbec] sm:$0xf0]  ;;  %v8594_v49 = vld [vmem:[%s13728_s1 + $0x170] sm:$0xf0] }
  0x68   : > { %3259 = vmatpush.bf16.msra.mxu2 %v6377_v7  ;;  %v8982_v7 = vld [vmem:[%s13728_s1 + $0xd94] sm:$0xf] }
  0x69   : > { %3272 = vmatpush.bf16.msra.mxu3 %v6601_v11  ;;  %v7357_v11 = vor.u32 %v8926_v5, %v7354_v6  ;;  %v7581_v15 = vor.u32 %v8982_v7, %v7578_v8  ;;  %v6766_v5 = vld [vmem:[%s13728_s1 + $0x754] sm:$0xf0]  ;;  %v8835_v6 = vld [vmem:[%s13728_s1 + $0x8fc] sm:$0xf] }
  0x6a   : > { %3234 = vmatpush.bf16.msra.mxu0 %v5901_v17  ;;  %v8919_v17 = vld [vmem:[%s13728_s1 + $0xb9c] sm:$0xf]  ;;  %v6990_v8 = vld [vmem:[%s13728_s1 + $0x914] sm:$0xf0]  ;;  %v6769_v13 = vor.u32 %v8779_v4, %v6766_v5 }
  0x6b   : > { %3247 = vmatpush.bf16.msra.mxu1 %v6125_v18  ;;  %v7326_v18 = vld [vmem:[%s13728_s1 + $0xbb4] sm:$0xf0]  ;;  %v6993_v16 = vor.u32 %v8835_v6, %v6990_v8 }
  0x6c   : > { %3260 = vmatpush.bf16.msra.mxu2 %v6349_v19  ;;  %v8975_v19 = vld [vmem:[%s13728_s1 + $0xd5c] sm:$0xf] }
  0x6d   : > { %3273 = vmatpush.bf16.msra.mxu3 %v6573_v23  ;;  %v7329_v23 = vor.u32 %v8919_v17, %v7326_v18  ;;  %v7553_v28 = vor.u32 %v8975_v19, %v7550_v20  ;;  %v8828_v18 = vld [vmem:[%s13728_s1 + $0x8c4] sm:$0xf]  ;;  %v6962_v19 = vld [vmem:[%s13728_s1 + $0x8dc] sm:$0xf0] }
  0x6e   : > { %3235 = vmatpush.bf16.msra.mxu0 %v5873_v30  ;;  %v8912_v30 = vld [vmem:[%s13728_s1 + $0xb64] sm:$0xf] }
  0x6f   : > { %3248 = vmatpush.bf16.msra.mxu1 %v6097_v33  ;;  %v7522_v33 = vld [vmem:[%s13728_s1 + $0xd3c] sm:$0xf0]  ;;  %v7301_v39 = vor.u32 %v8912_v30, %v7298_v31  ;;  %v8884_v20 = vld [vmem:[%s13728_s1 + $0xa84] sm:$0xf]  ;;  %v8657_v30 = vld [vmem:[%s13728_s1 + $0x368] sm:$0xf0] }
  0x70   : > { %3261 = vmatpush.bf16.msra.mxu2 %v6321_v34  ;;  %v6853_v34 = vor.u32 %v8800_v24, %v6850_v26  ;;  %v7525_v47 = vor.u32 %v8968_v32, %v7522_v33  ;;  %v7410_v24 = vld [vmem:[%s13728_s1 + $0xc5c] sm:$0xf0]  ;;  %v6044_v26 = vld [vmem:[%s13728_s1 + $0x190] sm:$0xf]  ;;  %v8713_v32 = vld [vmem:[%s13728_s1 + $0x528] sm:$0xf0]  ;;  %v6965_v33 = vor.u32 %v8828_v18, %v6962_v19 }
  0x71   : > { %3274 = vmatpush.bf16.msra.mxu3 %v6545_v44  ;;  %v6822_v44 = vld [vmem:[%s13728_s1 + $0x7c4] sm:$0xf0]  ;;  %v6492_v31 = vld [vmem:[%s13728_s1 + $0x510] sm:$0xf] }
  0x72   : > { %3236 = vmatpush.bf16.msra.mxu0 %v5845_v52  ;;  %v7494_v52 = vld [vmem:[%s13728_s1 + $0xd04] sm:$0xf0]  ;;  %v6825_v53 = vor.u32 %v8793_v42, %v6822_v44  ;;  %v6045_v44 = vor.u32 %v8601_v27, %v6044_v26  ;;  %v6156_v18 = vld [vmem:[%s13728_s1 + $0x270] sm:$0xf] }
  0x73   : > { %3249 = vmatpush.bf16.msra.mxu1 %v6069_v56  ;;  %v8786_v56 = vld [vmem:[%s13728_s1 + $0x774] sm:$0xf]  ;;  %v7497_v59 = vor.u32 %v8961_v51, %v7494_v52 }
  0x74   : > { %3262 = vmatpush.bf16.msra.mxu2 %v6293_v57  ;;  %v6794_v57 = vld [vmem:[%s13728_s1 + $0x78c] sm:$0xf0]  ;;  %v8650_v52 = vld [vmem:[%s13728_s1 + $0x330] sm:$0xf0] }
  0x75   : > { %3275 = vmatpush.bf16.msra.mxu3 %v6517_v60  ;;  %3237 = vmatmul.bf16.vlgmr.msra.gmra.mxu0 %v9780_v38  ;;  %v7018_v60 = vld [vmem:[%s13728_s1 + $0x94c] sm:$0xf0]  ;;  %v6797_v1 = vor.u32 %v8786_v56, %v6794_v57  ;;  %v8762_v56 = vld [vmem:[%s13728_s1 + $0x6b0] sm:$0xf0]  ;;  %v6017_v57 = vor.u32 %v8594_v49, %v6016_v48  ;;  %v5876_v48 = vld [vmem:[%s13728_s1 + $0x40] sm:$0xf] }
  0x76   : > { %3281 = vmatpush.bf16.msrb.mxu0 %v6937_v61  ;;  %3250 = vmatmul.bf16.vlgmr.msra.gmra.mxu1 %v9785_v41  ;;  %v8898_v61 = vld [vmem:[%s13728_s1 + $0xaf4] sm:$0xf]  ;;  %v7021_v2 = vor.u32 %v8842_v58, %v7018_v60  ;;  %v6241_v58 = vor.u32 %v8650_v52, %v6240_v50  ;;  %v5988_v60 = vld [vmem:[%s13728_s1 + $0x120] sm:$0xf]  ;;  %v8559_v49 = vld [vmem:[%s13728_s1 + $0x58] sm:$0xf0] }
  0x77   : > { %3294 = vmatpush.bf16.msrb.mxu1 %v7161_v62  ;;  %3263 = vmatmul.bf16.vlgmr.msra.gmra.mxu2 %v9775_v36  ;;  %v7242_v62 = vld [vmem:[%s13728_s1 + $0xb0c] sm:$0xf0]  ;;  %v6100_v50 = vld [vmem:[%s13728_s1 + $0x200] sm:$0xf]  ;;  %v8615_v52 = vld [vmem:[%s13728_s1 + $0x218] sm:$0xf0] }
  0x78   : > { %3307 = vmatpush.bf16.msrb.mxu2 %v7385_v63  ;;  %3276 = vmatmul.bf16.vlgmr.msra.gmra.mxu3 %v9783_v40  ;;  %v8954_v63 = vld [vmem:[%s13728_s1 + $0xcb4] sm:$0xf] }
  0x79   : > { %3320 = vmatpush.bf16.msrb.mxu3 %v7609_v3  ;;  %v7245_v3 = vor.u32 %v8898_v61, %v7242_v62  ;;  %v7469_v7 = vor.u32 %v8954_v63, %v7466_v0  ;;  %v8587_v61 = vld [vmem:[%s13728_s1 + $0x138] sm:$0xf0]  ;;  %v6212_v62 = vld [vmem:[%s13728_s1 + $0x2e0] sm:$0xf] }
  0x7a   : > { %3282 = vmatpush.bf16.msrb.mxu0 %v6909_v9  ;;  %v8891_v9 = vld [vmem:[%s13728_s1 + $0xabc] sm:$0xf]  ;;  %v5989_v4 = vor.u32 %v8587_v61, %v5988_v60  ;;  %v6101_v60 = vor.u32 %v8615_v52, %v6100_v50  ;;  %v8916_v50 = vld [vmem:[%s13728_s1 + $0xb80] sm:$0xf0] }
  0x7b   : > { %3295 = vmatpush.bf16.msrb.mxu1 %v7133_v10  ;;  %v7214_v10 = vld [vmem:[%s13728_s1 + $0xad4] sm:$0xf0]  ;;  %v8643_v0 = vld [vmem:[%s13728_s1 + $0x2f8] sm:$0xf0]  ;;  %v8972_v52 = vld [vmem:[%s13728_s1 + $0xd40] sm:$0xf0] }
  0x7c   : > { %3308 = vmatpush.bf16.msrb.mxu2 %v7357_v11  ;;  %v8947_v11 = vld [vmem:[%s13728_s1 + $0xc7c] sm:$0xf]  ;;  %v7217_v17 = vor.u32 %v8891_v9, %v7214_v10  ;;  %v6213_v5 = vor.u32 %v8643_v0, %v6212_v62  ;;  %v6408_v9 = vld [vmem:[%s13728_s1 + $0x468] sm:$0xf]  ;;  %v8692_v10 = vld [vmem:[%s13728_s1 + $0x480] sm:$0xf0] }
  0x7d   : > { %3321 = vmatpush.bf16.msrb.mxu3 %v7581_v15  ;;  %v6738_v15 = vld [vmem:[%s13728_s1 + $0x71c] sm:$0xf0]  ;;  %v6072_v62 = vld [vmem:[%s13728_s1 + $0x1c8] sm:$0xf] }
  0x7e   : > { %3283 = vmatpush.bf16.msrb.mxu0 %v6881_v21  ;;  %v7441_v21 = vor.u32 %v8947_v11, %v7438_v12  ;;  %v6741_v29 = vor.u32 %v8772_v14, %v6738_v15  ;;  %v6632_v11 = vld [vmem:[%s13728_s1 + $0x628] sm:$0xf]  ;;  %v8748_v12 = vld [vmem:[%s13728_s1 + $0x640] sm:$0xf0]  ;;  %v6409_v15 = vor.u32 %v8692_v10, %v6408_v9  ;;  %v7612_v10 = vld [vmem:[%s13728_s1 + $0xdd0] sm:$0xf] }
  0x7f   : > { %3296 = vmatpush.bf16.msrb.mxu1 %v7105_v22  ;;  %v7186_v22 = vld [vmem:[%s13728_s1 + $0xa9c] sm:$0xf0]  ;;  %v6633_v19 = vor.u32 %v8748_v12, %v6632_v11  ;;  %v6296_v0 = vld [vmem:[%s13728_s1 + $0x388] sm:$0xf]  ;;  %v8993_v11 = vld [vmem:[%s13728_s1 + $0xde8] sm:$0xf0] }
  0x80   : > { %3309 = vmatpush.bf16.msrb.mxu2 %v7329_v23  ;;  %v8940_v23 = vld [vmem:[%s13728_s1 + $0xc44] sm:$0xf] }
  0x81   : > { %3322 = vmatpush.bf16.msrb.mxu3 %v7553_v28  ;;  %v6268_v28 = vld [vmem:[%s13728_s1 + $0x350] sm:$0xf]  ;;  %v7413_v42 = vor.u32 %v8940_v23, %v7410_v24  ;;  %v8741_v24 = vld [vmem:[%s13728_s1 + $0x608] sm:$0xf0] }
  0x82   : > { %3284 = vmatpush.bf16.msrb.mxu0 %v6853_v34  ;;  %v7189_v34 = vor.u32 %v8884_v20, %v7186_v22  ;;  %v6269_v46 = vor.u32 %v8657_v30, %v6268_v28  ;;  %v8629_v20 = vld [vmem:[%s13728_s1 + $0x288] sm:$0xf0]  ;;  %v6604_v23 = vld [vmem:[%s13728_s1 + $0x5f0] sm:$0xf]  ;;  %v8566_v30 = vld [vmem:[%s13728_s1 + $0x90] sm:$0xf0] }
  0x83   : > { %3297 = vmatpush.bf16.msrb.mxu1 %v7077_v35  ;;  %v6716_v35 = vld [vmem:[%s13728_s1 + $0x6d0] sm:$0xf]  ;;  %v8685_v22 = vld [vmem:[%s13728_s1 + $0x448] sm:$0xf0]  ;;  %v6157_v27 = vor.u32 %v8629_v20, %v6156_v18  ;;  %v7136_v18 = vld [vmem:[%s13728_s1 + $0xa18] sm:$0xf] }
  0x84   : > { %3310 = vmatpush.bf16.msrb.mxu2 %v7301_v39  ;;  %v8769_v39 = vld [vmem:[%s13728_s1 + $0x6e8] sm:$0xf0]  ;;  %v8874_v20 = vld [vmem:[%s13728_s1 + $0xa30] sm:$0xf0] }
  0x85   : > { %3323 = vmatpush.bf16.msrb.mxu3 %v7525_v47  ;;  %v6493_v47 = vor.u32 %v8713_v32, %v6492_v31  ;;  %v6717_v51 = vor.u32 %v8769_v39, %v6716_v35  ;;  %v6128_v31 = vld [vmem:[%s13728_s1 + $0x238] sm:$0xf]  ;;  %v6605_v32 = vor.u32 %v8741_v24, %v6604_v23  ;;  %v8678_v35 = vld [vmem:[%s13728_s1 + $0x410] sm:$0xf0] }
  0x86   : > { %3285 = vmatpush.bf16.msrb.mxu0 %v6825_v53  ;;  %v6464_v53 = vld [vmem:[%s13728_s1 + $0x4d8] sm:$0xf]  ;;  %v8986_v24 = vld [vmem:[%s13728_s1 + $0xdb0] sm:$0xf0] }
  0x87   : > { %3298 = vmatpush.bf16.msrb.mxu1 %v7049_v54  ;;  %v8706_v54 = vld [vmem:[%s13728_s1 + $0x4f0] sm:$0xf0]  ;;  %v6576_v39 = vld [vmem:[%s13728_s1 + $0x5b8] sm:$0xf] }
  0x88   : > { %3311 = vmatpush.bf16.msrb.mxu2 %v7273_v55  ;;  %v6688_v55 = vld [vmem:[%s13728_s1 + $0x698] sm:$0xf] }
  0x89   : > { %3324 = vmatpush.bf16.msrb.mxu3 %v7497_v59  ;;  %v6465_v59 = vor.u32 %v8706_v54, %v6464_v53  ;;  %v6689_v63 = vor.u32 %v8762_v56, %v6688_v55  ;;  %v6324_v53 = vld [vmem:[%s13728_s1 + $0x3c0] sm:$0xf]  ;;  %v8671_v54 = vld [vmem:[%s13728_s1 + $0x3d8] sm:$0xf0]  ;;  %v7584_v23 = vld [vmem:[%s13728_s1 + $0xd98] sm:$0xf] }
  0x8a   : > { %3286 = vmatpush.bf16.msrb.mxu0 %v6797_v1  ;;  %v6436_v1 = vld [vmem:[%s13728_s1 + $0x4a0] sm:$0xf]  ;;  %v8727_v56 = vld [vmem:[%s13728_s1 + $0x598] sm:$0xf0]  ;;  %v6325_v61 = vor.u32 %v8671_v54, %v6324_v53 }
  0x8b   : > { %3299 = vmatpush.bf16.msrb.mxu1 %v7021_v2  ;;  %v8699_v2 = vld [vmem:[%s13728_s1 + $0x4b8] sm:$0xf0]  ;;  %v6548_v55 = vld [vmem:[%s13728_s1 + $0x580] sm:$0xf] }
  0x8c   : > { %3312 = vmatpush.bf16.msrb.mxu2 %v7245_v3  ;;  %v8755_v3 = vld [vmem:[%s13728_s1 + $0x678] sm:$0xf0]  ;;  %v6437_v6 = vor.u32 %v8699_v2, %v6436_v1  ;;  %v6549_v1 = vor.u32 %v8727_v56, %v6548_v55  ;;  %v8664_v2 = vld [vmem:[%s13728_s1 + $0x3a0] sm:$0xf0]  ;;  %v6828_v56 = vld [vmem:[%s13728_s1 + $0x7b0] sm:$0xf] }
  0x8d   : > { %3325 = vmatpush.bf16.msrb.mxu3 %v7469_v7  ;;  %v6184_v7 = vld [vmem:[%s13728_s1 + $0x2a8] sm:$0xf]  ;;  %v6297_v9 = vor.u32 %v8664_v2, %v6296_v0  ;;  %v8965_v0 = vld [vmem:[%s13728_s1 + $0xd08] sm:$0xf0] }
  0x8e   : > { %3287 = vmatpush.bf16.msrb.mxu0 %v6769_v13 }
  0x8f   : > { %3300 = vmatpush.bf16.msrb.mxu1 %v6993_v16  ;;  %v5932_v16 = vld [vmem:[%s13728_s1 + $0xb0] sm:$0xf] }
  0x90   : > { %3313 = vmatpush.bf16.msrb.mxu2 %v7217_v17  ;;  %v8573_v17 = vld [vmem:[%s13728_s1 + $0xc8] sm:$0xf0] }
  0x91   : > { %3326 = vmatpush.bf16.msrb.mxu3 %v7441_v21  ;;  %v6380_v21 = vld [vmem:[%s13728_s1 + $0x430] sm:$0xf]  ;;  %v5933_v26 = vor.u32 %v8573_v17, %v5932_v16  ;;  %v6912_v16 = vld [vmem:[%s13728_s1 + $0x858] sm:$0xf]  ;;  %v8818_v17 = vld [vmem:[%s13728_s1 + $0x870] sm:$0xf0] }
  0x92   : > { %3288 = vmatpush.bf16.msrb.mxu0 %v6741_v29  ;;  %v6381_v28 = vor.u32 %v8685_v22, %v6380_v21  ;;  %v5904_v29 = vld [vmem:[%s13728_s1 + $0x78] sm:$0xf]  ;;  %v8930_v22 = vld [vmem:[%s13728_s1 + $0xbf0] sm:$0xf0] }
  0x93   : > { %3301 = vmatpush.bf16.msrb.mxu1 %v6965_v33  ;;  %v8622_v33 = vld [vmem:[%s13728_s1 + $0x250] sm:$0xf0]  ;;  %v7360_v21 = vld [vmem:[%s13728_s1 + $0xbd8] sm:$0xf] }
  0x94   : > { %3314 = vmatpush.bf16.msrb.mxu2 %v7189_v34  ;;  %v6352_v34 = vld [vmem:[%s13728_s1 + $0x3f8] sm:$0xf] }
  0x95   : > { %3327 = vmatpush.bf16.msrb.mxu3 %v7413_v42  ;;  %3289 = vmatmul.bf16.vlgmr.msrb.gmra.mxu0 %v9907_v37  ;;  %v5960_v37 = vld [vmem:[%s13728_s1 + $0xe8] sm:$0xf]  ;;  %v8734_v42 = vld [vmem:[%s13728_s1 + $0x5d0] sm:$0xf0] }
  0x96   : > { %3333 = vmatpush.bf16.msra.mxu0 %v6045_v44  ;;  %3302 = vmatmul.bf16.vlgmr.msrb.gmra.mxu1 %v9917_v45  ;;  %v8636_v45 = vld [vmem:[%s13728_s1 + $0x2c0] sm:$0xf0]  ;;  %v5905_v44 = vor.u32 %v8566_v30, %v5904_v29  ;;  %v6884_v29 = vld [vmem:[%s13728_s1 + $0x820] sm:$0xf]  ;;  %v8811_v30 = vld [vmem:[%s13728_s1 + $0x838] sm:$0xf0] }
  0x97   : > { %3346 = vmatpush.bf16.msra.mxu1 %v6269_v46  ;;  %3315 = vmatmul.bf16.vlgmr.msrb.gmra.mxu2 %v9886_v25  ;;  %v6660_v25 = vld [vmem:[%s13728_s1 + $0x660] sm:$0xf]  ;;  %v6185_v14 = vor.u32 %v8636_v45, %v6184_v7  ;;  %v6129_v46 = vor.u32 %v8622_v33, %v6128_v31  ;;  %v7388_v7 = vld [vmem:[%s13728_s1 + $0xc10] sm:$0xf]  ;;  %v8867_v33 = vld [vmem:[%s13728_s1 + $0x9f8] sm:$0xf0] }
  0x98   : > { %3359 = vmatpush.bf16.msra.mxu2 %v6493_v47  ;;  %3328 = vmatmul.bf16.vlgmr.msrb.gmra.mxu3 %v9915_v43  ;;  %v8580_v43 = vld [vmem:[%s13728_s1 + $0x100] sm:$0xf0]  ;;  %v6661_v8 = vor.u32 %v8755_v3, %v6660_v25  ;;  %v6353_v47 = vor.u32 %v8678_v35, %v6352_v34  ;;  %v6520_v25 = vld [vmem:[%s13728_s1 + $0x548] sm:$0xf]  ;;  %v7108_v31 = vld [vmem:[%s13728_s1 + $0x9e0] sm:$0xf] }
  0x99   : > { %3372 = vmatpush.bf16.msra.mxu3 %v6717_v51  ;;  %v5961_v13 = vor.u32 %v8580_v43, %v5960_v37  ;;  %v6577_v51 = vor.u32 %v8734_v42, %v6576_v39  ;;  %v8720_v3 = vld [vmem:[%s13728_s1 + $0x560] sm:$0xf0]  ;;  %v8881_v43 = vld [vmem:[%s13728_s1 + $0xa68] sm:$0xf0]  ;;  %v7332_v34 = vld [vmem:[%s13728_s1 + $0xba0] sm:$0xf] }
  0x9a   : > { %3334 = vmatpush.bf16.msra.mxu0 %v6017_v57  ;;  %v5877_v57 = vor.u32 %v8559_v49, %v5876_v48  ;;  %v6521_v12 = vor.u32 %v8720_v3, %v6520_v25  ;;  %v8923_v35 = vld [vmem:[%s13728_s1 + $0xbb8] sm:$0xf0]  ;;  %v7556_v39 = vld [vmem:[%s13728_s1 + $0xd60] sm:$0xf]  ;;  %v8804_v48 = vld [vmem:[%s13728_s1 + $0x800] sm:$0xf0] }
  0x9b   : > { %3347 = vmatpush.bf16.msra.mxu1 %v6241_v58  ;;  %v5848_v58 = vld [vmem:[%s13728_s1 + $0x8] sm:$0xf]  ;;  %v8979_v42 = vld [vmem:[%s13728_s1 + $0xd78] sm:$0xf0]  ;;  %v6800_v3 = vld [vmem:[%s13728_s1 + $0x778] sm:$0xf] }
  0x9c   : > { %3360 = vmatpush.bf16.msra.mxu2 %v6465_v59  ;;  %v8552_v59 = vld [vmem:[%s13728_s1 + $0x20] sm:$0xf0]  ;;  %v7304_v49 = vld [vmem:[%s13728_s1 + $0xb68] sm:$0xf] }
  0x9d   : > { %3373 = vmatpush.bf16.msra.mxu3 %v6689_v63  ;;  %v8608_v63 = vld [vmem:[%s13728_s1 + $0x1e0] sm:$0xf0]  ;;  %v5849_v37 = vor.u32 %v8552_v59, %v5848_v58  ;;  %v7305_v55 = vor.u32 %v8916_v50, %v7304_v49  ;;  %v7052_v58 = vld [vmem:[%s13728_s1 + $0x970] sm:$0xf] }
  0x9e   : > { %3335 = vmatpush.bf16.msra.mxu0 %v5989_v4  ;;  %v6940_v4 = vld [vmem:[%s13728_s1 + $0x890] sm:$0xf]  ;;  %v6073_v45 = vor.u32 %v8608_v63, %v6072_v62  ;;  %v8909_v62 = vld [vmem:[%s13728_s1 + $0xb48] sm:$0xf0] }
  0x9f   : > { %3348 = vmatpush.bf16.msra.mxu1 %v6213_v5  ;;  %v8825_v5 = vld [vmem:[%s13728_s1 + $0x8a8] sm:$0xf0]  ;;  %v7500_v63 = vld [vmem:[%s13728_s1 + $0xcf0] sm:$0xf] }
  0xa0   : > { %3361 = vmatpush.bf16.msra.mxu2 %v6437_v6  ;;  %v7164_v6 = vld [vmem:[%s13728_s1 + $0xa50] sm:$0xf] }
  0xa1   : > { %3374 = vmatpush.bf16.msra.mxu3 %v6661_v8  ;;  %v8937_v8 = vld [vmem:[%s13728_s1 + $0xc28] sm:$0xf0] }
  0xa2   : > { %3336 = vmatpush.bf16.msra.mxu0 %v5961_v13  ;;  %v6941_v13 = vor.u32 %v8825_v5, %v6940_v4  ;;  %v8790_v4 = vld [vmem:[%s13728_s1 + $0x790] sm:$0xf0]  ;;  %v7024_v5 = vld [vmem:[%s13728_s1 + $0x938] sm:$0xf] }
  0xa3   : > { %3349 = vmatpush.bf16.msra.mxu1 %v6185_v14  ;;  %v7165_v14 = vor.u32 %v8881_v43, %v7164_v6  ;;  %v7501_v6 = vor.u32 %v8965_v0, %v7500_v63  ;;  %v7248_v43 = vld [vmem:[%s13728_s1 + $0xaf8] sm:$0xf]  ;;  %v8703_v0 = vld [vmem:[%s13728_s1 + $0x4dc] sm:$0xf] }
  0xa4   : > { %3362 = vmatpush.bf16.msra.mxu2 %v6409_v15  ;;  %v7389_v15 = vor.u32 %v8937_v8, %v7388_v7  ;;  %v8902_v7 = vld [vmem:[%s13728_s1 + $0xb10] sm:$0xf0]  ;;  %v7472_v8 = vld [vmem:[%s13728_s1 + $0xcb8] sm:$0xf] }
  0xa5   : > { %3375 = vmatpush.bf16.msra.mxu3 %v6633_v19  ;;  %v7613_v19 = vor.u32 %v8993_v11, %v7612_v10  ;;  %v6772_v10 = vld [vmem:[%s13728_s1 + $0x740] sm:$0xf]  ;;  %v6242_v63 = vld [vmem:[%s13728_s1 + $0x334] sm:$0xf0] }
  0xa6   : > { %3337 = vmatpush.bf16.msra.mxu0 %v5933_v26  ;;  %v6913_v26 = vor.u32 %v8818_v17, %v6912_v16  ;;  %v8839_v17 = vld [vmem:[%s13728_s1 + $0x918] sm:$0xf0] }
  0xa7   : > { %3350 = vmatpush.bf16.msra.mxu1 %v6157_v27  ;;  %v7137_v27 = vor.u32 %v8874_v20, %v7136_v18  ;;  %v7220_v18 = vld [vmem:[%s13728_s1 + $0xac0] sm:$0xf] }
  0xa8   : > { %3363 = vmatpush.bf16.msra.mxu2 %v6381_v28  ;;  %v7361_v28 = vor.u32 %v8930_v22, %v7360_v21  ;;  %v7444_v20 = vld [vmem:[%s13728_s1 + $0xc80] sm:$0xf]  ;;  %v8951_v21 = vld [vmem:[%s13728_s1 + $0xc98] sm:$0xf0] }
  0xa9   : > { %3376 = vmatpush.bf16.msra.mxu3 %v6605_v32  ;;  %v7585_v32 = vor.u32 %v8986_v24, %v7584_v23  ;;  %v6744_v23 = vld [vmem:[%s13728_s1 + $0x708] sm:$0xf]  ;;  %v8776_v24 = vld [vmem:[%s13728_s1 + $0x720] sm:$0xf0] }
  0xaa   : > { %3338 = vmatpush.bf16.msra.mxu0 %v5905_v44  ;;  %v6885_v44 = vor.u32 %v8811_v30, %v6884_v29  ;;  %v6968_v29 = vld [vmem:[%s13728_s1 + $0x8c8] sm:$0xf]  ;;  %v8832_v30 = vld [vmem:[%s13728_s1 + $0x8e0] sm:$0xf0] }
  0xab   : > { %3351 = vmatpush.bf16.msra.mxu1 %v6129_v46  ;;  %v7109_v46 = vor.u32 %v8867_v33, %v7108_v31  ;;  %v7192_v31 = vld [vmem:[%s13728_s1 + $0xa88] sm:$0xf]  ;;  %v8888_v33 = vld [vmem:[%s13728_s1 + $0xaa0] sm:$0xf0]  ;;  %v6969_v49 = vor.u32 %v8832_v30, %v6968_v29 }
  0xac   : > { %3364 = vmatpush.bf16.msra.mxu2 %v6353_v47  ;;  %v6856_v47 = vld [vmem:[%s13728_s1 + $0x7e8] sm:$0xf]  ;;  %v7193_v50 = vor.u32 %v8888_v33, %v7192_v31 }
  0xad   : > { %3377 = vmatpush.bf16.msra.mxu3 %v6577_v51  ;;  %v7528_v51 = vld [vmem:[%s13728_s1 + $0xd28] sm:$0xf]  ;;  %v6857_v53 = vor.u32 %v8804_v48, %v6856_v47  ;;  %v6270_v47 = vld [vmem:[%s13728_s1 + $0x36c] sm:$0xf0]  ;;  %v8710_v48 = vld [vmem:[%s13728_s1 + $0x514] sm:$0xf] }
  0xae   : > { %3339 = vmatpush.bf16.msra.mxu0 %v5877_v57  ;;  %v8797_v57 = vld [vmem:[%s13728_s1 + $0x7c8] sm:$0xf0]  ;;  %v7529_v59 = vor.u32 %v8972_v52, %v7528_v51  ;;  %v8766_v51 = vld [vmem:[%s13728_s1 + $0x6d4] sm:$0xf]  ;;  %v6718_v52 = vld [vmem:[%s13728_s1 + $0x6ec] sm:$0xf0] }
  0xaf   : > { %3352 = vmatpush.bf16.msra.mxu1 %v6101_v60  ;;  %v8853_v60 = vld [vmem:[%s13728_s1 + $0x988] sm:$0xf0]  ;;  %v6186_v31 = vld [vmem:[%s13728_s1 + $0x2c4] sm:$0xf0] }
  0xb0   : > { %3365 = vmatpush.bf16.msra.mxu2 %v6325_v61  ;;  %v7276_v61 = vld [vmem:[%s13728_s1 + $0xb30] sm:$0xf]  ;;  %v7053_v2 = vor.u32 %v8853_v60, %v7052_v58  ;;  %v8591_v58 = vld [vmem:[%s13728_s1 + $0x15c] sm:$0xf]  ;;  %v6410_v33 = vld [vmem:[%s13728_s1 + $0x484] sm:$0xf0] }
  0xb1   : > { %3378 = vmatpush.bf16.msra.mxu3 %v6549_v1  ;;  %v6829_v1 = vor.u32 %v8797_v57, %v6828_v56  ;;  %v7277_v25 = vor.u32 %v8909_v62, %v7276_v61  ;;  %v8647_v60 = vld [vmem:[%s13728_s1 + $0x31c] sm:$0xf]  ;;  %v6721_v62 = vor.u32 %v8766_v51, %v6718_v52  ;;  %v6606_v51 = vld [vmem:[%s13728_s1 + $0x60c] sm:$0xf0] }
  0xb2   : > { %3340 = vmatpush.bf16.msra.mxu0 %v5849_v37  ;;  %v8846_v37 = vld [vmem:[%s13728_s1 + $0x950] sm:$0xf0] }
  0xb3   : > { %3353 = vmatpush.bf16.msra.mxu1 %v6073_v45  ;;  %v8958_v45 = vld [vmem:[%s13728_s1 + $0xcd0] sm:$0xf0]  ;;  %v7025_v11 = vor.u32 %v8846_v37, %v7024_v5 }
  0xb4   : > { %3366 = vmatpush.bf16.msra.mxu2 %v6297_v9  ;;  %v6801_v9 = vor.u32 %v8790_v4, %v6800_v3  ;;  %v7473_v16 = vor.u32 %v8958_v45, %v7472_v8  ;;  %v6690_v3 = vld [vmem:[%s13728_s1 + $0x6b4] sm:$0xf0]  ;;  %v5990_v8 = vld [vmem:[%s13728_s1 + $0x13c] sm:$0xf0]  ;;  %v8640_v45 = vld [vmem:[%s13728_s1 + $0x2e4] sm:$0xf] }
  0xb5   : > { %3379 = vmatpush.bf16.msra.mxu3 %v6521_v12  ;;  %3341 = vmatmul.bf16.vlgmr.msra.gmra.mxu0 %v9780_v38  ;;  %v7080_v38 = vld [vmem:[%s13728_s1 + $0x9a8] sm:$0xf]  ;;  %v7249_v12 = vor.u32 %v8902_v7, %v7248_v43  ;;  %v8584_v7 = vld [vmem:[%s13728_s1 + $0x124] sm:$0xf] }
  0xb6   : > { %3385 = vmatpush.bf16.msrb.mxu0 %v6941_v13  ;;  %3354 = vmatmul.bf16.vlgmr.msra.gmra.mxu1 %v9785_v41  ;;  %v8860_v41 = vld [vmem:[%s13728_s1 + $0x9c0] sm:$0xf0]  ;;  %v8783_v13 = vld [vmem:[%s13728_s1 + $0x758] sm:$0xf0] }
  0xb7   : > { %3398 = vmatpush.bf16.msrb.mxu1 %v7165_v14  ;;  %3367 = vmatmul.bf16.vlgmr.msra.gmra.mxu2 %v9775_v36  ;;  %v7333_v36 = vor.u32 %v8923_v35, %v7332_v34  ;;  %v7081_v54 = vor.u32 %v8860_v41, %v7080_v38  ;;  %v6996_v14 = vld [vmem:[%s13728_s1 + $0x900] sm:$0xf]  ;;  %v6773_v22 = vor.u32 %v8783_v13, %v6772_v10  ;;  %v7416_v34 = vld [vmem:[%s13728_s1 + $0xc48] sm:$0xf]  ;;  %v8944_v35 = vld [vmem:[%s13728_s1 + $0xc60] sm:$0xf0] }
  0xb8   : > { %3411 = vmatpush.bf16.msrb.mxu2 %v7389_v15  ;;  %3380 = vmatmul.bf16.vlgmr.msra.gmra.mxu3 %v9783_v40  ;;  %v7557_v40 = vor.u32 %v8979_v42, %v7556_v39  ;;  %v10594_v15 = vld [vmem:[%s13729_s2] sm:$0x7f]  ;;  %v8598_v39 = vld [vmem:[%s13728_s1 + $0x194] sm:$0xf]  ;;  %v6046_v42 = vld [vmem:[%s13728_s1 + $0x1ac] sm:$0xf0] }
  0xb9   : > { %3424 = vmatpush.bf16.msrb.mxu3 %v7613_v19  ;;  %v8895_v19 = vld [vmem:[%s13728_s1 + $0xad8] sm:$0xf0]  ;;  %v6494_v38 = vld [vmem:[%s13728_s1 + $0x52c] sm:$0xf0]  ;;  %v8696_v13 = vld [vmem:[%s13728_s1 + $0x4a4] sm:$0xf] }
  0xba   : > { %3386 = vmatpush.bf16.msrb.mxu0 %v6913_v26  ;;  %v3111_v26 = vperm.slane %v10594_v15, 0  ;;  %v6497_v57 = vor.u32 %v8710_v48, %v6494_v38  ;;  %v8626_v48 = vld [vmem:[%s13728_s1 + $0x274] sm:$0xf] }
  0xbb   : > { %3399 = vmatpush.bf16.msrb.mxu1 %v7137_v27  ;;  %v6997_v27 = vor.u32 %v8839_v17, %v6996_v14  ;;  %v6438_v14 = vld [vmem:[%s13728_s1 + $0x4bc] sm:$0xf0]  ;;  %v10705_v17 = vld [vmem:[#allocation1 + $0x24] sm:$0xff] }
  0xbc   : > { %3412 = vmatpush.bf16.msrb.mxu2 %v7361_v28  ;;  %v7221_v28 = vor.u32 %v8895_v19, %v7220_v18  ;;  %v10708_v18 = vld [vmem:[#allocation1 + $0x3f] sm:$0xff] }
  0xbd   : > { %3425 = vmatpush.bf16.msrb.mxu3 %v7585_v32  ;;  %v7445_v32 = vor.u32 %v8951_v21, %v7444_v20  ;;  %v3147_v41 = vpop.f32.mrf.mxu1  ;;  %v8752_v19 = vld [vmem:[%s13728_s1 + $0x664] sm:$0xf]  ;;  %v6662_v20 = vld [vmem:[%s13728_s1 + $0x67c] sm:$0xf0]  ;;  %v5993_v21 = vor.u32 %v8584_v7, %v5990_v8 }
  0xbe   : > { %3387 = vmatpush.bf16.msrb.mxu0 %v6885_v44  ;;  %v8654_v44 = vld [vmem:[%s13728_s1 + $0x354] sm:$0xf]  ;;  %v6665_v30 = vor.u32 %v8752_v19, %v6662_v20  ;;  %v5878_v7 = vld [vmem:[%s13728_s1 + $0x5c] sm:$0xf0]  ;;  %v8612_v8 = vld [vmem:[%s13728_s1 + $0x204] sm:$0xf] }
  0xbf   : > { %3400 = vmatpush.bf16.msrb.mxu1 %v7109_v46  ;;  %v3134_v46 = vpop.f32.mrf.mxu0  ;;  %v6273_v56 = vor.u32 %v8654_v44, %v6270_v47  ;;  %v5934_v47 = vld [vmem:[%s13728_s1 + $0xcc] sm:$0xf0]  ;;  %v6550_v19 = vld [vmem:[%s13728_s1 + $0x59c] sm:$0xf0] }
  0xc0   : > { %3413 = vmatpush.bf16.msrb.mxu2 %v7333_v36  ;;  %v6745_v36 = vor.u32 %v8776_v24, %v6744_v23  ;;  %v3160_v61 = vpop.f32.mrf.mxu2  ;;  %v6441_v24 = vor.u32 %v8696_v13, %v6438_v14  ;;  %v6326_v13 = vld [vmem:[%s13728_s1 + $0x3dc] sm:$0xf0] }
  0xc1   : > { %3426 = vmatpush.bf16.msrb.mxu3 %v7557_v40  ;;  %v3135_v40 = vadd.f32 %v3134_v46, %v3111_v26  ;;  %v3173_v5 = vpop.f32.mrf.mxu3  ;;  %v8577_v26 = vld [vmem:[%s13728_s1 + $0xec] sm:$0xf] }
  0xc2   : > { %3388 = vmatpush.bf16.msrb.mxu0 %v6857_v53  ;;  %v7417_v53 = vor.u32 %v8944_v35, %v7416_v34  ;;  %v8745_v34 = vld [vmem:[%s13728_s1 + $0x62c] sm:$0xf]  ;;  %v6634_v35 = vld [vmem:[%s13728_s1 + $0x644] sm:$0xf0] }
  0xc3   : > { %3401 = vmatpush.bf16.msrb.mxu1 %v7081_v54  ;;  %v6049_v54 = vor.u32 %v8598_v39, %v6046_v42  ;;  %v6637_v38 = vor.u32 %v8745_v34, %v6634_v35  ;;  %v6298_v34 = vld [vmem:[%s13728_s1 + $0x3a4] sm:$0xf0]  ;;  %v8717_v35 = vld [vmem:[%s13728_s1 + $0x54c] sm:$0xf] }
  0xc4   : > { %3414 = vmatpush.bf16.msrb.mxu2 %v7305_v55  ;;  %v3148_v55 = vadd.f32 %v3147_v41, %v3135_v40  ;;  %v6158_v40 = vld [vmem:[%s13728_s1 + $0x28c] sm:$0xf0]  ;;  %v8682_v41 = vld [vmem:[%s13728_s1 + $0x434] sm:$0xf] }
  0xc5   : > { %3427 = vmatpush.bf16.msrb.mxu3 %v7529_v59  ;;  %v6018_v59 = vld [vmem:[%s13728_s1 + $0x174] sm:$0xf0] }
  0xc6   : > { %3389 = vmatpush.bf16.msrb.mxu0 %v6829_v1  ;;  %v6466_v1 = vld [vmem:[%s13728_s1 + $0x4f4] sm:$0xf0]  ;;  %v6021_v4 = vor.u32 %v8591_v58, %v6018_v59  ;;  %v8563_v58 = vld [vmem:[%s13728_s1 + $0x7c] sm:$0xf] }
  0xc7   : > { %3402 = vmatpush.bf16.msrb.mxu1 %v7053_v2  ;;  %v3161_v2 = vadd.f32 %v3160_v61, %v3148_v55  ;;  %v6469_v37 = vor.u32 %v8703_v0, %v6466_v1  ;;  %v5906_v59 = vld [vmem:[%s13728_s1 + $0x94] sm:$0xf0]  ;;  %v8675_v1 = vld [vmem:[%s13728_s1 + $0x3fc] sm:$0xf] }
  0xc8   : > { %3415 = vmatpush.bf16.msrb.mxu2 %v7277_v25  ;;  %v8759_v25 = vld [vmem:[%s13728_s1 + $0x69c] sm:$0xf]  ;;  %v3162_v29 = vpop.f32.mrf.mxu2  ;;  %v6130_v0 = vld [vmem:[%s13728_s1 + $0x254] sm:$0xf0] }
  0xc9   : > { %3428 = vmatpush.bf16.msrb.mxu3 %v7501_v6  ;;  %v6245_v6 = vor.u32 %v8647_v60, %v6242_v63  ;;  %v3174_v43 = vadd.f32 %v3173_v5, %v3161_v2  ;;  %v6693_v10 = vor.u32 %v8759_v25, %v6690_v3  ;;  %v3175_v42 = vpop.f32.mrf.mxu3  ;;  %v8619_v60 = vld [vmem:[%s13728_s1 + $0x23c] sm:$0xf]  ;;  %v6354_v2 = vld [vmem:[%s13728_s1 + $0x414] sm:$0xf0]  ;;  %v8605_v29 = vld [vmem:[%s13728_s1 + $0x1cc] sm:$0xf] }
  0xca   : > { %3390 = vmatpush.bf16.msrb.mxu0 %v6801_v9  ;;  %v3136_v9 = vpop.f32.mrf.mxu0  ;;  %v8731_v25 = vld [vmem:[%s13728_s1 + $0x5bc] sm:$0xf]  ;;  %v6578_v3 = vld [vmem:[%s13728_s1 + $0x5d4] sm:$0xf0]  ;;  %v8822_v42 = vld [vmem:[%s13728_s1 + $0x894] sm:$0xf] }
  0xcb   : > { %3403 = vmatpush.bf16.msrb.mxu1 %v7025_v11  ;;  %v10693_v11 = vld [vmem:[#allocation1 + $0x36] sm:$0xff] }
  0xcc   : > { %3416 = vmatpush.bf16.msrb.mxu2 %v7249_v12  ;;  %v6214_v12 = vld [vmem:[%s13728_s1 + $0x2fc] sm:$0xf0] }
  0xcd   : > { %3429 = vmatpush.bf16.msrb.mxu3 %v7473_v16  ;;  %v3149_v16 = vpop.f32.mrf.mxu1  ;;  %v6217_v23 = vor.u32 %v8640_v45, %v6214_v12  ;;  %v6581_v45 = vor.u32 %v8731_v25, %v6578_v3  ;;  %v8668_v12 = vld [vmem:[%s13728_s1 + $0x3c4] sm:$0xf] }
  0xce   : > { %3391 = vmatpush.bf16.msrb.mxu0 %v6773_v22  ;;  %v10717_v22 = vld [vmem:[#allocation1 + $0x2d] sm:$0xff]  ;;  %v8724_v16 = vld [vmem:[%s13728_s1 + $0x584] sm:$0xf] }
  0xcf   : > { %3404 = vmatpush.bf16.msrb.mxu1 %v6997_v27  ;;  %v5962_v27 = vld [vmem:[%s13728_s1 + $0x104] sm:$0xf0]  ;;  %v8808_v3 = vld [vmem:[%s13728_s1 + $0x824] sm:$0xf] }
  0xd0   : > { %3417 = vmatpush.bf16.msrb.mxu2 %v7221_v28  ;;  %v8633_v28 = vld [vmem:[%s13728_s1 + $0x2ac] sm:$0xf]  ;;  %v5965_v39 = vor.u32 %v8577_v26, %v5962_v27 }
  0xd1   : > { %3430 = vmatpush.bf16.msrb.mxu3 %v7445_v32  ;;  %v8689_v32 = vld [vmem:[%s13728_s1 + $0x46c] sm:$0xf]  ;;  %v6189_v44 = vor.u32 %v8633_v28, %v6186_v31  ;;  %v6329_v28 = vor.u32 %v8668_v12, %v6326_v13  ;;  %v10920_v12 = vld [vmem:[#allocation1 + $0x1b] sm:$0xff] }
  0xd2   : > { %3392 = vmatpush.bf16.msrb.mxu0 %v6745_v36  ;;  %v6413_v46 = vor.u32 %v8689_v32, %v6410_v33  ;;  %v8570_v36 = vld [vmem:[%s13728_s1 + $0xb4] sm:$0xf]  ;;  %v3186_v52 = vpop.f32.mrf.mxu0  ;;  %v8661_v31 = vld [vmem:[%s13728_s1 + $0x38c] sm:$0xf]  ;;  %v6553_v33 = vor.u32 %v8724_v16, %v6550_v19 }
  0xd3   : > { %3405 = vmatpush.bf16.msrb.mxu1 %v6969_v49  ;;  %v6382_v49 = vld [vmem:[%s13728_s1 + $0x44c] sm:$0xf0]  ;;  %v8801_v16 = vld [vmem:[%s13728_s1 + $0x7ec] sm:$0xf] }
  0xd4   : > { %3418 = vmatpush.bf16.msrb.mxu2 %v7193_v50  ;;  %v8738_v50 = vld [vmem:[%s13728_s1 + $0x5f4] sm:$0xf]  ;;  %v10926_v19 = vld [vmem:[#allocation1 + $0x9] sm:$0xff] }
  0xd5   : > { %3431 = vmatpush.bf16.msrb.mxu3 %v7417_v53  ;;  %3393 = vmatmul.bf16.vlgmr.msrb.gmra.mxu0 %v10705_v17  ;;  %v5937_v53 = vor.u32 %v8570_v36, %v5934_v47  ;;  %v3199_v55 = vpop.f32.mrf.mxu1  ;;  %v7166_v47 = vld [vmem:[%s13728_s1 + $0xa6c] sm:$0xf0] }
  0xd6   : > { %3437 = vmatpush.bf16.msra.mxu0 %v6049_v54  ;;  %3406 = vmatmul.bf16.vlgmr.msrb.gmra.mxu1 %v10717_v22  ;;  %v3187_v54 = vadd.f32 %v3186_v52, %v3174_v43  ;;  %v8556_v43 = vld [vmem:[%s13728_s1 + $0x44] sm:$0xf] }
  0xd7   : > { %3450 = vmatpush.bf16.msra.mxu1 %v6273_v56  ;;  %3419 = vmatmul.bf16.vlgmr.msrb.gmra.mxu2 %v10693_v11  ;;  %v6161_v56 = vor.u32 %v8626_v48, %v6158_v40  ;;  %v8934_v48 = vld [vmem:[%s13728_s1 + $0xc14] sm:$0xf] }
  0xd8   : > { %3463 = vmatpush.bf16.msra.mxu2 %v6497_v57  ;;  %3432 = vmatmul.bf16.vlgmr.msrb.gmra.mxu3 %v10708_v18  ;;  %v6385_v57 = vor.u32 %v8682_v41, %v6382_v49  ;;  %v3200_v63 = vadd.f32 %v3199_v55, %v3187_v54  ;;  %v6301_v41 = vor.u32 %v8661_v31, %v6298_v34  ;;  %v8990_v49 = vld [vmem:[%s13728_s1 + $0xdd4] sm:$0xf]  ;;  %v8969_v31 = vld [vmem:[%s13728_s1 + $0xd2c] sm:$0xf] }
  0xd9   : > { %3476 = vmatpush.bf16.msra.mxu3 %v6721_v62  ;;  %v6609_v62 = vor.u32 %v8738_v50, %v6606_v51  ;;  %v7614_v50 = vld [vmem:[%s13728_s1 + $0xdec] sm:$0xf0] }
  0xda   : > { %3438 = vmatpush.bf16.msra.mxu0 %v6021_v4  ;;  %v3212_v61 = vpop.f32.mrf.mxu2  ;;  %v5909_v4 = vor.u32 %v8563_v58, %v5906_v59  ;;  %v3188_v20 = vpop.f32.mrf.mxu0  ;;  %v8871_v58 = vld [vmem:[%s13728_s1 + $0xa1c] sm:$0xf]  ;;  %v7617_v59 = vor.u32 %v8990_v49, %v7614_v50  ;;  %v7502_v49 = vld [vmem:[%s13728_s1 + $0xd0c] sm:$0xf0] }
  0xdb   : > { %3451 = vmatpush.bf16.msra.mxu1 %v6245_v6  ;;  %v3213_v5 = vadd.f32 %v3212_v61, %v3200_v63  ;;  %v6133_v6 = vor.u32 %v8619_v60, %v6130_v0  ;;  %v3225_v9 = vpop.f32.mrf.mxu3  ;;  %v7138_v60 = vld [vmem:[%s13728_s1 + $0xa34] sm:$0xf0]  ;;  %v8927_v61 = vld [vmem:[%s13728_s1 + $0xbdc] sm:$0xf] }
  0xdc   : > { %3464 = vmatpush.bf16.msra.mxu2 %v6469_v37  ;;  %v6357_v37 = vor.u32 %v8675_v1, %v6354_v2  ;;  %v8983_v63 = vld [vmem:[%s13728_s1 + $0xd9c] sm:$0xf]  ;;  %v7586_v0 = vld [vmem:[%s13728_s1 + $0xdb4] sm:$0xf0]  ;;  %v7141_v2 = vor.u32 %v8871_v58, %v7138_v60 }
  0xdd   : > { %3477 = vmatpush.bf16.msra.mxu3 %v6693_v10  ;;  %v6102_v10 = vld [vmem:[%s13728_s1 + $0x21c] sm:$0xf0]  ;;  %v10810_v14 = vadd.f32 %v3225_v9, %v3213_v5  ;;  %v3201_v26 = vpop.f32.mrf.mxu1  ;;  %v8864_v5 = vld [vmem:[%s13728_s1 + $0x9e4] sm:$0xf]  ;;  %v8899_v60 = vld [vmem:[%s13728_s1 + $0xafc] sm:$0xf] }
  0xde   : > { %3439 = vmatpush.bf16.msra.mxu0 %v5993_v21  ;;  %v5881_v21 = vor.u32 %v8556_v43, %v5878_v7  ;;  %v6105_v27 = vor.u32 %v8612_v8, %v6102_v10  ;;  %v8920_v43 = vld [vmem:[%s13728_s1 + $0xba4] sm:$0xf]  ;;  %v7334_v7 = vld [vmem:[%s13728_s1 + $0xbbc] sm:$0xf0]  ;;  %v10908_v8 = vld [vmem:[#allocation1 + $0x12] sm:$0xff]  ;;  %v3112_v26 = vperm.slane %v10594_v15, 1 }
  0xdf   : > { %3452 = vmatpush.bf16.msra.mxu1 %v6217_v23  ;;  %v8549_v23 = vld [vmem:[%s13728_s1 + $0xc] sm:$0xf]  ;;  %v7558_v9 = vld [vmem:[%s13728_s1 + $0xd7c] sm:$0xf0]  ;;  %v7530_v15 = vld [vmem:[%s13728_s1 + $0xd44] sm:$0xf0] }
  0xe0   : > { %3465 = vmatpush.bf16.msra.mxu2 %v6441_v24  ;;  %v5850_v24 = vld [vmem:[%s13728_s1 + $0x24] sm:$0xf0]  ;;  %v10917_v10 = vld [vmem:[#allocation1] sm:$0xff]  ;;  %vm3853_vm0 = vcmp.ge.f32.partialorder %v10810_v14, 0.0 }
  0xe1   : > { %3478 = vmatpush.bf16.msra.mxu3 %v6665_v30  ;;  %v6074_v30 = vld [vmem:[%s13728_s1 + $0x1e4] sm:$0xf0]  ;;  %v5853_v36 = vor.u32 %v8549_v23, %v5850_v24  ;;  %v8857_v24 = vld [vmem:[%s13728_s1 + $0x9ac] sm:$0xf] }
  0xe2   : > { %3440 = vmatpush.bf16.msra.mxu0 %v5965_v39  ;;  %v3214_v32 = vpop.f32.mrf.mxu2  ;;  %v6522_v39 = vld [vmem:[%s13728_s1 + $0x564] sm:$0xf0]  ;;  %v6077_v40 = vor.u32 %v8605_v29, %v6074_v30  ;;  %v8913_v29 = vld [vmem:[%s13728_s1 + $0xb6c] sm:$0xf] }
  0xe3   : > { %3453 = vmatpush.bf16.msra.mxu1 %v6189_v44  ;;  %v6942_v44 = vld [vmem:[%s13728_s1 + $0x8ac] sm:$0xf0]  ;;  %v6525_v51 = vor.u32 %v8717_v35, %v6522_v39  ;;  %v6858_v23 = vld [vmem:[%s13728_s1 + $0x804] sm:$0xf0]  ;;  %v8794_v39 = vld [vmem:[%s13728_s1 + $0x7b4] sm:$0xf] }
  0xe4   : > { %3466 = vmatpush.bf16.msra.mxu2 %v6413_v46  ;;  %v8878_v46 = vld [vmem:[%s13728_s1 + $0xa54] sm:$0xf]  ;;  %v6945_v52 = vor.u32 %v8822_v42, %v6942_v44  ;;  %v7306_v30 = vld [vmem:[%s13728_s1 + $0xb84] sm:$0xf0]  ;;  %v6861_v32 = vor.u32 %v8801_v16, %v6858_v23  ;;  %v6830_v42 = vld [vmem:[%s13728_s1 + $0x7cc] sm:$0xf0] }
  0xe5   : > { %3479 = vmatpush.bf16.msra.mxu3 %v6637_v38  ;;  %v7390_v38 = vld [vmem:[%s13728_s1 + $0xc2c] sm:$0xf0]  ;;  %v7169_v54 = vor.u32 %v8878_v46, %v7166_v47  ;;  %v7309_v35 = vor.u32 %v8913_v29, %v7306_v30  ;;  %v8850_v44 = vld [vmem:[%s13728_s1 + $0x974] sm:$0xf]  ;;  %v7533_v47 = vor.u32 %v8969_v31, %v7530_v15  ;;  %v7222_v16 = vld [vmem:[%s13728_s1 + $0xadc] sm:$0xf0] }
  0xe6   : > { %3441 = vmatpush.bf16.msra.mxu0 %v5937_v53  ;;  %v3227_v53 = vpop.f32.mrf.mxu3  ;;  %v7393_v55 = vor.u32 %v8934_v48, %v7390_v38  ;;  %v7054_v48 = vld [vmem:[%s13728_s1 + $0x98c] sm:$0xf0]  ;;  %v8906_v38 = vld [vmem:[%s13728_s1 + $0xb34] sm:$0xf]  ;;  %v8829_v29 = vld [vmem:[%s13728_s1 + $0x8cc] sm:$0xf] }
  0xe7   : > { %3454 = vmatpush.bf16.msra.mxu1 %v6161_v56  ;;  %v8815_v56 = vld [vmem:[%s13728_s1 + $0x85c] sm:$0xf]  ;;  %v6970_v30 = vld [vmem:[%s13728_s1 + $0x8e4] sm:$0xf0]  ;;  %v8885_v31 = vld [vmem:[%s13728_s1 + $0xa8c] sm:$0xf] }
  0xe8   : > { %3467 = vmatpush.bf16.msra.mxu2 %v6385_v57  ;;  %v6914_v57 = vld [vmem:[%s13728_s1 + $0x874] sm:$0xf0] }
  0xe9   : > { %3480 = vmatpush.bf16.msra.mxu3 %v6609_v62  ;;  %v7362_v62 = vld [vmem:[%s13728_s1 + $0xbf4] sm:$0xf0]  ;;  %v6917_v1 = vor.u32 %v8815_v56, %v6914_v57  ;;  %v8843_v56 = vld [vmem:[%s13728_s1 + $0x93c] sm:$0xf] }
  0xea   : > { %3442 = vmatpush.bf16.msra.mxu0 %v5909_v4  ;;  %v7365_v25 = vor.u32 %v8927_v61, %v7362_v62  ;;  %v6886_v4 = vld [vmem:[%s13728_s1 + $0x83c] sm:$0xf0]  ;;  %v7250_v61 = vld [vmem:[%s13728_s1 + $0xb14] sm:$0xf0] }
  0xeb   : > { %3455 = vmatpush.bf16.msra.mxu1 %v6133_v6  ;;  %v7589_v6 = vor.u32 %v8983_v63, %v7586_v0  ;;  %v6889_v13 = vor.u32 %v8808_v3, %v6886_v4  ;;  %v8955_v0 = vld [vmem:[%s13728_s1 + $0xcbc] sm:$0xf] }
  0xec   : > { %3468 = vmatpush.bf16.msra.mxu2 %v6357_v37  ;;  %v7110_v37 = vld [vmem:[%s13728_s1 + $0x9fc] sm:$0xf0] }
  0xed   : > { %3481 = vmatpush.bf16.msra.mxu3 %v6581_v45  ;;  %v8976_v45 = vld [vmem:[%s13728_s1 + $0xd64] sm:$0xf]  ;;  %v7113_v20 = vor.u32 %v8864_v5, %v7110_v37  ;;  %v7253_v5 = vor.u32 %v8899_v60, %v7250_v61  ;;  %v6774_v37 = vld [vmem:[%s13728_s1 + $0x75c] sm:$0xf0]  ;;  %v8707_v61 = vld [vmem:[%s13728_s1 + $0x4f8] sm:$0xf0] }
  0xee   : > { %3443 = vmatpush.bf16.msra.mxu0 %v5881_v21  ;;  %v7337_v21 = vor.u32 %v8920_v43, %v7334_v7  ;;  %v8836_v43 = vld [vmem:[%s13728_s1 + $0x904] sm:$0xf]  ;;  %v6472_v60 = vld [vmem:[%s13728_s1 + $0x4e0] sm:$0xf] }
  0xef   : > { %3456 = vmatpush.bf16.msra.mxu1 %v6105_v27  ;;  %v7561_v27 = vor.u32 %v8976_v45, %v7558_v9  ;;  %v6998_v9 = vld [vmem:[%s13728_s1 + $0x91c] sm:$0xf0] }
  0xf0   : > { %3469 = vmatpush.bf16.msra.mxu2 %v6329_v28  ;;  %v7082_v28 = vld [vmem:[%s13728_s1 + $0x9c4] sm:$0xf0] }
  0xf1   : > { %3482 = vmatpush.bf16.msra.mxu3 %v6553_v33  ;;  %v7085_v34 = vor.u32 %v8857_v24, %v7082_v28  ;;  %v8773_v24 = vld [vmem:[%s13728_s1 + $0x70c] sm:$0xf] }
  0xf2   : > { %3444 = vmatpush.bf16.msra.mxu0 %v5853_v36  ;;  %v3238_v33 = vpop.f32.mrf.mxu0 }
  0xf3   : > { %3457 = vmatpush.bf16.msra.mxu1 %v6077_v40  ;;  %v3239_v46 = vadd.f32 %v3238_v33, %v3112_v26  ;;  %v3251_v36 = vpop.f32.mrf.mxu1  ;;  %v7278_v40 = vld [vmem:[%s13728_s1 + $0xb4c] sm:$0xf0]  ;;  %v6746_v26 = vld [vmem:[%s13728_s1 + $0x724] sm:$0xf0] }
  0xf4   : > { %3470 = vmatpush.bf16.msra.mxu2 %v6301_v41  ;;  %v8962_v41 = vld [vmem:[%s13728_s1 + $0xcf4] sm:$0xf]  ;;  %v7281_v53 = vor.u32 %v8906_v38, %v7278_v40  ;;  %v7194_v33 = vld [vmem:[%s13728_s1 + $0xaa4] sm:$0xf0]  ;;  %v6973_v40 = vor.u32 %v8829_v29, %v6970_v30 }
  0xf5   : > { %3483 = vmatpush.bf16.msra.mxu3 %v6525_v51  ;;  %3445 = vmatmul.bf16.vlgmr.msra.gmra.mxu0 %v10917_v10  ;;  %v3252_v50 = vadd.f32 %v3251_v36, %v3239_v46  ;;  %v6833_v51 = vor.u32 %v8794_v39, %v6830_v42  ;;  %v7505_v58 = vor.u32 %v8962_v41, %v7502_v49  ;;  %v6052_v42 = vld [vmem:[%s13728_s1 + $0x198] sm:$0xf]  ;;  %v8714_v38 = vld [vmem:[%s13728_s1 + $0x530] sm:$0xf0] }
  0xf6   : > { %3489 = vmatpush.bf16.msrb.mxu0 %v6945_v52  ;;  %3458 = vmatmul.bf16.vlgmr.msra.gmra.mxu1 %v10926_v19  ;;  %v7057_v52 = vor.u32 %v8850_v44, %v7054_v48  ;;  %v8602_v44 = vld [vmem:[%s13728_s1 + $0x1b0] sm:$0xf0]  ;;  %v6276_v46 = vld [vmem:[%s13728_s1 + $0x358] sm:$0xf]  ;;  %v6749_v36 = vor.u32 %v8773_v24, %v6746_v26  ;;  %v7197_v41 = vor.u32 %v8885_v31, %v7194_v33  ;;  %v8693_v24 = vld [vmem:[%s13728_s1 + $0x488] sm:$0xf0] }
  0xf7   : > { %3502 = vmatpush.bf16.msrb.mxu1 %v7169_v54  ;;  %3471 = vmatmul.bf16.vlgmr.msra.gmra.mxu2 %v10908_v8  ;;  %v8787_v54 = vld [vmem:[%s13728_s1 + $0x77c] sm:$0xf]  ;;  %v6500_v48 = vld [vmem:[%s13728_s1 + $0x518] sm:$0xf]  ;;  %v6640_v26 = vld [vmem:[%s13728_s1 + $0x630] sm:$0xf] }
  0xf8   : > { %3515 = vmatpush.bf16.msrb.mxu2 %v7393_v55  ;;  %3484 = vmatmul.bf16.vlgmr.msra.gmra.mxu3 %v10920_v12  ;;  %v6802_v55 = vld [vmem:[%s13728_s1 + $0x794] sm:$0xf0] }
  0xf9   : > { %3528 = vmatpush.bf16.msrb.mxu3 %v7617_v59  ;;  %v7026_v59 = vld [vmem:[%s13728_s1 + $0x954] sm:$0xf0] }
  0xfa   : > { %3490 = vmatpush.bf16.msrb.mxu0 %v6917_v1  ;;  %v3264_v57 = vpop.f32.mrf.mxu2  ;;  %v7474_v1 = vld [vmem:[%s13728_s1 + $0xcd4] sm:$0xf0]  ;;  %v3240_v3 = vpop.f32.mrf.mxu0  ;;  %v7029_v4 = vor.u32 %v8843_v56, %v7026_v59  ;;  %v8595_v56 = vld [vmem:[%s13728_s1 + $0x178] sm:$0xf0] }
  0xfb   : > { %3503 = vmatpush.bf16.msrb.mxu1 %v7141_v2  ;;  %v3265_v62 = vadd.f32 %v3264_v57, %v3252_v50  ;;  %v3277_v63 = vpop.f32.mrf.mxu3  ;;  %v6805_v2 = vor.u32 %v8787_v54, %v6802_v55  ;;  %v3253_v7 = vpop.f32.mrf.mxu1  ;;  %v7477_v45 = vor.u32 %v8955_v0, %v7474_v1  ;;  %v6724_v49 = vld [vmem:[%s13728_s1 + $0x6d8] sm:$0xf]  ;;  %v8770_v50 = vld [vmem:[%s13728_s1 + $0x6f0] sm:$0xf0]  ;;  %v6501_v54 = vor.u32 %v8714_v38, %v6500_v48  ;;  %v6024_v55 = vld [vmem:[%s13728_s1 + $0x160] sm:$0xf] }
  0xfc   : > { %3516 = vmatpush.bf16.msrb.mxu2 %v7365_v25  ;;  %v6248_v57 = vld [vmem:[%s13728_s1 + $0x320] sm:$0xf]  ;;  %v8651_v59 = vld [vmem:[%s13728_s1 + $0x338] sm:$0xf0]  ;;  %v6025_v0 = vor.u32 %v8595_v56, %v6024_v55  ;;  %v5996_v3 = vld [vmem:[%s13728_s1 + $0x128] sm:$0xf] }
  0xfd   : > { %3529 = vmatpush.bf16.msrb.mxu3 %v7589_v6  ;;  %v10999_v25 = vadd.f32 %v3277_v63, %v3265_v62  ;;  %v8780_v6 = vld [vmem:[%s13728_s1 + $0x744] sm:$0xf]  ;;  %v6696_v62 = vld [vmem:[%s13728_s1 + $0x6a0] sm:$0xf]  ;;  %v8763_v63 = vld [vmem:[%s13728_s1 + $0x6b8] sm:$0xf0]  ;;  %v6249_v1 = vor.u32 %v8651_v59, %v6248_v57 }
  0xfe   : > { %3491 = vmatpush.bf16.msrb.mxu0 %v6889_v13  ;;  %v8892_v13 = vld [vmem:[%s13728_s1 + $0xac4] sm:$0xf]  ;;  %v6777_v23 = vor.u32 %v8780_v6, %v6774_v37  ;;  %v6697_v6 = vor.u32 %v8763_v63, %v6696_v62  ;;  %v6164_v33 = vld [vmem:[%s13728_s1 + $0x278] sm:$0xf]  ;;  %v8679_v55 = vld [vmem:[%s13728_s1 + $0x418] sm:$0xf0] }
  0xff   : > { %3504 = vmatpush.bf16.msrb.mxu1 %v7113_v20  ;;  %v8948_v20 = vld [vmem:[%s13728_s1 + $0xc84] sm:$0xf]  ;;  %v7225_v28 = vor.u32 %v8892_v13, %v7222_v16  ;;  %v8735_v59 = vld [vmem:[%s13728_s1 + $0x5d8] sm:$0xf0] }
 0x100   : > { %3517 = vmatpush.bf16.msrb.mxu2 %v7337_v21  ;;  %v7446_v21 = vld [vmem:[%s13728_s1 + $0xc9c] sm:$0xf0]  ;;  %v8644_v37 = vld [vmem:[%s13728_s1 + $0x300] sm:$0xf0] }
 0x101   : > { %3530 = vmatpush.bf16.msrb.mxu3 %v7561_v27  ;;  %v7001_v27 = vor.u32 %v8836_v43, %v6998_v9  ;;  %v6444_v43 = vld [vmem:[%s13728_s1 + $0x4a8] sm:$0xf]  ;;  %v8700_v7 = vld [vmem:[%s13728_s1 + $0x4c0] sm:$0xf0] }
 0x102   : > { %3492 = vmatpush.bf16.msrb.mxu0 %v6861_v32  ;;  %v3266_v15 = vpop.f32.mrf.mxu2  ;;  %v7449_v32 = vor.u32 %v8948_v20, %v7446_v21  ;;  %v6445_v16 = vor.u32 %v8700_v7, %v6444_v43  ;;  %v6192_v20 = vld [vmem:[%s13728_s1 + $0x2b0] sm:$0xf]  ;;  %v8672_v43 = vld [vmem:[%s13728_s1 + $0x3e0] sm:$0xf0]  ;;  %v6556_v7 = vld [vmem:[%s13728_s1 + $0x588] sm:$0xf] }
 0x103   : > { %3505 = vmatpush.bf16.msrb.mxu1 %v7085_v34  ;;  %v8941_v34 = vld [vmem:[%s13728_s1 + $0xc4c] sm:$0xf]  ;;  %v3279_v39 = vpop.f32.mrf.mxu3  ;;  %v5940_v15 = vld [vmem:[%s13728_s1 + $0xb8] sm:$0xf] }
 0x104   : > { %3518 = vmatpush.bf16.msrb.mxu2 %v7309_v35  ;;  %v7418_v35 = vld [vmem:[%s13728_s1 + $0xc64] sm:$0xf0] }
 0x105   : > { %3531 = vmatpush.bf16.msrb.mxu3 %v7533_v47  ;;  %v8658_v47 = vld [vmem:[%s13728_s1 + $0x370] sm:$0xf0] }
 0x106   : > { %3493 = vmatpush.bf16.msrb.mxu0 %v6833_v51  ;;  %v7421_v51 = vor.u32 %v8941_v34, %v7418_v35 }
 0x107   : > { %3506 = vmatpush.bf16.msrb.mxu1 %v7057_v52  ;;  %v6053_v52 = vor.u32 %v8602_v44, %v6052_v42  ;;  %v8630_v42 = vld [vmem:[%s13728_s1 + $0x290] sm:$0xf0]  ;;  %v6388_v44 = vld [vmem:[%s13728_s1 + $0x438] sm:$0xf] }
 0x108   : > { %3519 = vmatpush.bf16.msrb.mxu2 %v7281_v53  ;;  %v6277_v53 = vor.u32 %v8658_v47, %v6276_v46  ;;  %v8686_v46 = vld [vmem:[%s13728_s1 + $0x450] sm:$0xf0]  ;;  %v6165_v38 = vor.u32 %v8630_v42, %v6164_v33  ;;  %v7396_v33 = vld [vmem:[%s13728_s1 + $0xc18] sm:$0xf] }
 0x109   : > { %3532 = vmatpush.bf16.msrb.mxu3 %v7505_v58  ;;  %v6725_v58 = vor.u32 %v8770_v50, %v6724_v49  ;;  %v8567_v49 = vld [vmem:[%s13728_s1 + $0x98] sm:$0xf0]  ;;  %v6136_v50 = vld [vmem:[%s13728_s1 + $0x240] sm:$0xf]  ;;  %v7620_v42 = vld [vmem:[%s13728_s1 + $0xdd8] sm:$0xf] }
 0x10a   : > { %3494 = vmatpush.bf16.msrb.mxu0 %v6805_v2  ;;  %v6473_v2 = vor.u32 %v8707_v61, %v6472_v60 }
 0x10b   : > { %3507 = vmatpush.bf16.msrb.mxu1 %v7029_v4  ;;  %v8588_v4 = vld [vmem:[%s13728_s1 + $0x140] sm:$0xf0] }
 0x10c   : > { %3520 = vmatpush.bf16.msrb.mxu2 %v7253_v5  ;;  %v6220_v5 = vld [vmem:[%s13728_s1 + $0x2e8] sm:$0xf]  ;;  %v5997_v9 = vor.u32 %v8588_v4, %v5996_v3 }
 0x10d   : > { %3533 = vmatpush.bf16.msrb.mxu3 %v7477_v45  ;;  %v8756_v45 = vld [vmem:[%s13728_s1 + $0x680] sm:$0xf0]  ;;  %v6221_v13 = vor.u32 %v8644_v37, %v6220_v5  ;;  %v6108_v3 = vld [vmem:[%s13728_s1 + $0x208] sm:$0xf] }
 0x10e   : > { %3495 = vmatpush.bf16.msrb.mxu0 %v6777_v23  ;;  %v6416_v23 = vld [vmem:[%s13728_s1 + $0x470] sm:$0xf]  ;;  %v6332_v37 = vld [vmem:[%s13728_s1 + $0x3c8] sm:$0xf] }
 0x10f   : > { %3508 = vmatpush.bf16.msrb.mxu1 %v7001_v27  ;;  %v8749_v27 = vld [vmem:[%s13728_s1 + $0x648] sm:$0xf0]  ;;  %v6417_v31 = vor.u32 %v8693_v24, %v6416_v23 }
 0x110   : > { %3521 = vmatpush.bf16.msrb.mxu2 %v7225_v28  ;;  %v6641_v39 = vor.u32 %v8749_v27, %v6640_v26  ;;  %v8665_v24 = vld [vmem:[%s13728_s1 + $0x3a8] sm:$0xf0]  ;;  %v6528_v26 = vld [vmem:[%s13728_s1 + $0x550] sm:$0xf] }
 0x111   : > { %3534 = vmatpush.bf16.msrb.mxu3 %v7449_v32  ;;  %v8574_v32 = vld [vmem:[%s13728_s1 + $0xd0] sm:$0xf0]  ;;  %v8721_v27 = vld [vmem:[%s13728_s1 + $0x568] sm:$0xf0] }
 0x112   : > { %3496 = vmatpush.bf16.msrb.mxu0 %v6749_v36  ;;  %v3290_v29 = vpop.f32.mrf.mxu0  ;;  %v6612_v36 = vld [vmem:[%s13728_s1 + $0x5f8] sm:$0xf]  ;;  %v5941_v48 = vor.u32 %v8574_v32, %v5940_v15  ;;  %v8882_v32 = vld [vmem:[%s13728_s1 + $0xa70] sm:$0xf0] }
 0x113   : > { %3509 = vmatpush.bf16.msrb.mxu1 %v6973_v40  ;;  %v3291_v34 = vadd.f32 %v3290_v29, %v10999_v25  ;;  %v3303_v35 = vpop.f32.mrf.mxu1  ;;  %v8742_v25 = vld [vmem:[%s13728_s1 + $0x610] sm:$0xf0]  ;;  %v6389_v40 = vor.u32 %v8686_v46, %v6388_v44  ;;  %v6948_v29 = vld [vmem:[%s13728_s1 + $0x898] sm:$0xf]  ;;  %v6529_v46 = vor.u32 %v8721_v27, %v6528_v26 }
 0x114   : > { %3522 = vmatpush.bf16.msrb.mxu2 %v7197_v41  ;;  %v5912_v41 = vld [vmem:[%s13728_s1 + $0x80] sm:$0xf]  ;;  %v8994_v44 = vld [vmem:[%s13728_s1 + $0xdf0] sm:$0xf0] }
 0x115   : > { %3535 = vmatpush.bf16.msrb.mxu3 %v7421_v51  ;;  %3497 = vmatmul.bf16.vlgmr.msrb.gmra.mxu0 %v10705_v17  ;;  %v5968_v17 = vld [vmem:[%s13728_s1 + $0xf0] sm:$0xf]  ;;  %v3304_v47 = vadd.f32 %v3303_v35, %v3291_v34  ;;  %v5913_v60 = vor.u32 %v8567_v49, %v5912_v41  ;;  %v8938_v34 = vld [vmem:[%s13728_s1 + $0xc30] sm:$0xf0]  ;;  %v7621_v41 = vor.u32 %v8994_v44, %v7620_v42  ;;  %v8875_v49 = vld [vmem:[%s13728_s1 + $0xa38] sm:$0xf0] }
 0x116   : > { %3541 = vmatpush.bf16.msra.mxu0 %v6053_v52  ;;  %3510 = vmatmul.bf16.vlgmr.msrb.gmra.mxu1 %v10717_v22  ;;  %v8637_v22 = vld [vmem:[%s13728_s1 + $0x2c8] sm:$0xf0]  ;;  %v6613_v52 = vor.u32 %v8742_v25, %v6612_v36  ;;  %v8854_v27 = vld [vmem:[%s13728_s1 + $0x990] sm:$0xf0]  ;;  %v7032_v42 = vld [vmem:[%s13728_s1 + $0x940] sm:$0xf] }
 0x117   : > { %3554 = vmatpush.bf16.msra.mxu1 %v6277_v53  ;;  %3523 = vmatmul.bf16.vlgmr.msrb.gmra.mxu2 %v10693_v11  ;;  %v6668_v11 = vld [vmem:[%s13728_s1 + $0x668] sm:$0xf]  ;;  %v6193_v30 = vor.u32 %v8637_v22, %v6192_v20  ;;  %v8623_v53 = vld [vmem:[%s13728_s1 + $0x258] sm:$0xf0]  ;;  %v8609_v20 = vld [vmem:[%s13728_s1 + $0x1e8] sm:$0xf0] }
 0x118   : > { %3567 = vmatpush.bf16.msra.mxu2 %v6501_v54  ;;  %3536 = vmatmul.bf16.vlgmr.msrb.gmra.mxu3 %v10708_v18  ;;  %v8581_v18 = vld [vmem:[%s13728_s1 + $0x108] sm:$0xf0]  ;;  %v6669_v21 = vor.u32 %v8756_v45, %v6668_v11  ;;  %v6360_v54 = vld [vmem:[%s13728_s1 + $0x400] sm:$0xf]  ;;  %v6137_v63 = vor.u32 %v8623_v53, %v6136_v50  ;;  %v8728_v11 = vld [vmem:[%s13728_s1 + $0x5a0] sm:$0xf0] }
 0x119   : > { %3580 = vmatpush.bf16.msra.mxu3 %v6725_v58  ;;  %v5969_v28 = vor.u32 %v8581_v18, %v5968_v17  ;;  %v6584_v58 = vld [vmem:[%s13728_s1 + $0x5c0] sm:$0xf]  ;;  %v6333_v17 = vor.u32 %v8672_v43, %v6332_v37  ;;  %v6080_v18 = vld [vmem:[%s13728_s1 + $0x1d0] sm:$0xf]  ;;  %v6557_v23 = vor.u32 %v8728_v11, %v6556_v7  ;;  %v8987_v53 = vld [vmem:[%s13728_s1 + $0xdb8] sm:$0xf0] }
 0x11a   : > { %3542 = vmatpush.bf16.msra.mxu0 %v6025_v0  ;;  %v3316_v51 = vpop.f32.mrf.mxu2  ;;  %v3292_v62 = vpop.f32.mrf.mxu0  ;;  %v6361_v0 = vor.u32 %v8679_v55, %v6360_v54  ;;  %v6585_v5 = vor.u32 %v8735_v59, %v6584_v58  ;;  %v6081_v35 = vor.u32 %v8609_v20, %v6080_v18  ;;  %v7368_v50 = vld [vmem:[%s13728_s1 + $0xbe0] sm:$0xf]  ;;  %v8812_v58 = vld [vmem:[%s13728_s1 + $0x840] sm:$0xf0]  ;;  %v7116_v59 = vld [vmem:[%s13728_s1 + $0x9e8] sm:$0xf] }
 0x11b   : > { %3555 = vmatpush.bf16.msra.mxu1 %v6249_v1  ;;  %v3317_v56 = vadd.f32 %v3316_v51, %v3304_v47  ;;  %v3329_v57 = vpop.f32.mrf.mxu3  ;;  %v5884_v1 = vld [vmem:[%s13728_s1 + $0x48] sm:$0xf]  ;;  %v3305_v4 = vpop.f32.mrf.mxu1  ;;  %v7397_v47 = vor.u32 %v8938_v34, %v7396_v33  ;;  %v8931_v51 = vld [vmem:[%s13728_s1 + $0xbf8] sm:$0xf0]  ;;  %v8868_v62 = vld [vmem:[%s13728_s1 + $0xa00] sm:$0xf0] }
 0x11c   : > { %3568 = vmatpush.bf16.msra.mxu2 %v6473_v2  ;;  %v8560_v2 = vld [vmem:[%s13728_s1 + $0x60] sm:$0xf0]  ;;  %v6864_v4 = vld [vmem:[%s13728_s1 + $0x7f0] sm:$0xf]  ;;  %v8861_v43 = vld [vmem:[%s13728_s1 + $0x9c8] sm:$0xf0] }
 0x11d   : > { %3581 = vmatpush.bf16.msra.mxu3 %v6697_v6  ;;  %v11198_v61 = vadd.f32 %v3329_v57, %v3317_v56  ;;  %v8616_v6 = vld [vmem:[%s13728_s1 + $0x220] sm:$0xf0]  ;;  %v5885_v45 = vor.u32 %v8560_v2, %v5884_v1  ;;  %v7369_v56 = vor.u32 %v8931_v51, %v7368_v50  ;;  %v6892_v57 = vld [vmem:[%s13728_s1 + $0x828] sm:$0xf]  ;;  %v7312_v7 = vld [vmem:[%s13728_s1 + $0xb70] sm:$0xf] }
 0x11e   : > { %3543 = vmatpush.bf16.msra.mxu0 %v5997_v9  ;;  %v5856_v9 = vld [vmem:[%s13728_s1 + $0x10] sm:$0xf]  ;;  %v7564_v1 = vld [vmem:[%s13728_s1 + $0xd68] sm:$0xf]  ;;  %v8980_v2 = vld [vmem:[%s13728_s1 + $0xd80] sm:$0xf0] }
 0x11f   : > { %3556 = vmatpush.bf16.msra.mxu1 %v6221_v13  ;;  %v8553_v13 = vld [vmem:[%s13728_s1 + $0x28] sm:$0xf0]  ;;  %v6836_v20 = vld [vmem:[%s13728_s1 + $0x7b8] sm:$0xf]  ;;  %vm3854_vm1 = vcmp.ge.f32.partialorder %v11198_v61, 0.0 }
 0x120   : > { %3569 = vmatpush.bf16.msra.mxu2 %v6445_v16  ;;  %v6109_v16 = vor.u32 %v8616_v6, %v6108_v3  ;;  %v5857_v15 = vor.u32 %v8553_v13, %v5856_v9  ;;  %v6893_v3 = vor.u32 %v8812_v58, %v6892_v57  ;;  %v8805_v6 = vld [vmem:[%s13728_s1 + $0x808] sm:$0xf0] }
 0x121   : > { %3582 = vmatpush.bf16.msra.mxu3 %v6669_v21  ;;  %v6304_v21 = vld [vmem:[%s13728_s1 + $0x390] sm:$0xf]  ;;  %v8917_v11 = vld [vmem:[%s13728_s1 + $0xb88] sm:$0xf0]  ;;  %v6865_v13 = vor.u32 %v8805_v6, %v6864_v4 }
 0x122   : > { %3544 = vmatpush.bf16.msra.mxu0 %v5969_v28  ;;  %v3318_v22 = vpop.f32.mrf.mxu2  ;;  %v8973_v9 = vld [vmem:[%s13728_s1 + $0xd48] sm:$0xf0]  ;;  %v7313_v18 = vor.u32 %v8917_v11, %v7312_v7  ;;  %v7424_v7 = vld [vmem:[%s13728_s1 + $0xc50] sm:$0xf] }
 0x123   : > { %3557 = vmatpush.bf16.msra.mxu1 %v6193_v30  ;;  %v3331_v28 = vpop.f32.mrf.mxu3  ;;  %v8826_v30 = vld [vmem:[%s13728_s1 + $0x8b0] sm:$0xf0]  ;;  %v7060_v22 = vld [vmem:[%s13728_s1 + $0x978] sm:$0xf]  ;;  %v8833_v6 = vld [vmem:[%s13728_s1 + $0x8e8] sm:$0xf0] }
 0x124   : > { %3570 = vmatpush.bf16.msra.mxu2 %v6417_v31  ;;  %v7172_v31 = vld [vmem:[%s13728_s1 + $0xa58] sm:$0xf]  ;;  %v6949_v36 = vor.u32 %v8826_v30, %v6948_v29  ;;  %v8910_v29 = vld [vmem:[%s13728_s1 + $0xb50] sm:$0xf0]  ;;  %v7061_v33 = vor.u32 %v8854_v27, %v7060_v22  ;;  %v8945_v11 = vld [vmem:[%s13728_s1 + $0xc68] sm:$0xf0] }
 0x125   : > { %3583 = vmatpush.bf16.msra.mxu3 %v6641_v39  ;;  %v6305_v39 = vor.u32 %v8665_v24, %v6304_v21  ;;  %v7173_v25 = vor.u32 %v8882_v32, %v7172_v31  ;;  %v8798_v21 = vld [vmem:[%s13728_s1 + $0x7d0] sm:$0xf0]  ;;  %v7284_v28 = vld [vmem:[%s13728_s1 + $0xb38] sm:$0xf]  ;;  %v7425_v27 = vor.u32 %v8945_v11, %v7424_v7  ;;  %v8627_v11 = vld [vmem:[%s13728_s1 + $0x27c] sm:$0xf] }
 0x126   : > { %3545 = vmatpush.bf16.msra.mxu0 %v5941_v48  ;;  %v6920_v48 = vld [vmem:[%s13728_s1 + $0x860] sm:$0xf]  ;;  %v7508_v30 = vld [vmem:[%s13728_s1 + $0xcf8] sm:$0xf]  ;;  %v8966_v31 = vld [vmem:[%s13728_s1 + $0xd10] sm:$0xf0]  ;;  %v6837_v32 = vor.u32 %v8798_v21, %v6836_v20  ;;  %v7285_v34 = vor.u32 %v8910_v29, %v7284_v28 }
 0x127   : > { %3558 = vmatpush.bf16.msra.mxu1 %v6165_v38  ;;  %v8819_v38 = vld [vmem:[%s13728_s1 + $0x878] sm:$0xf0]  ;;  %v6502_v21 = vld [vmem:[%s13728_s1 + $0x534] sm:$0xf0] }
 0x128   : > { %3571 = vmatpush.bf16.msra.mxu2 %v6389_v40  ;;  %v7144_v40 = vld [vmem:[%s13728_s1 + $0xa20] sm:$0xf]  ;;  %v6921_v54 = vor.u32 %v8819_v38, %v6920_v48  ;;  %v8711_v20 = vld [vmem:[%s13728_s1 + $0x51c] sm:$0xf]  ;;  %v5942_v7 = vld [vmem:[%s13728_s1 + $0xd4] sm:$0xf0] }
 0x129   : > { %3584 = vmatpush.bf16.msra.mxu3 %v6613_v52  ;;  %v7592_v52 = vld [vmem:[%s13728_s1 + $0xda0] sm:$0xf]  ;;  %v7145_v55 = vor.u32 %v8875_v49, %v7144_v40 }
 0x12a   : > { %3546 = vmatpush.bf16.msra.mxu0 %v5913_v60  ;;  %v7593_v60 = vor.u32 %v8987_v53, %v7592_v52  ;;  %v7480_v40 = vld [vmem:[%s13728_s1 + $0xcc0] sm:$0xf] }
 0x12b   : > { %3559 = vmatpush.bf16.msra.mxu1 %v6137_v63  ;;  %v7340_v63 = vld [vmem:[%s13728_s1 + $0xba8] sm:$0xf] }
 0x12c   : > { %3572 = vmatpush.bf16.msra.mxu2 %v6361_v0  ;;  %v8924_v0 = vld [vmem:[%s13728_s1 + $0xbc0] sm:$0xf0] }
 0x12d   : > { %3585 = vmatpush.bf16.msra.mxu3 %v6585_v5  ;;  %v7341_v5 = vor.u32 %v8924_v0, %v7340_v63  ;;  %v7452_v63 = vld [vmem:[%s13728_s1 + $0xc88] sm:$0xf]  ;;  %v8952_v0 = vld [vmem:[%s13728_s1 + $0xca0] sm:$0xf0] }
 0x12e   : > { %3547 = vmatpush.bf16.msra.mxu0 %v5885_v45  ;;  %v7536_v45 = vld [vmem:[%s13728_s1 + $0xd30] sm:$0xf] }
 0x12f   : > { %3560 = vmatpush.bf16.msra.mxu1 %v6109_v16  ;;  %v7537_v26 = vor.u32 %v8973_v9, %v7536_v45  ;;  %v8599_v9 = vld [vmem:[%s13728_s1 + $0x19c] sm:$0xf] }
 0x130   : > { %3573 = vmatpush.bf16.msra.mxu2 %v6333_v17 }
 0x131   : > { %3586 = vmatpush.bf16.msra.mxu3 %v6557_v23 }
 0x132   : > { %3548 = vmatpush.bf16.msra.mxu0 %v5857_v15  ;;  %v3342_v16 = vpop.f32.mrf.mxu0 }
 0x133   : > { %3561 = vmatpush.bf16.msra.mxu1 %v6081_v35  ;;  %v3355_v24 = vpop.f32.mrf.mxu1  ;;  %v6808_v35 = vld [vmem:[%s13728_s1 + $0x780] sm:$0xf] }
 0x134   : > { %3574 = vmatpush.bf16.msra.mxu2 %v6305_v39  ;;  %v8791_v39 = vld [vmem:[%s13728_s1 + $0x798] sm:$0xf0] }
 0x135   : > { %3587 = vmatpush.bf16.msra.mxu3 %v6529_v46  ;;  %3549 = vmatmul.bf16.vlgmr.msra.gmra.mxu0 %v10917_v10  ;;  %v7088_v10 = vld [vmem:[%s13728_s1 + $0x9b0] sm:$0xf]  ;;  %v7509_v46 = vor.u32 %v8966_v31, %v7508_v30  ;;  %v6809_v49 = vor.u32 %v8791_v39, %v6808_v35  ;;  %v6505_v30 = vor.u32 %v8711_v20, %v6502_v21  ;;  %v8592_v31 = vld [vmem:[%s13728_s1 + $0x164] sm:$0xf]  ;;  %v6474_v39 = vld [vmem:[%s13728_s1 + $0x4fc] sm:$0xf0] }
 0x136   : > { %3593 = vmatpush.bf16.msrb.mxu0 %v6949_v36  ;;  %3562 = vmatmul.bf16.vlgmr.msra.gmra.mxu1 %v10926_v19  ;;  %v7565_v19 = vor.u32 %v8980_v2, %v7564_v1  ;;  %v7089_v17 = vor.u32 %v8861_v43, %v7088_v10  ;;  %v8847_v36 = vld [vmem:[%s13728_s1 + $0x958] sm:$0xf0]  ;;  %v6752_v2 = vld [vmem:[%s13728_s1 + $0x710] sm:$0xf]  ;;  %v8889_v43 = vld [vmem:[%s13728_s1 + $0xaa8] sm:$0xf0] }
 0x137   : > { %3606 = vmatpush.bf16.msrb.mxu1 %v7173_v25  ;;  %3575 = vmatmul.bf16.vlgmr.msra.gmra.mxu2 %v10908_v8  ;;  %v7117_v8 = vor.u32 %v8868_v62, %v7116_v59  ;;  %v7256_v25 = vld [vmem:[%s13728_s1 + $0xb00] sm:$0xf]  ;;  %v7033_v52 = vor.u32 %v8847_v36, %v7032_v42  ;;  %v8840_v59 = vld [vmem:[%s13728_s1 + $0x920] sm:$0xf0]  ;;  %v7200_v10 = vld [vmem:[%s13728_s1 + $0xa90] sm:$0xf] }
 0x138   : > { %3619 = vmatpush.bf16.msrb.mxu2 %v7397_v47  ;;  %3588 = vmatmul.bf16.vlgmr.msra.gmra.mxu3 %v10920_v12  ;;  %v11336_v12 = vld [vmem:[%s13729_s2] sm:$0x7f]  ;;  %v8903_v47 = vld [vmem:[%s13728_s1 + $0xb18] sm:$0xf0] }
 0x139   : > { %3632 = vmatpush.bf16.msrb.mxu3 %v7621_v41  ;;  %v3113_v37 = vperm.slane %v11336_v12, 2  ;;  %v8959_v41 = vld [vmem:[%s13728_s1 + $0xcd8] sm:$0xf0]  ;;  %v7257_v53 = vor.u32 %v8903_v47, %v7256_v25  ;;  %v8896_v62 = vld [vmem:[%s13728_s1 + $0xae0] sm:$0xf0] }
 0x13a   : > { %3594 = vmatpush.bf16.msrb.mxu0 %v6921_v54  ;;  %v3368_v44 = vpop.f32.mrf.mxu2  ;;  %v3344_v51 = vpop.f32.mrf.mxu0  ;;  %v6780_v54 = vld [vmem:[%s13728_s1 + $0x748] sm:$0xf]  ;;  %v7481_v58 = vor.u32 %v8959_v41, %v7480_v40  ;;  %v8704_v35 = vld [vmem:[%s13728_s1 + $0x4e4] sm:$0xf]  ;;  %v8585_v47 = vld [vmem:[%s13728_s1 + $0x12c] sm:$0xf] }
 0x13b   : > { %3607 = vmatpush.bf16.msrb.mxu1 %v7145_v55  ;;  %v3343_v23 = vadd.f32 %v3342_v16, %v3113_v37  ;;  %v3381_v38 = vpop.f32.mrf.mxu3  ;;  %v8784_v55 = vld [vmem:[%s13728_s1 + $0x760] sm:$0xf0]  ;;  %v3357_v57 = vpop.f32.mrf.mxu1  ;;  %v8655_v16 = vld [vmem:[%s13728_s1 + $0x35c] sm:$0xf]  ;;  %v6477_v25 = vor.u32 %v8704_v35, %v6474_v39  ;;  %v8697_v51 = vld [vmem:[%s13728_s1 + $0x4ac] sm:$0xf] }
 0x13c   : > { %3620 = vmatpush.bf16.msrb.mxu2 %v7369_v56  ;;  %v7004_v56 = vld [vmem:[%s13728_s1 + $0x908] sm:$0xf]  ;;  %v6781_v1 = vor.u32 %v8784_v55, %v6780_v54  ;;  %v8760_v42 = vld [vmem:[%s13728_s1 + $0x6a4] sm:$0xf]  ;;  %v11509_v41 = vld [vmem:[#allocation1 + $0x36] sm:$0xff] }
 0x13d   : > { %3633 = vmatpush.bf16.msrb.mxu3 %v7593_v60  ;;  %v3356_v15 = vadd.f32 %v3355_v24, %v3343_v23  ;;  %v7228_v60 = vld [vmem:[%s13728_s1 + $0xac8] sm:$0xf]  ;;  %v7005_v4 = vor.u32 %v8840_v59, %v7004_v56  ;;  %v7201_v23 = vor.u32 %v8889_v43, %v7200_v10  ;;  %v8767_v24 = vld [vmem:[%s13728_s1 + $0x6dc] sm:$0xf]  ;;  %v8753_v55 = vld [vmem:[%s13728_s1 + $0x66c] sm:$0xf] }
 0x13e   : > { %3595 = vmatpush.bf16.msrb.mxu0 %v6893_v3  ;;  %v8777_v3 = vld [vmem:[%s13728_s1 + $0x728] sm:$0xf0]  ;;  %v11524_v54 = vld [vmem:[#allocation1 + $0x3f] sm:$0xff]  ;;  %v6670_v56 = vld [vmem:[%s13728_s1 + $0x684] sm:$0xf0] }
 0x13f   : > { %3608 = vmatpush.bf16.msrb.mxu1 %v7117_v8  ;;  %v3369_v48 = vadd.f32 %v3368_v44, %v3356_v15  ;;  %v7229_v8 = vor.u32 %v8896_v62, %v7228_v60  ;;  %v6026_v15 = vld [vmem:[%s13728_s1 + $0x17c] sm:$0xf0]  ;;  %v8578_v62 = vld [vmem:[%s13728_s1 + $0xf4] sm:$0xf]  ;;  %v8571_v43 = vld [vmem:[%s13728_s1 + $0xbc] sm:$0xf] }
 0x140   : > { %3621 = vmatpush.bf16.msrb.mxu2 %v7341_v5  ;;  %v6976_v5 = vld [vmem:[%s13728_s1 + $0x8d0] sm:$0xf]  ;;  %v6698_v44 = vld [vmem:[%s13728_s1 + $0x6bc] sm:$0xf0]  ;;  %v8739_v20 = vld [vmem:[%s13728_s1 + $0x5fc] sm:$0xf] }
 0x141   : > { %3634 = vmatpush.bf16.msrb.mxu3 %v7565_v19  ;;  %v11402_v50 = vadd.f32 %v3381_v38, %v3369_v48  ;;  %v7453_v19 = vor.u32 %v8952_v0, %v7452_v63  ;;  %v6977_v22 = vor.u32 %v8833_v6, %v6976_v5  ;;  %v5998_v48 = vld [vmem:[%s13728_s1 + $0x144] sm:$0xf0]  ;;  %v8641_v38 = vld [vmem:[%s13728_s1 + $0x2ec] sm:$0xf]  ;;  %v6701_v40 = vor.u32 %v8760_v42, %v6698_v44  ;;  %v5970_v63 = vld [vmem:[%s13728_s1 + $0x10c] sm:$0xf0] }
 0x142   : > { %3596 = vmatpush.bf16.msrb.mxu0 %v6865_v13  ;;  %v3370_v37 = vpop.f32.mrf.mxu2  ;;  %v6054_v13 = vld [vmem:[%s13728_s1 + $0x1b4] sm:$0xf0]  ;;  %v6001_v57 = vor.u32 %v8585_v47, %v5998_v48  ;;  %v8634_v0 = vld [vmem:[%s13728_s1 + $0x2b4] sm:$0xf]  ;;  %v6642_v5 = vld [vmem:[%s13728_s1 + $0x64c] sm:$0xf0]  ;;  %v5973_v6 = vor.u32 %v8578_v62, %v5970_v63 }
 0x143   : > { %3609 = vmatpush.bf16.msrb.mxu1 %v7089_v17  ;;  %v3383_v45 = vpop.f32.mrf.mxu3  ;;  %v6753_v17 = vor.u32 %v8777_v3, %v6752_v2  ;;  %v6057_v28 = vor.u32 %v8599_v9, %v6054_v13  ;;  %v6194_v2 = vld [vmem:[%s13728_s1 + $0x2cc] sm:$0xf0]  ;;  %v8690_v3 = vld [vmem:[%s13728_s1 + $0x474] sm:$0xf]  ;;  %v8732_v35 = vld [vmem:[%s13728_s1 + $0x5c4] sm:$0xf] }
 0x144   : > { %3622 = vmatpush.bf16.msrb.mxu2 %v7313_v18  ;;  %v6278_v18 = vld [vmem:[%s13728_s1 + $0x374] sm:$0xf0]  ;;  %v6197_v37 = vor.u32 %v8634_v0, %v6194_v2  ;;  %v6586_v39 = vld [vmem:[%s13728_s1 + $0x5dc] sm:$0xf0]  ;;  %v8557_v47 = vld [vmem:[%s13728_s1 + $0x4c] sm:$0xf] }
 0x145   : > { %3635 = vmatpush.bf16.msrb.mxu3 %v7537_v26  ;;  %v6726_v26 = vld [vmem:[%s13728_s1 + $0x6f4] sm:$0xf0]  ;;  %v6281_v29 = vor.u32 %v8655_v16, %v6278_v18  ;;  %v5886_v48 = vld [vmem:[%s13728_s1 + $0x64] sm:$0xf0]  ;;  %v5858_v62 = vld [vmem:[%s13728_s1 + $0x2c] sm:$0xf0] }
 0x146   : > { %3597 = vmatpush.bf16.msrb.mxu0 %v6837_v32  ;;  %v8648_v32 = vld [vmem:[%s13728_s1 + $0x324] sm:$0xf]  ;;  %v6166_v16 = vld [vmem:[%s13728_s1 + $0x294] sm:$0xf0]  ;;  %v6082_v2 = vld [vmem:[%s13728_s1 + $0x1ec] sm:$0xf0] }
 0x147   : > { %3610 = vmatpush.bf16.msrb.mxu1 %v7061_v33  ;;  %v6729_v33 = vor.u32 %v8767_v24, %v6726_v26  ;;  %v6390_v18 = vld [vmem:[%s13728_s1 + $0x454] sm:$0xf0]  ;;  %v8564_v26 = vld [vmem:[%s13728_s1 + $0x84] sm:$0xf] }
 0x148   : > { %3623 = vmatpush.bf16.msrb.mxu2 %v7285_v34  ;;  %v6250_v34 = vld [vmem:[%s13728_s1 + $0x33c] sm:$0xf0] }
 0x149   : > { %3636 = vmatpush.bf16.msrb.mxu3 %v7509_v46  ;;  %v6029_v46 = vor.u32 %v8592_v31, %v6026_v15  ;;  %v6253_v36 = vor.u32 %v8648_v32, %v6250_v34  ;;  %v6138_v31 = vld [vmem:[%s13728_s1 + $0x25c] sm:$0xf0]  ;;  %v8676_v15 = vld [vmem:[%s13728_s1 + $0x404] sm:$0xf] }
 0x14a   : > { %3598 = vmatpush.bf16.msrb.mxu0 %v6809_v49  ;;  %v6222_v49 = vld [vmem:[%s13728_s1 + $0x304] sm:$0xf0]  ;;  %v6362_v32 = vld [vmem:[%s13728_s1 + $0x41c] sm:$0xf0] }
 0x14b   : > { %3611 = vmatpush.bf16.msrb.mxu1 %v7033_v52  ;;  %v6446_v52 = vld [vmem:[%s13728_s1 + $0x4c4] sm:$0xf0]  ;;  %v6225_v59 = vor.u32 %v8641_v38, %v6222_v49  ;;  %v8613_v38 = vld [vmem:[%s13728_s1 + $0x20c] sm:$0xf]  ;;  %v6589_v49 = vor.u32 %v8732_v35, %v6586_v39 }
 0x14c   : > { %3624 = vmatpush.bf16.msrb.mxu2 %v7257_v53  ;;  %v11521_v53 = vld [vmem:[#allocation1 + $0x24] sm:$0xff]  ;;  %v6449_v60 = vor.u32 %v8697_v51, %v6446_v52  ;;  %v8669_v52 = vld [vmem:[%s13728_s1 + $0x3cc] sm:$0xf] }
 0x14d   : > { %3637 = vmatpush.bf16.msrb.mxu3 %v7481_v58  ;;  %v11533_v58 = vld [vmem:[#allocation1 + $0x2d] sm:$0xff]  ;;  %v6110_v51 = vld [vmem:[%s13728_s1 + $0x224] sm:$0xf0] }
 0x14e   : > { %3599 = vmatpush.bf16.msrb.mxu0 %v6781_v1  ;;  %v6673_v1 = vor.u32 %v8753_v55, %v6670_v56  ;;  %v6334_v55 = vld [vmem:[%s13728_s1 + $0x3e4] sm:$0xf0]  ;;  %v8725_v56 = vld [vmem:[%s13728_s1 + $0x58c] sm:$0xf]  ;;  %v6113_v63 = vor.u32 %v8613_v38, %v6110_v51  ;;  %v11725_v38 = vld [vmem:[#allocation1 + $0x12] sm:$0xff] }
 0x14f   : > { %3612 = vmatpush.bf16.msrb.mxu1 %v7005_v4  ;;  %v6418_v4 = vld [vmem:[%s13728_s1 + $0x48c] sm:$0xf0]  ;;  %v6337_v0 = vor.u32 %v8669_v52, %v6334_v55  ;;  %v8809_v39 = vld [vmem:[%s13728_s1 + $0x82c] sm:$0xf]  ;;  %v11734_v51 = vld [vmem:[#allocation1] sm:$0xff] }
 0x150   : > { %3625 = vmatpush.bf16.msrb.mxu2 %v7229_v8  ;;  %v8746_v8 = vld [vmem:[%s13728_s1 + $0x634] sm:$0xf]  ;;  %v11737_v52 = vld [vmem:[#allocation1 + $0x1b] sm:$0xff] }
 0x151   : > { %3638 = vmatpush.bf16.msrb.mxu3 %v7453_v19  ;;  %v6421_v19 = vor.u32 %v8690_v3, %v6418_v4  ;;  %v6645_v13 = vor.u32 %v8746_v8, %v6642_v5  ;;  %v8662_v3 = vld [vmem:[%s13728_s1 + $0x394] sm:$0xf]  ;;  %v6306_v5 = vld [vmem:[%s13728_s1 + $0x3ac] sm:$0xf0] }
 0x152   : > { %3600 = vmatpush.bf16.msrb.mxu0 %v6753_v17  ;;  %v3394_v10 = vpop.f32.mrf.mxu0  ;;  %v8683_v17 = vld [vmem:[%s13728_s1 + $0x43c] sm:$0xf] }
 0x153   : > { %3613 = vmatpush.bf16.msrb.mxu1 %v6977_v22  ;;  %v3395_v45 = vadd.f32 %v3394_v10, %v11402_v50  ;;  %v3407_v9 = vpop.f32.mrf.mxu1  ;;  %v6614_v50 = vld [vmem:[%s13728_s1 + $0x614] sm:$0xf0]  ;;  %v5945_v22 = vor.u32 %v8571_v43, %v5942_v7  ;;  %v6393_v24 = vor.u32 %v8683_v17, %v6390_v18  ;;  %v6530_v10 = vld [vmem:[%s13728_s1 + $0x56c] sm:$0xf0]  ;;  %v8879_v7 = vld [vmem:[%s13728_s1 + $0xa5c] sm:$0xf]  ;;  %v6309_v17 = vor.u32 %v8662_v3, %v6306_v5 }
 0x154   : > { %3626 = vmatpush.bf16.msrb.mxu2 %v7201_v23  ;;  %v6169_v23 = vor.u32 %v8627_v11, %v6166_v16  ;;  %v6950_v43 = vld [vmem:[%s13728_s1 + $0x8b4] sm:$0xf0]  ;;  %v8991_v18 = vld [vmem:[%s13728_s1 + $0xddc] sm:$0xf]  ;;  %v8914_v3 = vld [vmem:[%s13728_s1 + $0xb74] sm:$0xf] }
 0x155   : > { %3639 = vmatpush.bf16.msrb.mxu3 %v7425_v27  ;;  %3601 = vmatmul.bf16.vlgmr.msrb.gmra.mxu0 %v11521_v53  ;;  %v3408_v21 = vadd.f32 %v3407_v9, %v3395_v45  ;;  %v5914_v27 = vld [vmem:[%s13728_s1 + $0x9c] sm:$0xf0]  ;;  %v7174_v45 = vld [vmem:[%s13728_s1 + $0xa74] sm:$0xf0]  ;;  %v8935_v9 = vld [vmem:[%s13728_s1 + $0xc1c] sm:$0xf] }
 0x156   : > { %3645 = vmatpush.bf16.msra.mxu0 %v6057_v28  ;;  %3614 = vmatmul.bf16.vlgmr.msrb.gmra.mxu1 %v11533_v58  ;;  %v8620_v28 = vld [vmem:[%s13728_s1 + $0x244] sm:$0xf]  ;;  %v5917_v42 = vor.u32 %v8564_v26, %v5914_v27  ;;  %v6922_v26 = vld [vmem:[%s13728_s1 + $0x87c] sm:$0xf0] }
 0x157   : > { %3658 = vmatpush.bf16.msra.mxu1 %v6281_v29  ;;  %3627 = vmatmul.bf16.vlgmr.msrb.gmra.mxu2 %v11509_v41  ;;  %v8872_v27 = vld [vmem:[%s13728_s1 + $0xa24] sm:$0xf] }
 0x158   : > { %3671 = vmatpush.bf16.msra.mxu2 %v6505_v30  ;;  %3640 = vmatmul.bf16.vlgmr.msrb.gmra.mxu3 %v11524_v54  ;;  %v6617_v30 = vor.u32 %v8739_v20, %v6614_v50  ;;  %v7622_v20 = vld [vmem:[%s13728_s1 + $0xdf4] sm:$0xf0] }
 0x159   : > { %3684 = vmatpush.bf16.msra.mxu3 %v6729_v33 }
 0x15a   : > { %3646 = vmatpush.bf16.msra.mxu0 %v6029_v46  ;;  %v3420_v29 = vpop.f32.mrf.mxu2  ;;  %v3396_v46 = vpop.f32.mrf.mxu0 }
 0x15b   : > { %3659 = vmatpush.bf16.msra.mxu1 %v6253_v36  ;;  %v3421_v33 = vadd.f32 %v3420_v29, %v3408_v21  ;;  %v3433_v34 = vpop.f32.mrf.mxu3  ;;  %v6141_v36 = vor.u32 %v8620_v28, %v6138_v31  ;;  %v7625_v28 = vor.u32 %v8991_v18, %v7622_v20  ;;  %v7146_v29 = vld [vmem:[%s13728_s1 + $0xa3c] sm:$0xf0]  ;;  %v8865_v46 = vld [vmem:[%s13728_s1 + $0x9ec] sm:$0xf]  ;;  %v8963_v18 = vld [vmem:[%s13728_s1 + $0xcfc] sm:$0xf] }
 0x15c   : > { %3672 = vmatpush.bf16.msra.mxu2 %v6477_v25  ;;  %v6365_v25 = vor.u32 %v8676_v15, %v6362_v32  ;;  %v7370_v31 = vld [vmem:[%s13728_s1 + $0xbfc] sm:$0xf0]  ;;  %v8984_v15 = vld [vmem:[%s13728_s1 + $0xda4] sm:$0xf]  ;;  %v7510_v20 = vld [vmem:[%s13728_s1 + $0xd14] sm:$0xf0] }
 0x15d   : > { %3685 = vmatpush.bf16.msra.mxu3 %v6701_v40  ;;  %v11609_v44 = vadd.f32 %v3433_v34, %v3421_v33  ;;  %v3409_v40 = vpop.f32.mrf.mxu1  ;;  %v7594_v32 = vld [vmem:[%s13728_s1 + $0xdbc] sm:$0xf0]  ;;  %v7149_v34 = vor.u32 %v8872_v27, %v7146_v29  ;;  %v8844_v27 = vld [vmem:[%s13728_s1 + $0x944] sm:$0xf]  ;;  %v7513_v29 = vor.u32 %v8963_v18, %v7510_v20  ;;  %v8715_v18 = vld [vmem:[%s13728_s1 + $0x538] sm:$0xf0] }
 0x15e   : > { %3647 = vmatpush.bf16.msra.mxu0 %v6001_v57  ;;  %v6558_v57 = vld [vmem:[%s13728_s1 + $0x5a4] sm:$0xf0]  ;;  %v8977_v40 = vld [vmem:[%s13728_s1 + $0xd6c] sm:$0xf] }
 0x15f   : > { %3660 = vmatpush.bf16.msra.mxu1 %v6225_v59  ;;  %v5889_v59 = vor.u32 %v8557_v47, %v5886_v48  ;;  %v6561_v8 = vor.u32 %v8725_v56, %v6558_v57  ;;  %v8921_v47 = vld [vmem:[%s13728_s1 + $0xbac] sm:$0xf]  ;;  %v7342_v48 = vld [vmem:[%s13728_s1 + $0xbc4] sm:$0xf0]  ;;  %v8802_v56 = vld [vmem:[%s13728_s1 + $0x7f4] sm:$0xf] }
 0x160   : > { %3673 = vmatpush.bf16.msra.mxu2 %v6449_v60  ;;  %v8550_v60 = vld [vmem:[%s13728_s1 + $0x14] sm:$0xf]  ;;  %v11743_v57 = vld [vmem:[#allocation1 + $0x9] sm:$0xff]  ;;  %vm3855_vm2 = vcmp.ge.f32.partialorder %v11609_v44, 0.0 }
 0x161   : > { %3686 = vmatpush.bf16.msra.mxu3 %v6673_v1  ;;  %v8606_v1 = vld [vmem:[%s13728_s1 + $0x1d4] sm:$0xf]  ;;  %v5861_v11 = vor.u32 %v8550_v60, %v5858_v62  ;;  %v7345_v60 = vor.u32 %v8921_v47, %v7342_v48  ;;  %v6866_v62 = vld [vmem:[%s13728_s1 + $0x80c] sm:$0xf0]  ;;  %v8781_v47 = vld [vmem:[%s13728_s1 + $0x74c] sm:$0xf] }
 0x162   : > { %3648 = vmatpush.bf16.msra.mxu0 %v5973_v6  ;;  %v3422_v4 = vpop.f32.mrf.mxu2  ;;  %v8718_v6 = vld [vmem:[%s13728_s1 + $0x554] sm:$0xf]  ;;  %v6085_v16 = vor.u32 %v8606_v1, %v6082_v2  ;;  %v7090_v2 = vld [vmem:[%s13728_s1 + $0x9cc] sm:$0xf0]  ;;  %v6869_v5 = vor.u32 %v8802_v56, %v6866_v62  ;;  %v6782_v48 = vld [vmem:[%s13728_s1 + $0x764] sm:$0xf0] }
 0x163   : > { %3661 = vmatpush.bf16.msra.mxu1 %v6197_v37  ;;  %v3435_v37 = vpop.f32.mrf.mxu3  ;;  %v6533_v50 = vor.u32 %v8718_v6, %v6530_v10  ;;  %v7314_v4 = vld [vmem:[%s13728_s1 + $0xb8c] sm:$0xf0]  ;;  %v7006_v56 = vld [vmem:[%s13728_s1 + $0x924] sm:$0xf0]  ;;  %v8949_v62 = vld [vmem:[%s13728_s1 + $0xc8c] sm:$0xf] }
 0x164   : > { %3674 = vmatpush.bf16.msra.mxu2 %v6421_v19  ;;  %v8823_v19 = vld [vmem:[%s13728_s1 + $0x89c] sm:$0xf]  ;;  %v7317_v37 = vor.u32 %v8914_v3, %v7314_v4 }
 0x165   : > { %3687 = vmatpush.bf16.msra.mxu3 %v6645_v13  ;;  %v7398_v13 = vld [vmem:[%s13728_s1 + $0xc34] sm:$0xf0]  ;;  %v6953_v21 = vor.u32 %v8823_v19, %v6950_v43  ;;  %v8795_v19 = vld [vmem:[%s13728_s1 + $0x7bc] sm:$0xf] }
 0x166   : > { %3649 = vmatpush.bf16.msra.mxu0 %v5945_v22  ;;  %v7177_v22 = vor.u32 %v8879_v7, %v7174_v45  ;;  %v6838_v43 = vld [vmem:[%s13728_s1 + $0x7d4] sm:$0xf0]  ;;  %v8851_v7 = vld [vmem:[%s13728_s1 + $0x97c] sm:$0xf] }
 0x167   : > { %3662 = vmatpush.bf16.msra.mxu1 %v6169_v23  ;;  %v7401_v23 = vor.u32 %v8935_v9, %v7398_v13  ;;  %v7062_v13 = vld [vmem:[%s13728_s1 + $0x994] sm:$0xf0] }
 0x168   : > { %3675 = vmatpush.bf16.msra.mxu2 %v6393_v24  ;;  %v8816_v24 = vld [vmem:[%s13728_s1 + $0x864] sm:$0xf] }
 0x169   : > { %3688 = vmatpush.bf16.msra.mxu3 %v6617_v30  ;;  %v8928_v30 = vld [vmem:[%s13728_s1 + $0xbe4] sm:$0xf]  ;;  %v6925_v33 = vor.u32 %v8816_v24, %v6922_v26  ;;  %v6810_v26 = vld [vmem:[%s13728_s1 + $0x79c] sm:$0xf0] }
 0x16a   : > { %3650 = vmatpush.bf16.msra.mxu0 %v5917_v42  ;;  %v7373_v35 = vor.u32 %v8928_v30, %v7370_v31  ;;  %v6894_v42 = vld [vmem:[%s13728_s1 + $0x844] sm:$0xf0]  ;;  %v8788_v24 = vld [vmem:[%s13728_s1 + $0x784] sm:$0xf]  ;;  %v7034_v30 = vld [vmem:[%s13728_s1 + $0x95c] sm:$0xf0] }
 0x16b   : > { %3663 = vmatpush.bf16.msra.mxu1 %v6141_v36  ;;  %v7597_v36 = vor.u32 %v8984_v15, %v7594_v32  ;;  %v6897_v55 = vor.u32 %v8809_v39, %v6894_v42  ;;  %v8900_v31 = vld [vmem:[%s13728_s1 + $0xb04] sm:$0xf]  ;;  %v7258_v15 = vld [vmem:[%s13728_s1 + $0xb1c] sm:$0xf0]  ;;  %v6813_v39 = vor.u32 %v8788_v24, %v6810_v26 }
 0x16c   : > { %3676 = vmatpush.bf16.msra.mxu2 %v6365_v25  ;;  %v7118_v25 = vld [vmem:[%s13728_s1 + $0xa04] sm:$0xf0] }
 0x16d   : > { %3689 = vmatpush.bf16.msra.mxu3 %v6589_v49  ;;  %v7566_v49 = vld [vmem:[%s13728_s1 + $0xd84] sm:$0xf0] }
 0x16e   : > { %3651 = vmatpush.bf16.msra.mxu0 %v5889_v59  ;;  %v7121_v59 = vor.u32 %v8865_v46, %v7118_v25  ;;  %v7569_v1 = vor.u32 %v8977_v40, %v7566_v49  ;;  %v7261_v25 = vor.u32 %v8900_v31, %v7258_v15  ;;  %v8837_v40 = vld [vmem:[%s13728_s1 + $0x90c] sm:$0xf]  ;;  %v8652_v15 = vld [vmem:[%s13728_s1 + $0x340] sm:$0xf0] }
 0x16f   : > { %3664 = vmatpush.bf16.msra.mxu1 %v6113_v63  ;;  %v8858_v63 = vld [vmem:[%s13728_s1 + $0x9b4] sm:$0xf]  ;;  %v7009_v3 = vor.u32 %v8837_v40, %v7006_v56  ;;  %v8701_v56 = vld [vmem:[%s13728_s1 + $0x4c8] sm:$0xf0] }
 0x170   : > { %3677 = vmatpush.bf16.msra.mxu2 %v6337_v0  ;;  %v3114_v0 = vperm.slane %v11336_v12, 3  ;;  %v7538_v12 = vld [vmem:[%s13728_s1 + $0xd4c] sm:$0xf0]  ;;  %v7093_v10 = vor.u32 %v8858_v63, %v7090_v2  ;;  %v7454_v63 = vld [vmem:[%s13728_s1 + $0xca4] sm:$0xf0] }
 0x171   : > { %3690 = vmatpush.bf16.msra.mxu3 %v6561_v8  ;;  %v8970_v8 = vld [vmem:[%s13728_s1 + $0xd34] sm:$0xf]  ;;  %v6754_v2 = vld [vmem:[%s13728_s1 + $0x72c] sm:$0xf0] }
 0x172   : > { %3652 = vmatpush.bf16.msra.mxu0 %v5861_v11  ;;  %v3446_v6 = vpop.f32.mrf.mxu0  ;;  %v7541_v9 = vor.u32 %v8970_v8, %v7538_v12  ;;  %v8830_v8 = vld [vmem:[%s13728_s1 + $0x8d4] sm:$0xf]  ;;  %v6978_v12 = vld [vmem:[%s13728_s1 + $0x8ec] sm:$0xf0] }
 0x173   : > { %3665 = vmatpush.bf16.msra.mxu1 %v6085_v16  ;;  %v3447_v11 = vadd.f32 %v3446_v6, %v3114_v0  ;;  %v3459_v45 = vpop.f32.mrf.mxu1  ;;  %v8907_v16 = vld [vmem:[%s13728_s1 + $0xb3c] sm:$0xf]  ;;  %v6785_v0 = vor.u32 %v8781_v47, %v6782_v48  ;;  %v6981_v20 = vor.u32 %v8830_v8, %v6978_v12  ;;  %v8589_v47 = vld [vmem:[%s13728_s1 + $0x148] sm:$0xf0]  ;;  %v6228_v48 = vld [vmem:[%s13728_s1 + $0x2f0] sm:$0xf] }
 0x174   : > { %3678 = vmatpush.bf16.msra.mxu2 %v6309_v17  ;;  %v7286_v17 = vld [vmem:[%s13728_s1 + $0xb54] sm:$0xf0]  ;;  %v8750_v8 = vld [vmem:[%s13728_s1 + $0x650] sm:$0xf0] }
 0x175   : > { %3691 = vmatpush.bf16.msra.mxu3 %v6533_v50  ;;  %3653 = vmatmul.bf16.vlgmr.msra.gmra.mxu0 %v11734_v51  ;;  %v3460_v50 = vadd.f32 %v3459_v45, %v3447_v11  ;;  %v6060_v11 = vld [vmem:[%s13728_s1 + $0x1a0] sm:$0xf]  ;;  %v8603_v45 = vld [vmem:[%s13728_s1 + $0x1b8] sm:$0xf0] }
 0x176   : > { %3697 = vmatpush.bf16.msrb.mxu0 %v6953_v21  ;;  %3666 = vmatmul.bf16.vlgmr.msra.gmra.mxu1 %v11743_v57  ;;  %v6841_v21 = vor.u32 %v8795_v19, %v6838_v43  ;;  %v8942_v19 = vld [vmem:[%s13728_s1 + $0xc54] sm:$0xf]  ;;  %v7426_v43 = vld [vmem:[%s13728_s1 + $0xc6c] sm:$0xf0]  ;;  %v6061_v24 = vor.u32 %v8603_v45, %v6060_v11 }
 0x177   : > { %3710 = vmatpush.bf16.msrb.mxu1 %v7177_v22  ;;  %3679 = vmatmul.bf16.vlgmr.msra.gmra.mxu2 %v11725_v38  ;;  %v7065_v22 = vor.u32 %v8851_v7, %v7062_v13 }
 0x178   : > { %3723 = vmatpush.bf16.msrb.mxu2 %v7401_v23  ;;  %3692 = vmatmul.bf16.vlgmr.msra.gmra.mxu3 %v11737_v52  ;;  %v7289_v23 = vor.u32 %v8907_v16, %v7286_v17  ;;  %v8659_v16 = vld [vmem:[%s13728_s1 + $0x378] sm:$0xf0]  ;;  %v6508_v17 = vld [vmem:[%s13728_s1 + $0x520] sm:$0xf] }
 0x179   : > { %3736 = vmatpush.bf16.msrb.mxu3 %v7625_v28 }
 0x17a   : > { %3698 = vmatpush.bf16.msrb.mxu0 %v6925_v33  ;;  %v3472_v28 = vpop.f32.mrf.mxu2  ;;  %v3448_v46 = vpop.f32.mrf.mxu0 }
 0x17b   : > { %3711 = vmatpush.bf16.msrb.mxu1 %v7149_v34  ;;  %v3473_v32 = vadd.f32 %v3472_v28, %v3460_v50  ;;  %v3485_v33 = vpop.f32.mrf.mxu3  ;;  %v8956_v34 = vld [vmem:[%s13728_s1 + $0xcc4] sm:$0xf]  ;;  %v3461_v49 = vpop.f32.mrf.mxu1  ;;  %v6032_v28 = vld [vmem:[%s13728_s1 + $0x168] sm:$0xf] }
 0x17c   : > { %3724 = vmatpush.bf16.msrb.mxu2 %v7373_v35  ;;  %v7482_v35 = vld [vmem:[%s13728_s1 + $0xcdc] sm:$0xf0]  ;;  %v8645_v49 = vld [vmem:[%s13728_s1 + $0x308] sm:$0xf0] }
 0x17d   : > { %3737 = vmatpush.bf16.msrb.mxu3 %v7597_v36  ;;  %v11816_v42 = vadd.f32 %v3485_v33, %v3473_v32  ;;  %v7037_v36 = vor.u32 %v8844_v27, %v7034_v30  ;;  %v6509_v27 = vor.u32 %v8715_v18, %v6508_v17  ;;  %v6256_v30 = vld [vmem:[%s13728_s1 + $0x328] sm:$0xf]  ;;  %v8708_v33 = vld [vmem:[%s13728_s1 + $0x500] sm:$0xf0]  ;;  %v6620_v17 = vld [vmem:[%s13728_s1 + $0x600] sm:$0xf] }
 0x17e   : > { %3699 = vmatpush.bf16.msrb.mxu0 %v6897_v55  ;;  %v7485_v55 = vor.u32 %v8956_v34, %v7482_v35  ;;  %v6480_v32 = vld [vmem:[%s13728_s1 + $0x4e8] sm:$0xf]  ;;  %v8764_v35 = vld [vmem:[%s13728_s1 + $0x6c0] sm:$0xf0]  ;;  %v6257_v46 = vor.u32 %v8652_v15, %v6256_v30 }
 0x17f   : > { %3712 = vmatpush.bf16.msrb.mxu1 %v7121_v59  ;;  %v8893_v59 = vld [vmem:[%s13728_s1 + $0xacc] sm:$0xf]  ;;  %v6704_v34 = vld [vmem:[%s13728_s1 + $0x6a8] sm:$0xf]  ;;  %v8680_v30 = vld [vmem:[%s13728_s1 + $0x420] sm:$0xf0] }
 0x180   : > { %3725 = vmatpush.bf16.msrb.mxu2 %v7345_v60  ;;  %v7230_v60 = vld [vmem:[%s13728_s1 + $0xae4] sm:$0xf0]  ;;  %v6705_v40 = vor.u32 %v8764_v35, %v6704_v34 }
 0x181   : > { %3738 = vmatpush.bf16.msrb.mxu3 %v7569_v1  ;;  %v8774_v1 = vld [vmem:[%s13728_s1 + $0x714] sm:$0xf]  ;;  %v7233_v4 = vor.u32 %v8893_v59, %v7230_v60  ;;  %v8757_v59 = vld [vmem:[%s13728_s1 + $0x688] sm:$0xf0] }
 0x182   : > { %3700 = vmatpush.bf16.msrb.mxu0 %v6869_v5  ;;  %v8886_v5 = vld [vmem:[%s13728_s1 + $0xa94] sm:$0xf]  ;;  %v3474_v6 = vpop.f32.mrf.mxu2  ;;  %v6757_v13 = vor.u32 %v8774_v1, %v6754_v2  ;;  %v6424_v2 = vld [vmem:[%s13728_s1 + $0x478] sm:$0xf] }
 0x183   : > { %3713 = vmatpush.bf16.msrb.mxu1 %v7093_v10  ;;  %v7457_v10 = vor.u32 %v8949_v62, %v7454_v63  ;;  %v3487_v7 = vpop.f32.mrf.mxu3  ;;  %v6229_v62 = vor.u32 %v8645_v49, %v6228_v48  ;;  %v6116_v48 = vld [vmem:[%s13728_s1 + $0x210] sm:$0xf] }
 0x184   : > { %3726 = vmatpush.bf16.msrb.mxu2 %v7317_v37  ;;  %v7202_v37 = vld [vmem:[%s13728_s1 + $0xaac] sm:$0xf0] }
 0x185   : > { %3739 = vmatpush.bf16.msrb.mxu3 %v7541_v9  ;;  %v6284_v9 = vld [vmem:[%s13728_s1 + $0x360] sm:$0xf]  ;;  %v7205_v50 = vor.u32 %v8886_v5, %v7202_v37 }
 0x186   : > { %3701 = vmatpush.bf16.msrb.mxu0 %v6841_v21  ;;  %v6732_v21 = vld [vmem:[%s13728_s1 + $0x6e0] sm:$0xf]  ;;  %v6285_v26 = vor.u32 %v8659_v16, %v6284_v9  ;;  %v8631_v9 = vld [vmem:[%s13728_s1 + $0x298] sm:$0xf0] }
 0x187   : > { %3714 = vmatpush.bf16.msrb.mxu1 %v7065_v22  ;;  %v8771_v22 = vld [vmem:[%s13728_s1 + $0x6f8] sm:$0xf0]  ;;  %v5948_v37 = vld [vmem:[%s13728_s1 + $0xc0] sm:$0xf] }
 0x188   : > { %3727 = vmatpush.bf16.msrb.mxu2 %v7289_v23  ;;  %v7429_v23 = vor.u32 %v8942_v19, %v7426_v43  ;;  %v6733_v31 = vor.u32 %v8771_v22, %v6732_v21  ;;  %v8575_v19 = vld [vmem:[%s13728_s1 + $0xd8] sm:$0xf0]  ;;  %v6172_v43 = vld [vmem:[%s13728_s1 + $0x280] sm:$0xf]  ;;  %v5920_v22 = vld [vmem:[%s13728_s1 + $0x88] sm:$0xf] }
 0x189   : > { %3740 = vmatpush.bf16.msrb.mxu3 %v7513_v29  ;;  %v8596_v29 = vld [vmem:[%s13728_s1 + $0x180] sm:$0xf0]  ;;  %v8687_v16 = vld [vmem:[%s13728_s1 + $0x458] sm:$0xf0] }
 0x18a   : > { %3702 = vmatpush.bf16.msrb.mxu0 %v6813_v39  ;;  %v6033_v39 = vor.u32 %v8596_v29, %v6032_v28  ;;  %v8624_v28 = vld [vmem:[%s13728_s1 + $0x260] sm:$0xf0]  ;;  %v6368_v29 = vld [vmem:[%s13728_s1 + $0x408] sm:$0xf] }
 0x18b   : > { %3715 = vmatpush.bf16.msrb.mxu1 %v7037_v36  ;;  %v6481_v36 = vor.u32 %v8708_v33, %v6480_v32  ;;  %v6592_v32 = vld [vmem:[%s13728_s1 + $0x5c8] sm:$0xf]  ;;  %v8736_v33 = vld [vmem:[%s13728_s1 + $0x5e0] sm:$0xf0] }
 0x18c   : > { %3728 = vmatpush.bf16.msrb.mxu2 %v7261_v25  ;;  %v6004_v25 = vld [vmem:[%s13728_s1 + $0x130] sm:$0xf]  ;;  %v6593_v49 = vor.u32 %v8736_v33, %v6592_v32 }
 0x18d   : > { %3741 = vmatpush.bf16.msrb.mxu3 %v7485_v55  ;;  %v6452_v55 = vld [vmem:[%s13728_s1 + $0x4b0] sm:$0xf]  ;;  %v6005_v60 = vor.u32 %v8589_v47, %v6004_v25  ;;  %v8561_v47 = vld [vmem:[%s13728_s1 + $0x68] sm:$0xf0] }
 0x18e   : > { %3703 = vmatpush.bf16.msrb.mxu0 %v6785_v0  ;;  %v6453_v63 = vor.u32 %v8701_v56, %v6452_v55  ;;  %v6200_v0 = vld [vmem:[%s13728_s1 + $0x2b8] sm:$0xf]  ;;  %v5892_v25 = vld [vmem:[%s13728_s1 + $0x50] sm:$0xf]  ;;  %v8617_v55 = vld [vmem:[%s13728_s1 + $0x228] sm:$0xf0] }
 0x18f   : > { %3716 = vmatpush.bf16.msrb.mxu1 %v7009_v3  ;;  %v8694_v3 = vld [vmem:[%s13728_s1 + $0x490] sm:$0xf0]  ;;  %v6340_v56 = vld [vmem:[%s13728_s1 + $0x3d0] sm:$0xf] }
 0x190   : > { %3729 = vmatpush.bf16.msrb.mxu2 %v7233_v4  ;;  %v6648_v4 = vld [vmem:[%s13728_s1 + $0x638] sm:$0xf]  ;;  %v6900_v33 = vld [vmem:[%s13728_s1 + $0x830] sm:$0xf] }
 0x191   : > { %3742 = vmatpush.bf16.msrb.mxu3 %v7457_v10  ;;  %v6425_v10 = vor.u32 %v8694_v3, %v6424_v2  ;;  %v6649_v45 = vor.u32 %v8750_v8, %v6648_v4  ;;  %v6312_v2 = vld [vmem:[%s13728_s1 + $0x398] sm:$0xf]  ;;  %v8666_v8 = vld [vmem:[%s13728_s1 + $0x3b0] sm:$0xf0] }
 0x192   : > { %3704 = vmatpush.bf16.msrb.mxu0 %v6757_v13  ;;  %v3498_v5 = vpop.f32.mrf.mxu0  ;;  %v6396_v13 = vld [vmem:[%s13728_s1 + $0x440] sm:$0xf] }
 0x193   : > { %3717 = vmatpush.bf16.msrb.mxu1 %v6981_v20  ;;  %v3499_v7 = vadd.f32 %v3498_v5, %v11816_v42  ;;  %v3511_v11 = vpop.f32.mrf.mxu1  ;;  %v8743_v42 = vld [vmem:[%s13728_s1 + $0x618] sm:$0xf0]  ;;  %v5949_v20 = vor.u32 %v8575_v19, %v5948_v37  ;;  %v6397_v21 = vor.u32 %v8687_v16, %v6396_v13  ;;  %v8722_v5 = vld [vmem:[%s13728_s1 + $0x570] sm:$0xf0]  ;;  %v7180_v19 = vld [vmem:[%s13728_s1 + $0xa60] sm:$0xf]  ;;  %v6313_v13 = vor.u32 %v8666_v8, %v6312_v2 }
 0x194   : > { %3730 = vmatpush.bf16.msrb.mxu2 %v7205_v50  ;;  %v6173_v50 = vor.u32 %v8631_v9, %v6172_v43  ;;  %v8827_v37 = vld [vmem:[%s13728_s1 + $0x8b8] sm:$0xf0]  ;;  %v7628_v16 = vld [vmem:[%s13728_s1 + $0xde0] sm:$0xf] }
 0x195   : > { %3743 = vmatpush.bf16.msrb.mxu3 %v7429_v23  ;;  %3705 = vmatmul.bf16.vlgmr.msrb.gmra.mxu0 %v11521_v53  ;;  %v5976_v53 = vld [vmem:[%s13728_s1 + $0xf8] sm:$0xf]  ;;  %v3512_v18 = vadd.f32 %v3511_v11, %v3499_v7  ;;  %v8568_v23 = vld [vmem:[%s13728_s1 + $0xa0] sm:$0xf0]  ;;  %v8883_v7 = vld [vmem:[%s13728_s1 + $0xa78] sm:$0xf0] }
 0x196   : > { %3749 = vmatpush.bf16.msra.mxu0 %v6061_v24  ;;  %3718 = vmatmul.bf16.vlgmr.msrb.gmra.mxu1 %v11533_v58  ;;  %v8638_v58 = vld [vmem:[%s13728_s1 + $0x2d0] sm:$0xf0]  ;;  %v6144_v24 = vld [vmem:[%s13728_s1 + $0x248] sm:$0xf]  ;;  %v5921_v34 = vor.u32 %v8568_v23, %v5920_v22  ;;  %v7404_v11 = vld [vmem:[%s13728_s1 + $0xc20] sm:$0xf] }
 0x197   : > { %3762 = vmatpush.bf16.msra.mxu1 %v6285_v26  ;;  %3731 = vmatmul.bf16.vlgmr.msrb.gmra.mxu2 %v11509_v41  ;;  %v6676_v41 = vld [vmem:[%s13728_s1 + $0x670] sm:$0xf]  ;;  %v6201_v6 = vor.u32 %v8638_v58, %v6200_v0  ;;  %v8610_v58 = vld [vmem:[%s13728_s1 + $0x1f0] sm:$0xf0]  ;;  %v8820_v22 = vld [vmem:[%s13728_s1 + $0x880] sm:$0xf0] }
 0x198   : > { %3775 = vmatpush.bf16.msra.mxu2 %v6509_v27  ;;  %3744 = vmatmul.bf16.vlgmr.msrb.gmra.mxu3 %v11524_v54  ;;  %v8582_v54 = vld [vmem:[%s13728_s1 + $0x110] sm:$0xf0]  ;;  %v6677_v1 = vor.u32 %v8757_v59, %v6676_v41  ;;  %v6621_v27 = vor.u32 %v8743_v42, %v6620_v17  ;;  %v8673_v41 = vld [vmem:[%s13728_s1 + $0x3e8] sm:$0xf0]  ;;  %v6564_v59 = vld [vmem:[%s13728_s1 + $0x590] sm:$0xf] }
 0x199   : > { %3788 = vmatpush.bf16.msra.mxu3 %v6733_v31  ;;  %v5977_v12 = vor.u32 %v8582_v54, %v5976_v53  ;;  %v8554_v53 = vld [vmem:[%s13728_s1 + $0x30] sm:$0xf0]  ;;  %v6117_v54 = vor.u32 %v8617_v55, %v6116_v48  ;;  %v6341_v0 = vor.u32 %v8673_v41, %v6340_v56  ;;  %v8995_v17 = vld [vmem:[%s13728_s1 + $0xdf8] sm:$0xf0]  ;;  %v7152_v23 = vld [vmem:[%s13728_s1 + $0xa28] sm:$0xf] }
 0x19a   : > { %3750 = vmatpush.bf16.msra.mxu0 %v6033_v39  ;;  %v3524_v26 = vpop.f32.mrf.mxu2  ;;  %v3500_v39 = vpop.f32.mrf.mxu0  ;;  %v7572_v48 = vld [vmem:[%s13728_s1 + $0xd70] sm:$0xf]  ;;  %v6872_v56 = vld [vmem:[%s13728_s1 + $0x7f8] sm:$0xf]  ;;  %v8806_v41 = vld [vmem:[%s13728_s1 + $0x810] sm:$0xf0] }
 0x19b   : > { %3763 = vmatpush.bf16.msra.mxu1 %v6257_v46  ;;  %v3525_v31 = vadd.f32 %v3524_v26, %v3512_v18  ;;  %v3537_v15 = vpop.f32.mrf.mxu3  ;;  %v6145_v46 = vor.u32 %v8624_v28, %v6144_v24  ;;  %v7629_v24 = vor.u32 %v8995_v17, %v7628_v16  ;;  %v8876_v26 = vld [vmem:[%s13728_s1 + $0xa40] sm:$0xf0]  ;;  %v7124_v39 = vld [vmem:[%s13728_s1 + $0x9f0] sm:$0xf]  ;;  %v8799_v2 = vld [vmem:[%s13728_s1 + $0x7d8] sm:$0xf0] }
 0x19c   : > { %3776 = vmatpush.bf16.msra.mxu2 %v6481_v36  ;;  %v6369_v36 = vor.u32 %v8680_v30, %v6368_v29  ;;  %v8932_v28 = vld [vmem:[%s13728_s1 + $0xc00] sm:$0xf0]  ;;  %v7600_v29 = vld [vmem:[%s13728_s1 + $0xda8] sm:$0xf] }
 0x19d   : > { %3789 = vmatpush.bf16.msra.mxu3 %v6705_v40  ;;  %v12015_v35 = vadd.f32 %v3537_v15, %v3525_v31  ;;  %v3513_v40 = vpop.f32.mrf.mxu1  ;;  %v8988_v30 = vld [vmem:[%s13728_s1 + $0xdc0] sm:$0xf0]  ;;  %v7153_v15 = vor.u32 %v8876_v26, %v7152_v23 }
 0x19e   : > { %3751 = vmatpush.bf16.msra.mxu0 %v6005_v60  ;;  %v8729_v60 = vld [vmem:[%s13728_s1 + $0x5a8] sm:$0xf0]  ;;  %v8848_v17 = vld [vmem:[%s13728_s1 + $0x960] sm:$0xf0] }
 0x19f   : > { %3764 = vmatpush.bf16.msra.mxu1 %v6229_v62  ;;  %v5893_v62 = vor.u32 %v8561_v47, %v5892_v25  ;;  %v6565_v4 = vor.u32 %v8729_v60, %v6564_v59  ;;  %v7348_v25 = vld [vmem:[%s13728_s1 + $0xbb0] sm:$0xf]  ;;  %v8925_v47 = vld [vmem:[%s13728_s1 + $0xbc8] sm:$0xf0]  ;;  %v7320_v59 = vld [vmem:[%s13728_s1 + $0xb78] sm:$0xf] }
 0x1a0   : > { %3777 = vmatpush.bf16.msra.mxu2 %v6453_v63  ;;  %v5864_v63 = vld [vmem:[%s13728_s1 + $0x18] sm:$0xf]  ;;  %v7349_v55 = vor.u32 %v8925_v47, %v7348_v25  ;;  %v8918_v60 = vld [vmem:[%s13728_s1 + $0xb90] sm:$0xf0]  ;;  %vm3856_vm3 = vcmp.ge.f32.partialorder %v12015_v35, 0.0 }
 0x1a1   : > { %3790 = vmatpush.bf16.msra.mxu3 %v6677_v1  ;;  %v6088_v1 = vld [vmem:[%s13728_s1 + $0x1d8] sm:$0xf]  ;;  %v5865_v43 = vor.u32 %v8554_v53, %v5864_v63  ;;  %v8974_v63 = vld [vmem:[%s13728_s1 + $0xd50] sm:$0xf0]  ;;  %v6873_v53 = vor.u32 %v8806_v41, %v6872_v56 }
 0x1a2   : > { %3752 = vmatpush.bf16.msra.mxu0 %v5977_v12  ;;  %v3526_v3 = vpop.f32.mrf.mxu2  ;;  %v6536_v12 = vld [vmem:[%s13728_s1 + $0x558] sm:$0xf]  ;;  %v6089_v9 = vor.u32 %v8610_v58, %v6088_v1  ;;  %v7321_v1 = vor.u32 %v8918_v60, %v7320_v59  ;;  %v6844_v58 = vld [vmem:[%s13728_s1 + $0x7c0] sm:$0xf]  ;;  %v8778_v25 = vld [vmem:[%s13728_s1 + $0x730] sm:$0xf0] }
 0x1a3   : > { %3765 = vmatpush.bf16.msra.mxu1 %v6201_v6  ;;  %v3539_v6 = vpop.f32.mrf.mxu3  ;;  %v6537_v42 = vor.u32 %v8722_v5, %v6536_v12  ;;  %v7068_v3 = vld [vmem:[%s13728_s1 + $0x980] sm:$0xf]  ;;  %v8855_v12 = vld [vmem:[%s13728_s1 + $0x998] sm:$0xf0]  ;;  %v8890_v41 = vld [vmem:[%s13728_s1 + $0xab0] sm:$0xf0] }
 0x1a4   : > { %3778 = vmatpush.bf16.msra.mxu2 %v6425_v10  ;;  %v6956_v10 = vld [vmem:[%s13728_s1 + $0x8a0] sm:$0xf]  ;;  %v8911_v6 = vld [vmem:[%s13728_s1 + $0xb58] sm:$0xf0]  ;;  %v9026_v60 = vld [vmem:[%s13730_s3 + $0xec] sm:$0xf0] }
 0x1a5   : > { %3791 = vmatpush.bf16.msra.mxu3 %v6649_v45  ;;  %v8939_v45 = vld [vmem:[%s13728_s1 + $0xc38] sm:$0xf0]  ;;  %v6957_v18 = vor.u32 %v8827_v37, %v6956_v10  ;;  %v7292_v5 = vld [vmem:[%s13728_s1 + $0xb40] sm:$0xf] }
 0x1a6   : > { %3753 = vmatpush.bf16.msra.mxu0 %v5949_v20  ;;  %v7181_v20 = vor.u32 %v8883_v7, %v7180_v19  ;;  %v7516_v10 = vld [vmem:[%s13728_s1 + $0xd00] sm:$0xf]  ;;  %v8967_v37 = vld [vmem:[%s13728_s1 + $0xd18] sm:$0xf0]  ;;  %v6845_v19 = vor.u32 %v8799_v2, %v6844_v58  ;;  %v7293_v7 = vor.u32 %v8911_v6, %v7292_v5 }
 0x1a7   : > { %3766 = vmatpush.bf16.msra.mxu1 %v6173_v50  ;;  %v7405_v50 = vor.u32 %v8939_v45, %v7404_v11  ;;  %v6816_v11 = vld [vmem:[%s13728_s1 + $0x788] sm:$0xf]  ;;  %v8792_v45 = vld [vmem:[%s13728_s1 + $0x7a0] sm:$0xf0]  ;;  %v7517_v16 = vor.u32 %v8967_v37, %v7516_v10  ;;  %v7744_v59 = vld [vmem:[%s13730_s3 + $0xe0] sm:$0xf] }
 0x1a8   : > { %3779 = vmatpush.bf16.msra.mxu2 %v6397_v21  ;;  %v6928_v21 = vld [vmem:[%s13728_s1 + $0x868] sm:$0xf]  ;;  %v7745_v5 = vor.u32 %v9026_v60, %v7744_v59  ;;  %v7728_v37 = vld [vmem:[%s13730_s3 + $0xc0] sm:$0xf]  ;;  %v9010_v60 = vld [vmem:[%s13730_s3 + $0x6c] sm:$0xf0] }
 0x1a9   : > { %3792 = vmatpush.bf16.msra.mxu3 %v6621_v27  ;;  %v7376_v27 = vld [vmem:[%s13728_s1 + $0xbe8] sm:$0xf]  ;;  %v6929_v31 = vor.u32 %v8820_v22, %v6928_v21  ;;  %v8960_v21 = vld [vmem:[%s13728_s1 + $0xce0] sm:$0xf0]  ;;  %v6817_v22 = vor.u32 %v8792_v45, %v6816_v11  ;;  %v9054_v11 = vld [vmem:[%s13730_s3 + $0x1cc] sm:$0xf0] }
 0x1aa   : > { %3754 = vmatpush.bf16.msra.mxu0 %v5921_v34  ;;  %v7377_v32 = vor.u32 %v8932_v28, %v7376_v27  ;;  %v8813_v34 = vld [vmem:[%s13728_s1 + $0x848] sm:$0xf0]  ;;  %v6788_v27 = vld [vmem:[%s13728_s1 + $0x750] sm:$0xf]  ;;  %v7984_v45 = vld [vmem:[%s13730_s3 + $0x2c0] sm:$0xf] }
 0x1ab   : > { %3767 = vmatpush.bf16.msra.mxu1 %v6145_v46  ;;  %v7601_v46 = vor.u32 %v8988_v30, %v7600_v29  ;;  %v6901_v40 = vor.u32 %v8813_v34, %v6900_v33  ;;  %v8785_v28 = vld [vmem:[%s13728_s1 + $0x768] sm:$0xf0]  ;;  %v7012_v29 = vld [vmem:[%s13728_s1 + $0x910] sm:$0xf]  ;;  %v7680_v59 = vld [vmem:[%s13730_s3 + $0x60] sm:$0xf] }
 0x1ac   : > { %3780 = vmatpush.bf16.msra.mxu2 %v6369_v36  ;;  %v8869_v36 = vld [vmem:[%s13728_s1 + $0xa08] sm:$0xf0]  ;;  %v7460_v34 = vld [vmem:[%s13728_s1 + $0xc90] sm:$0xf] }
 0x1ad   : > { %3793 = vmatpush.bf16.msra.mxu3 %v6593_v49  ;;  %v7125_v49 = vor.u32 %v8869_v36, %v7124_v39  ;;  %v8897_v33 = vld [vmem:[%s13728_s1 + $0xae8] sm:$0xf0]  ;;  %v6760_v36 = vld [vmem:[%s13728_s1 + $0x718] sm:$0xf] }
 0x1ae   : > { %3755 = vmatpush.bf16.msra.mxu0 %v5893_v62  ;;  %v7544_v62 = vld [vmem:[%s13728_s1 + $0xd38] sm:$0xf]  ;;  %v8953_v39 = vld [vmem:[%s13728_s1 + $0xca8] sm:$0xf0] }
 0x1af   : > { %3768 = vmatpush.bf16.msra.mxu1 %v6117_v54  ;;  %v7545_v8 = vor.u32 %v8974_v63, %v7544_v62  ;;  %v7461_v56 = vor.u32 %v8953_v39, %v7460_v34  ;;  %v7872_v62 = vld [vmem:[%s13730_s3 + $0x1e0] sm:$0xf]  ;;  %v6761_v63 = vor.u32 %v8778_v25, %v6760_v36  ;;  %v9014_v25 = vld [vmem:[%s13730_s3 + $0x8c] sm:$0xf0] }
 0x1b0   : > { %3781 = vmatpush.bf16.msra.mxu2 %v6341_v0  ;;  %v7696_v36 = vld [vmem:[%s13730_s3 + $0x80] sm:$0xf] }
 0x1b1   : > { %3794 = vmatpush.bf16.msra.mxu3 %v6565_v4 }
 0x1b2   : > { %3756 = vmatpush.bf16.msra.mxu0 %v5865_v43  ;;  %v12165_v54 = vpop.f32.mrf.mxu0  ;;  %v7069_v43 = vor.u32 %v8855_v12, %v7068_v3  ;;  %v8128_v3 = vld [vmem:[%s13730_s3 + $0x3e0] sm:$0xf] }
 0x1b3   : > { %3769 = vmatpush.bf16.msra.mxu1 %v6089_v9  ;;  %v12176_v4 = vpop.f32.mrf.mxu1  ;;  %v7040_v9 = vld [vmem:[%s13728_s1 + $0x948] sm:$0xf] }
 0x1b4   : > { %3782 = vmatpush.bf16.msra.mxu2 %v6313_v13 }
 0x1b5   : > { %3795 = vmatpush.bf16.msra.mxu3 %v6537_v42  ;;  %3757 = vmatmul.bf16.vlgmr.msra.gmra.mxu0 %v11734_v51  ;;  %v7096_v51 = vld [vmem:[%s13728_s1 + $0x9b8] sm:$0xf]  ;;  %v7264_v42 = vld [vmem:[%s13728_s1 + $0xb08] sm:$0xf] }
 0x1b6   : > { %3801 = vmatpush.bf16.msrb.mxu0 %v6957_v18  ;;  %3770 = vmatmul.bf16.vlgmr.msra.gmra.mxu1 %v11743_v57  ;;  %v8862_v57 = vld [vmem:[%s13728_s1 + $0x9d0] sm:$0xf0]  ;;  %v8904_v18 = vld [vmem:[%s13728_s1 + $0xb20] sm:$0xf0] }
 0x1b7   : > { %3814 = vmatpush.bf16.msrb.mxu1 %v7181_v20  ;;  %3783 = vmatmul.bf16.vlgmr.msra.gmra.mxu2 %v11725_v38  ;;  %v8981_v38 = vld [vmem:[%s13728_s1 + $0xd88] sm:$0xf0]  ;;  %v7097_v0 = vor.u32 %v8862_v57, %v7096_v51  ;;  %v7265_v26 = vor.u32 %v8904_v18, %v7264_v42  ;;  %v7432_v51 = vld [vmem:[%s13728_s1 + $0xc58] sm:$0xf] }
 0x1b8   : > { %3827 = vmatpush.bf16.msrb.mxu2 %v7405_v50  ;;  %3796 = vmatmul.bf16.vlgmr.msra.gmra.mxu3 %v11737_v52  ;;  %v7573_v52 = vor.u32 %v8981_v38, %v7572_v48  ;;  %v7488_v50 = vld [vmem:[%s13728_s1 + $0xcc8] sm:$0xf]  ;;  %v6984_v38 = vld [vmem:[%s13728_s1 + $0x8d8] sm:$0xf] }
 0x1b9   : > { %3840 = vmatpush.bf16.msrb.mxu3 %v7629_v24  ;;  %v7041_v24 = vor.u32 %v8848_v17, %v7040_v9  ;;  %v9086_v9 = vld [vmem:[%s13730_s3 + $0x2cc] sm:$0xf0] }
 0x1ba   : > { %3802 = vmatpush.bf16.msrb.mxu0 %v6929_v31  ;;  %v12202_v13 = vpop.f32.mrf.mxu2  ;;  %v3552_v23 = vpop.f32.mrf.mxu0  ;;  %v7489_v31 = vor.u32 %v8960_v21, %v7488_v50  ;;  %v9118_v17 = vld [vmem:[%s13730_s3 + $0x3cc] sm:$0xf0]  ;;  %v7985_v50 = vor.u32 %v9086_v9, %v7984_v45  ;;  %v7712_v21 = vld [vmem:[%s13730_s3 + $0xa0] sm:$0xf] }
 0x1bb   : > { %3815 = vmatpush.bf16.msrb.mxu1 %v7153_v15  ;;  %v12213_v20 = vpop.f32.mrf.mxu3  ;;  %v3565_v30 = vpop.f32.mrf.mxu1  ;;  %v8841_v15 = vld [vmem:[%s13728_s1 + $0x928] sm:$0xf0]  ;;  %v7840_v23 = vld [vmem:[%s13730_s3 + $0x1a0] sm:$0xf]  ;;  %v9038_v45 = vld [vmem:[%s13730_s3 + $0x14c] sm:$0xf0] }
 0x1bc   : > { %3828 = vmatpush.bf16.msrb.mxu2 %v7377_v32  ;;  %v7236_v32 = vld [vmem:[%s13728_s1 + $0xad0] sm:$0xf]  ;;  %v7013_v47 = vor.u32 %v8841_v15, %v7012_v29  ;;  %v8096_v15 = vld [vmem:[%s13730_s3 + $0x3a0] sm:$0xf] }
 0x1bd   : > { %3841 = vmatpush.bf16.msrb.mxu3 %v7601_v46  ;;  %v6789_v46 = vor.u32 %v8785_v28, %v6788_v27  ;;  %v7237_v48 = vor.u32 %v8897_v33, %v7236_v32  ;;  %v9050_v27 = vld [vmem:[%s13730_s3 + $0x1ac] sm:$0xf0]  ;;  %v7968_v28 = vld [vmem:[%s13730_s3 + $0x2a0] sm:$0xf] }
 0x1be   : > { %3803 = vmatpush.bf16.msrb.mxu0 %v6901_v40  ;;  %v8834_v40 = vld [vmem:[%s13728_s1 + $0x8f0] sm:$0xf0]  ;;  %v9082_v29 = vld [vmem:[%s13730_s3 + $0x2ac] sm:$0xf0]  ;;  %v9283_v33 = vld [vmem:[#allocation1 + $0x3f] sm:$0xff]  ;;  %v7841_v39 = vor.u32 %v9050_v27, %v7840_v23 }
 0x1bf   : > { %3816 = vmatpush.bf16.msrb.mxu1 %v7125_v49  ;;  %v7208_v49 = vld [vmem:[%s13728_s1 + $0xa98] sm:$0xf]  ;;  %v6985_v58 = vor.u32 %v8834_v40, %v6984_v38  ;;  %v9281_v30 = vld [vmem:[#allocation1 + $0x2d] sm:$0xff]  ;;  %v7952_v40 = vld [vmem:[%s13730_s3 + $0x280] sm:$0xf] }
 0x1c0   : > { %3829 = vmatpush.bf16.msrb.mxu2 %v7349_v55  ;;  %v7209_v2 = vor.u32 %v8890_v41, %v7208_v49  ;;  %v9114_v32 = vld [vmem:[%s13730_s3 + $0x3ac] sm:$0xf0]  ;;  %v7697_v41 = vor.u32 %v9014_v25, %v7696_v36  ;;  %v7920_v9 = vld [vmem:[%s13730_s3 + $0x240] sm:$0xf]  ;;  %v3863_v36 = vmul.f32 0.01, %v12015_v35 }
 0x1c1   : > { %3842 = vmatpush.bf16.msrb.mxu3 %v7573_v52  ;;  %v8946_v52 = vld [vmem:[%s13728_s1 + $0xc70] sm:$0xf0]  ;;  %v9046_v38 = vld [vmem:[%s13730_s3 + $0x18c] sm:$0xf0]  ;;  %v7648_v27 = vld [vmem:[%s13730_s3 + $0x20] sm:$0xf] }
 0x1c2   : > { %3804 = vmatpush.bf16.msrb.mxu0 %v6873_v53  ;;  %v3578_v55 = vpop.f32.mrf.mxu2  ;;  %v9058_v53 = vld [vmem:[%s13730_s3 + $0x1ec] sm:$0xf0]  ;;  %v7433_v12 = vor.u32 %v8946_v52, %v7432_v51 }
 0x1c3   : > { %3817 = vmatpush.bf16.msrb.mxu1 %v7097_v0  ;;  %v3591_v57 = vpop.f32.mrf.mxu3  ;;  %v8000_v0 = vld [vmem:[%s13730_s3 + $0x2e0] sm:$0xf]  ;;  %v7873_v6 = vor.u32 %v9058_v53, %v7872_v62  ;;  %v9078_v49 = vld [vmem:[%s13730_s3 + $0x28c] sm:$0xf0] }
 0x1c4   : > { %3830 = vmatpush.bf16.msrb.mxu2 %v7321_v1  ;;  %v9090_v1 = vld [vmem:[%s13730_s3 + $0x2ec] sm:$0xf0]  ;;  %v8080_v55 = vld [vmem:[%s13730_s3 + $0x380] sm:$0xf]  ;;  %v7953_v57 = vor.u32 %v9078_v49, %v7952_v40 }
 0x1c5   : > { %3843 = vmatpush.bf16.msrb.mxu3 %v7545_v8  ;;  %v9122_v8 = vld [vmem:[%s13730_s3 + $0x3ec] sm:$0xf0]  ;;  %v8001_v10 = vor.u32 %v9090_v1, %v8000_v0  ;;  %v7808_v62 = vld [vmem:[%s13730_s3 + $0x160] sm:$0xf] }
 0x1c6   : > { %3805 = vmatpush.bf16.msrb.mxu0 %v6845_v19  ;;  %v9022_v19 = vld [vmem:[%s13730_s3 + $0xcc] sm:$0xf0]  ;;  %v7936_v1 = vld [vmem:[%s13730_s3 + $0x260] sm:$0xf] }
 0x1c7   : > { %3818 = vmatpush.bf16.msrb.mxu1 %v7069_v43  ;;  %v7856_v43 = vld [vmem:[%s13730_s3 + $0x1c0] sm:$0xf]  ;;  %v7729_v42 = vor.u32 %v9022_v19, %v7728_v37  ;;  %v9042_v0 = vld [vmem:[%s13730_s3 + $0x16c] sm:$0xf0] }
 0x1c8   : > { %3831 = vmatpush.bf16.msrb.mxu2 %v7293_v7  ;;  %v8129_v7 = vor.u32 %v9122_v8, %v8128_v3  ;;  %v7857_v18 = vor.u32 %v9054_v11, %v7856_v43  ;;  %v9106_v3 = vld [vmem:[%s13730_s3 + $0x36c] sm:$0xf0]  ;;  %v12396_v8 = vld [vmem:[%s13729_s2] sm:$0x7f] }
 0x1c9   : > { %3844 = vmatpush.bf16.msrb.mxu3 %v7517_v16  ;;  %v8112_v16 = vld [vmem:[%s13730_s3 + $0x3c0] sm:$0xf]  ;;  %v9006_v19 = vld [vmem:[%s13730_s3 + $0x4c] sm:$0xf0] }
 0x1ca   : > { %3806 = vmatpush.bf16.msrb.mxu0 %v6817_v22  ;;  %v9018_v22 = vld [vmem:[%s13730_s3 + $0xac] sm:$0xf0]  ;;  %v7664_v37 = vld [vmem:[%s13730_s3 + $0x40] sm:$0xf] }
 0x1cb   : > { %3819 = vmatpush.bf16.msrb.mxu1 %v7041_v24  ;;  %v9280_v24 = vld [vmem:[#allocation1 + $0x24] sm:$0xff]  ;;  %v7713_v34 = vor.u32 %v9018_v22, %v7712_v21  ;;  %v7792_v43 = vld [vmem:[%s13730_s3 + $0x140] sm:$0xf]  ;;  %v3861_v21 = vmul.f32 0.01, %v11198_v61  ;;  %v7665_v22 = vor.u32 %v9006_v19, %v7664_v37 }
 0x1cc   : > { %3832 = vmatpush.bf16.msrb.mxu2 %v7265_v26  ;;  %v8113_v26 = vor.u32 %v9118_v17, %v8112_v16  ;;  %v9070_v16 = vld [vmem:[%s13730_s3 + $0x24c] sm:$0xf0]  ;;  %v7760_v49 = vld [vmem:[%s13730_s3 + $0x100] sm:$0xf] }
 0x1cd   : > { %3845 = vmatpush.bf16.msrb.mxu3 %v7489_v31  ;;  %v9282_v31 = vld [vmem:[#allocation1 + $0x36] sm:$0xff]  ;;  %v3868_v37 = vsel %vm3854_vm1, %v11198_v61, %v3861_v21  ;;  %v8368_v61 = vld [vmem:[%s13730_s3 + $0x5c0] sm:$0xf] }
 0x1ce   : > { %3807 = vmatpush.bf16.msrb.mxu0 %v6789_v46  ;;  %v7969_v46 = vor.u32 %v9082_v29, %v7968_v28  ;;  %v9002_v28 = vld [vmem:[%s13730_s3 + $0x2c] sm:$0xf0]  ;;  %v7776_v29 = vld [vmem:[%s13730_s3 + $0x120] sm:$0xf] }
 0x1cf   : > { %3820 = vmatpush.bf16.msrb.mxu1 %v7013_v47  ;;  %v7824_v47 = vld [vmem:[%s13730_s3 + $0x180] sm:$0xf]  ;;  %v7649_v25 = vor.u32 %v9002_v28, %v7648_v27 }
 0x1d0   : > { %3833 = vmatpush.bf16.msrb.mxu2 %v7237_v48  ;;  %v8097_v48 = vor.u32 %v9114_v32, %v8096_v15  ;;  %v7825_v52 = vor.u32 %v9046_v38, %v7824_v47  ;;  %v9034_v32 = vld [vmem:[%s13730_s3 + $0x12c] sm:$0xf0]  ;;  %v7632_v47 = vld [vmem:[%s13730_s3] sm:$0xf] }
 0x1d1   : > { %3846 = vmatpush.bf16.msrb.mxu3 %v7461_v56  ;;  %v9110_v56 = vld [vmem:[%s13730_s3 + $0x38c] sm:$0xf0]  ;;  %v7777_v38 = vor.u32 %v9034_v32, %v7776_v29  ;;  %v8224_v29 = vld [vmem:[%s13730_s3 + $0x4a0] sm:$0xf]  ;;  %v7714_v32 = vld [vmem:[%s13730_s3 + $0xb0] sm:$0xf0] }
 0x1d2   : > { %3808 = vmatpush.bf16.msrb.mxu0 %v6761_v63  ;;  %v12365_v51 = vpop.f32.mrf.mxu0  ;;  %v8081_v53 = vor.u32 %v9110_v56, %v8080_v55  ;;  %v9030_v55 = vld [vmem:[%s13730_s3 + $0x10c] sm:$0xf0]  ;;  %v7888_v56 = vld [vmem:[%s13730_s3 + $0x200] sm:$0xf] }
 0x1d3   : > { %3821 = vmatpush.bf16.msrb.mxu1 %v6985_v58  ;;  %v12376_v63 = vpop.f32.mrf.mxu1  ;;  %v9074_v58 = vld [vmem:[%s13730_s3 + $0x26c] sm:$0xf0] }
 0x1d4   : > { %3834 = vmatpush.bf16.msrb.mxu2 %v7209_v2  ;;  %v8064_v2 = vld [vmem:[%s13730_s3 + $0x360] sm:$0xf] }
 0x1d5   : > { %3847 = vmatpush.bf16.msrb.mxu3 %v7433_v12  ;;  %3809 = vmatmul.bf16.vlgmr.msrb.gmra.mxu0 %v9280_v24  ;;  %v3115_v12 = vperm.slane %v12396_v8, 4  ;;  %v8065_v11 = vor.u32 %v9106_v3, %v8064_v2  ;;  %v7793_v24 = vor.u32 %v9038_v45, %v7792_v43  ;;  %v9186_v2 = vld [vmem:[%s13730_s3 + $0x5ec] sm:$0xf0]  ;;  %v9024_v3 = vld [vmem:[%s13730_s3 + $0xe4] sm:$0xf] }
 0x1d6   : > { %5071 = vmatpush.bf16.msra.mxu0 %v7745_v5  ;;  %3822 = vmatmul.bf16.vlgmr.msrb.gmra.mxu1 %v9281_v30  ;;  %v7681_v5 = vor.u32 %v9010_v60, %v7680_v59  ;;  %v9062_v59 = vld [vmem:[%s13730_s3 + $0x20c] sm:$0xf0]  ;;  %v8016_v60 = vld [vmem:[%s13730_s3 + $0x300] sm:$0xf] }
 0x1d7   : > { %5084 = vmatpush.bf16.msra.mxu1 %v7873_v6  ;;  %3835 = vmatmul.bf16.vlgmr.msrb.gmra.mxu2 %v9282_v31  ;;  %v7809_v6 = vor.u32 %v9042_v0, %v7808_v62  ;;  %v3551_v31 = vadd.f32 %v12165_v54, %v3115_v12  ;;  %v8032_v54 = vld [vmem:[%s13730_s3 + $0x320] sm:$0xf]  ;;  %v9094_v62 = vld [vmem:[%s13730_s3 + $0x30c] sm:$0xf0]  ;;  %v7746_v12 = vld [vmem:[%s13730_s3 + $0xf0] sm:$0xf0] }
 0x1d8   : > { %5097 = vmatpush.bf16.msra.mxu2 %v8001_v10  ;;  %3848 = vmatmul.bf16.vlgmr.msrb.gmra.mxu3 %v9283_v33  ;;  %v7937_v10 = vor.u32 %v9074_v58, %v7936_v1  ;;  %v7904_v33 = vld [vmem:[%s13730_s3 + $0x220] sm:$0xf]  ;;  %v8017_v43 = vor.u32 %v9094_v62, %v8016_v60  ;;  %v9008_v60 = vld [vmem:[%s13730_s3 + $0x64] sm:$0xf]  ;;  %v7682_v62 = vld [vmem:[%s13730_s3 + $0x70] sm:$0xf0] }
 0x1d9   : > { %5110 = vmatpush.bf16.msra.mxu3 %v8129_v7  ;;  %v8256_v0 = vld [vmem:[%s13730_s3 + $0x4e0] sm:$0xf] }
 0x1da   : > { %5072 = vmatpush.bf16.msra.mxu0 %v7729_v42  ;;  %v12408_v7 = vpop.f32.mrf.mxu2  ;;  %v3860_v42 = vmul.f32 0.01, %v10810_v14  ;;  %v3604_v23 = vpop.f32.mrf.mxu0  ;;  %v8384_v1 = vld [vmem:[%s13730_s3 + $0x5e0] sm:$0xf] }
 0x1db   : > { %5085 = vmatpush.bf16.msra.mxu1 %v7857_v18  ;;  %v12420_v17 = vpop.f32.mrf.mxu3  ;;  %v8048_v18 = vld [vmem:[%s13730_s3 + $0x340] sm:$0xf]  ;;  %v3617_v30 = vpop.f32.mrf.mxu1 }
 0x1dc   : > { %5098 = vmatpush.bf16.msra.mxu2 %v7985_v50  ;;  %v9102_v50 = vld [vmem:[%s13730_s3 + $0x34c] sm:$0xf0] }
 0x1dd   : > { %5111 = vmatpush.bf16.msra.mxu3 %v8113_v26  ;;  %v7921_v26 = vor.u32 %v9070_v16, %v7920_v9  ;;  %v8049_v15 = vor.u32 %v9102_v50, %v8048_v18  ;;  %v7749_v9 = vor.u32 %v9024_v3, %v7746_v12  ;;  %v8240_v16 = vld [vmem:[%s13730_s3 + $0x4c0] sm:$0xf]  ;;  %v9020_v18 = vld [vmem:[%s13730_s3 + $0xc4] sm:$0xf]  ;;  %v7730_v50 = vld [vmem:[%s13730_s3 + $0xd0] sm:$0xf0] }
 0x1de   : > { %5073 = vmatpush.bf16.msra.mxu0 %v7713_v34  ;;  %v9066_v34 = vld [vmem:[%s13730_s3 + $0x22c] sm:$0xf0]  ;;  %v7733_v28 = vor.u32 %v9020_v18, %v7730_v50  ;;  %v8304_v3 = vld [vmem:[%s13730_s3 + $0x540] sm:$0xf] }
 0x1df   : > { %5086 = vmatpush.bf16.msra.mxu1 %v7841_v39  ;;  %v3862_v39 = vmul.f32 0.01, %v11609_v44  ;;  %v7905_v40 = vor.u32 %v9066_v34, %v7904_v33  ;;  %v9146_v30 = vld [vmem:[%s13730_s3 + $0x4ac] sm:$0xf0] }
 0x1e0   : > { %5099 = vmatpush.bf16.msra.mxu2 %v7969_v46  ;;  %v9098_v46 = vld [vmem:[%s13730_s3 + $0x32c] sm:$0xf0]  ;;  %v8225_v34 = vor.u32 %v9146_v30, %v8224_v29  ;;  %v8272_v29 = vld [vmem:[%s13730_s3 + $0x500] sm:$0xf] }
 0x1e1   : > { %5112 = vmatpush.bf16.msra.mxu3 %v8097_v48  ;;  %v8998_v48 = vld [vmem:[%s13730_s3 + $0xc] sm:$0xf0]  ;;  %v3869_v45 = vsel %vm3855_vm2, %v11609_v44, %v3862_v39 }
 0x1e2   : > { %5074 = vmatpush.bf16.msra.mxu0 %v7697_v41  ;;  %v3630_v41 = vpop.f32.mrf.mxu2  ;;  %v7633_v58 = vor.u32 %v8998_v48, %v7632_v47  ;;  %v9182_v44 = vld [vmem:[%s13730_s3 + $0x5cc] sm:$0xf0]  ;;  %v9012_v47 = vld [vmem:[%s13730_s3 + $0x84] sm:$0xf]  ;;  %v7698_v48 = vld [vmem:[%s13730_s3 + $0x90] sm:$0xf0] }
 0x1e3   : > { %5087 = vmatpush.bf16.msra.mxu1 %v7825_v52  ;;  %v3564_v52 = vadd.f32 %v12176_v4, %v3551_v31  ;;  %v9154_v4 = vld [vmem:[%s13730_s3 + $0x4ec] sm:$0xf0]  ;;  %v8369_v27 = vor.u32 %v9182_v44, %v8368_v61  ;;  %v8192_v41 = vld [vmem:[%s13730_s3 + $0x460] sm:$0xf]  ;;  %v9000_v61 = vld [vmem:[%s13730_s3 + $0x24] sm:$0xf] }
 0x1e4   : > { %5100 = vmatpush.bf16.msra.mxu2 %v7953_v57  ;;  %v8033_v57 = vor.u32 %v9098_v46, %v8032_v54  ;;  %v9178_v31 = vld [vmem:[%s13730_s3 + $0x5ac] sm:$0xf0]  ;;  %v8208_v46 = vld [vmem:[%s13730_s3 + $0x480] sm:$0xf]  ;;  %v3116_v44 = vperm.slane %v12396_v8, 5 }
 0x1e5   : > { %5113 = vmatpush.bf16.msra.mxu3 %v8081_v53  ;;  %v3643_v53 = vpop.f32.mrf.mxu3  ;;  %v3577_v19 = vadd.f32 %v12202_v13, %v3564_v52  ;;  %v3870_v13 = vsel %vm3856_vm3, %v12015_v35, %v3863_v36  ;;  %v12538_v35 = vpack.c.bf16 %v3869_v45, %v3869_v45  ;;  %v9142_v36 = vld [vmem:[%s13730_s3 + $0x48c] sm:$0xf0] }
 0x1e6   : > { %5075 = vmatpush.bf16.msra.mxu0 %v7681_v5  ;;  %v3867_v5 = vsel %vm3853_vm0, %v10810_v14, %v3860_v42  ;;  %v8385_v14 = vor.u32 %v9186_v2, %v8384_v1  ;;  %v9150_v42 = vld [vmem:[%s13730_s3 + $0x4cc] sm:$0xf0]  ;;  %v7685_v1 = vor.u32 %v9008_v60, %v7682_v62  ;;  %v9148_v60 = vld [vmem:[%s13730_s3 + $0x4c4] sm:$0xf] }
 0x1e7   : > { %5088 = vmatpush.bf16.msra.mxu1 %v7809_v6  ;;  %v7761_v6 = vor.u32 %v9030_v55, %v7760_v49  ;;  %v12534_v21 = vpack.c.bf16 %v3867_v5, %v3867_v5  ;;  %v3590_v23 = vadd.f32 %v12213_v20, %v3577_v19  ;;  %v8352_v20 = vld [vmem:[%s13730_s3 + $0x5a0] sm:$0xf]  ;;  %v9138_v52 = vld [vmem:[%s13730_s3 + $0x46c] sm:$0xf0]  ;;  %v9004_v5 = vld [vmem:[%s13730_s3 + $0x44] sm:$0xf] }
 0x1e8   : > { %5101 = vmatpush.bf16.msra.mxu2 %v7937_v10  ;;  %v7889_v10 = vor.u32 %v9062_v59, %v7888_v56  ;;  %v8353_v39 = vor.u32 %v9178_v31, %v8352_v20  ;;  %v7701_v56 = vor.u32 %v9012_v47, %v7698_v48  ;;  %v9170_v59 = vld [vmem:[%s13730_s3 + $0x56c] sm:$0xf0]  ;;  %v8996_v31 = vld [vmem:[%s13730_s3 + $0x4] sm:$0xf] }
 0x1e9   : > { %5114 = vmatpush.bf16.msra.mxu3 %v8065_v11  ;;  %v8257_v11 = vor.u32 %v9154_v4, %v8256_v0  ;;  %v3603_v33 = vadd.f32 %v12365_v51, %v3590_v23  ;;  %v9174_v51 = vld [vmem:[%s13730_s3 + $0x58c] sm:$0xf0]  ;;  %v8193_v0 = vor.u32 %v9138_v52, %v8192_v41  ;;  %v8144_v23 = vld [vmem:[%s13730_s3 + $0x400] sm:$0xf]  ;;  %v7986_v52 = vld [vmem:[%s13730_s3 + $0x2d0] sm:$0xf0] }
 0x1ea   : > { %5076 = vmatpush.bf16.msra.mxu0 %v7665_v22  ;;  %v12536_v22 = vpack.c.bf16 %v3868_v37, %v3868_v37  ;;  %v9134_v2 = vld [vmem:[%s13730_s3 + $0x44c] sm:$0xf0] }
 0x1eb   : > { %5089 = vmatpush.bf16.msra.mxu1 %v7793_v24  ;;  %v8241_v24 = vor.u32 %v9150_v42, %v8240_v16  ;;  %v8288_v16 = vld [vmem:[%s13730_s3 + $0x520] sm:$0xf]  ;;  %v9162_v42 = vld [vmem:[%s13730_s3 + $0x52c] sm:$0xf0] }
 0x1ec   : > { %5102 = vmatpush.bf16.msra.mxu2 %v7921_v26  ;;  %v12541_v26 = vpack.c.bf16 %v3870_v13, %v3870_v13  ;;  %v7650_v13 = vld [vmem:[%s13730_s3 + $0x30] sm:$0xf0]  ;;  %v9158_v30 = vld [vmem:[%s13730_s3 + $0x50c] sm:$0xf0] }
 0x1ed   : > { %5115 = vmatpush.bf16.msra.mxu3 %v8049_v15  ;;  %v9016_v15 = vld [vmem:[%s13730_s3 + $0xa4] sm:$0xf]  ;;  %v8273_v47 = vor.u32 %v9158_v30, %v8272_v29  ;;  %v8194_v29 = vld [vmem:[%s13730_s3 + $0x470] sm:$0xf0] }
 0x1ee   : > { %5077 = vmatpush.bf16.msra.mxu0 %v7649_v25  ;;  %v7717_v54 = vor.u32 %v9016_v15, %v7714_v32  ;;  %v8336_v25 = vld [vmem:[%s13730_s3 + $0x580] sm:$0xf]  ;;  %v7634_v15 = vld [vmem:[%s13730_s3 + $0x10] sm:$0xf0]  ;;  %v9088_v32 = vld [vmem:[%s13730_s3 + $0x2e4] sm:$0xf] }
 0x1ef   : > { %5090 = vmatpush.bf16.msra.mxu1 %v7777_v38  ;;  %v3616_v38 = vadd.f32 %v12376_v63, %v3603_v33  ;;  %v8337_v55 = vor.u32 %v9174_v51, %v8336_v25  ;;  %v9152_v25 = vld [vmem:[%s13730_s3 + $0x4e4] sm:$0xf]  ;;  %v8258_v51 = vld [vmem:[%s13730_s3 + $0x4f0] sm:$0xf0]  ;;  %v7637_v48 = vor.u32 %v8996_v31, %v7634_v15 }
 0x1f0   : > { %5103 = vmatpush.bf16.msra.mxu2 %v7905_v40  ;;  %v8209_v40 = vor.u32 %v9142_v36, %v8208_v46  ;;  %v8130_v46 = vld [vmem:[%s13730_s3 + $0x3f0] sm:$0xf0]  ;;  %v8261_v41 = vor.u32 %v9152_v25, %v8258_v51  ;;  %v9068_v15 = vld [vmem:[%s13730_s3 + $0x244] sm:$0xf] }
 0x1f1   : > { %5116 = vmatpush.bf16.msra.mxu3 %v8033_v57  ;;  %v8320_v57 = vld [vmem:[%s13730_s3 + $0x560] sm:$0xf]  ;;  %v3629_v53 = vadd.f32 %v12408_v7, %v3616_v38  ;;  %v9166_v7 = vld [vmem:[%s13730_s3 + $0x54c] sm:$0xf0]  ;;  %v9132_v25 = vld [vmem:[%s13730_s3 + $0x444] sm:$0xf] }
 0x1f2   : > { %5078 = vmatpush.bf16.msra.mxu0 %v7633_v58  ;;  %v3654_v49 = vpop.f32.mrf.mxu0  ;;  %v8321_v4 = vor.u32 %v9170_v59, %v8320_v57  ;;  %v8176_v58 = vld [vmem:[%s13730_s3 + $0x440] sm:$0xf]  ;;  %v9116_v57 = vld [vmem:[%s13730_s3 + $0x3c4] sm:$0xf]  ;;  %v8114_v59 = vld [vmem:[%s13730_s3 + $0x3d0] sm:$0xf0] }
 0x1f3   : > { %5091 = vmatpush.bf16.msra.mxu1 %v7761_v6  ;;  %v12594_v63 = vpop.f32.mrf.mxu1  ;;  %v7666_v6 = vld [vmem:[%s13730_s3 + $0x50] sm:$0xf0]  ;;  %v3642_v37 = vadd.f32 %v12420_v17, %v3629_v53  ;;  %v8177_v19 = vor.u32 %v9134_v2, %v8176_v58 }
 0x1f4   : > { %5104 = vmatpush.bf16.msra.mxu2 %v7889_v10  ;;  %v7669_v45 = vor.u32 %v9004_v5, %v7666_v6  ;;  %v7970_v2 = vld [vmem:[%s13730_s3 + $0x2b0] sm:$0xf0] }
 0x1f5   : > { %5117 = vmatpush.bf16.msra.mxu3 %v8017_v43  ;;  %5079 = vmatmul.bf16.vlgmr.msra.gmra.mxu0 %v12534_v21  ;;  %vm3857_vm4 = vcmp.ge.f32.partialorder %v3642_v37, 0.0  ;;  %v3864_v18 = vmul.f32 0.01, %v3642_v37  ;;  %v8226_v5 = vld [vmem:[%s13730_s3 + $0x4b0] sm:$0xf0] }
 0x1f6   : > { %5123 = vmatpush.bf16.msrb.mxu0 %v8257_v11  ;;  %5092 = vmatmul.bf16.vlgmr.msra.gmra.mxu1 %v12536_v22  ;;  %v8305_v11 = vor.u32 %v9166_v7, %v8304_v3  ;;  %v9112_v3 = vld [vmem:[%s13730_s3 + $0x3a4] sm:$0xf]  ;;  %v8098_v7 = vld [vmem:[%s13730_s3 + $0x3b0] sm:$0xf0] }
 0x1f7   : > { %5136 = vmatpush.bf16.msrb.mxu1 %v8385_v14  ;;  %5105 = vmatmul.bf16.vlgmr.msra.gmra.mxu2 %v12538_v35  ;;  %v8160_v14 = vld [vmem:[%s13730_s3 + $0x420] sm:$0xf]  ;;  %v3871_v38 = vsel %vm3857_vm4, %v3642_v37, %v3864_v18  ;;  %v8101_v37 = vor.u32 %v9112_v3, %v8098_v7  ;;  %v8178_v51 = vld [vmem:[%s13730_s3 + $0x450] sm:$0xf0]  ;;  %v9124_v7 = vld [vmem:[%s13730_s3 + $0x404] sm:$0xf] }
 0x1f8   : > { %5118 = vmatmul.bf16.vlgmr.msra.gmra.mxu3 %v12541_v26  ;;  %v12704_v62 = vpack.c.bf16 %v3871_v38, %v3871_v38 }
 0x1f9   : > { %5162 = vmatpush.bf16.msrb.mxu3 %v7749_v9  ;;  %v9130_v9 = vld [vmem:[%s13730_s3 + $0x42c] sm:$0xf0] }
 0x1fa   : > { %5124 = vmatpush.bf16.msrb.mxu0 %v8241_v24  ;;  %v12615_v12 = vpop.f32.mrf.mxu2  ;;  %v3656_v43 = vpop.f32.mrf.mxu0  ;;  %v8161_v50 = vor.u32 %v9130_v9, %v8160_v14  ;;  %v8289_v24 = vor.u32 %v9162_v42, %v8288_v16  ;;  %v9108_v14 = vld [vmem:[%s13730_s3 + $0x384] sm:$0xf]  ;;  %v8082_v9 = vld [vmem:[%s13730_s3 + $0x390] sm:$0xf0] }
 0x1fb   : > { %5137 = vmatpush.bf16.msrb.mxu1 %v8369_v27  ;;  %v12626_v10 = vpop.f32.mrf.mxu3  ;;  %v3669_v17 = vpop.f32.mrf.mxu1  ;;  %v7653_v27 = vor.u32 %v9000_v61, %v7650_v13  ;;  %v9140_v16 = vld [vmem:[%s13730_s3 + $0x484] sm:$0xf]  ;;  %v8085_v42 = vor.u32 %v9108_v14, %v8082_v9  ;;  %v8008_v14 = vld [vmem:[%s13730_s3 + $0x2e8] sm:$0xf] }
 0x1fc   : > { %v9072_v13 = vld [vmem:[%s13730_s3 + $0x264] sm:$0xf] }
 0x1fd   : > { %5163 = vmatpush.bf16.msrb.mxu3 %v7733_v28  ;;  %v9126_v28 = vld [vmem:[%s13730_s3 + $0x40c] sm:$0xf0] }
 0x1fe   : > { %5125 = vmatpush.bf16.msrb.mxu0 %v8225_v34  ;;  %v3655_v34 = vadd.f32 %v3654_v49, %v3116_v44  ;;  %v8145_v36 = vor.u32 %v9126_v28, %v8144_v23  ;;  %v7938_v23 = vld [vmem:[%s13730_s3 + $0x270] sm:$0xf0]  ;;  %v9136_v28 = vld [vmem:[%s13730_s3 + $0x464] sm:$0xf] }
 0x1ff   : > { %5138 = vmatpush.bf16.msrb.mxu1 %v8353_v39  ;;  %v8002_v39 = vld [vmem:[%s13730_s3 + $0x2f0] sm:$0xf0] }
 0x201   : > { %5164 = vmatpush.bf16.msrb.mxu3 %v7717_v54  ;;  %v9120_v54 = vld [vmem:[%s13730_s3 + $0x3e4] sm:$0xf] }
 0x202   : > { %5126 = vmatpush.bf16.msrb.mxu0 %v8209_v40  ;;  %v3682_v20 = vpop.f32.mrf.mxu2  ;;  %v8005_v40 = vor.u32 %v9088_v32, %v8002_v39  ;;  %v8133_v49 = vor.u32 %v9120_v54, %v8130_v46  ;;  %v8197_v32 = vor.u32 %v9136_v28, %v8194_v29  ;;  %v9100_v39 = vld [vmem:[%s13730_s3 + $0x344] sm:$0xf]  ;;  %v8050_v54 = vld [vmem:[%s13730_s3 + $0x350] sm:$0xf0]  ;;  %v9023_v28 = vld [vmem:[%s13730_s3 + $0xd4] sm:$0xf0] }
 0x203   : > { %5139 = vmatpush.bf16.msrb.mxu1 %v8337_v55  ;;  %v3695_v33 = vpop.f32.mrf.mxu3  ;;  %v9084_v55 = vld [vmem:[%s13730_s3 + $0x2c4] sm:$0xf]  ;;  %v7941_v20 = vor.u32 %v9072_v13, %v7938_v23  ;;  %v8053_v38 = vor.u32 %v9100_v39, %v8050_v54  ;;  %v8402_v13 = vld [vmem:[%s13730_s3 + $0x610] sm:$0xf0]  ;;  %v7880_v29 = vld [vmem:[%s13730_s3 + $0x1e8] sm:$0xf] }
 0x204   : > { %v7989_v53 = vor.u32 %v9084_v55, %v7986_v52  ;;  %v8034_v52 = vld [vmem:[%s13730_s3 + $0x330] sm:$0xf0] }
 0x205   : > { %5165 = vmatpush.bf16.msrb.mxu3 %v7701_v56  ;;  %v3668_v56 = vadd.f32 %v12594_v63, %v3655_v34  ;;  %v8242_v63 = vld [vmem:[%s13730_s3 + $0x4d0] sm:$0xf0] }
 0x206   : > { %5127 = vmatpush.bf16.msrb.mxu0 %v8193_v0  ;;  %v8117_v0 = vor.u32 %v9116_v57, %v8114_v59  ;;  %v8245_v58 = vor.u32 %v9148_v60, %v8242_v63  ;;  %v7922_v34 = vld [vmem:[%s13730_s3 + $0x250] sm:$0xf0]  ;;  %v9128_v57 = vld [vmem:[%s13730_s3 + $0x424] sm:$0xf] }
 0x207   : > { %5140 = vmatpush.bf16.msrb.mxu1 %v8321_v4  ;;  %v9080_v4 = vld [vmem:[%s13730_s3 + $0x2a4] sm:$0xf]  ;;  %v8162_v63 = vld [vmem:[%s13730_s3 + $0x430] sm:$0xf0] }
 0x208   : > { %v7973_v6 = vor.u32 %v9080_v4, %v7970_v2  ;;  %v9092_v4 = vld [vmem:[%s13730_s3 + $0x304] sm:$0xf] }
 0x209   : > { %5166 = vmatpush.bf16.msrb.mxu3 %v7685_v1  ;;  %v3681_v1 = vadd.f32 %v12615_v12, %v3668_v56  ;;  %v9144_v12 = vld [vmem:[%s13730_s3 + $0x4a4] sm:$0xf]  ;;  %v8181_v56 = vor.u32 %v9132_v25, %v8178_v51  ;;  %v7864_v51 = vld [vmem:[%s13730_s3 + $0x1c8] sm:$0xf] }
 0x20a   : > { %5128 = vmatpush.bf16.msrb.mxu0 %v8177_v19  ;;  %v9076_v19 = vld [vmem:[%s13730_s3 + $0x284] sm:$0xf] }
 0x20b   : > { %5141 = vmatpush.bf16.msrb.mxu1 %v8305_v11  ;;  %v3694_v43 = vadd.f32 %v12626_v10, %v3681_v1  ;;  %v8229_v11 = vor.u32 %v9144_v12, %v8226_v5  ;;  %v8210_v10 = vld [vmem:[%s13730_s3 + $0x490] sm:$0xf0]  ;;  %v7752_v5 = vld [vmem:[%s13730_s3 + $0xe8] sm:$0xf] }
 0x20c   : > { %v8213_v44 = vor.u32 %v9140_v16, %v8210_v10  ;;  %v8018_v1 = vld [vmem:[%s13730_s3 + $0x310] sm:$0xf0]  ;;  %v9056_v10 = vld [vmem:[%s13730_s3 + $0x1e4] sm:$0xf] }
 0x20d   : > { %5167 = vmatpush.bf16.msrb.mxu3 %v7669_v45  ;;  %v7954_v45 = vld [vmem:[%s13730_s3 + $0x290] sm:$0xf0] }
 0x20e   : > { %5129 = vmatpush.bf16.msrb.mxu0 %v8161_v50  ;;  %v7957_v17 = vor.u32 %v9076_v19, %v7954_v45  ;;  %v8146_v12 = vld [vmem:[%s13730_s3 + $0x410] sm:$0xf0]  ;;  %v9027_v19 = vld [vmem:[%s13730_s3 + $0xf4] sm:$0xf0]  ;;  %v9190_v45 = vld [vmem:[%s13730_s3 + $0x60c] sm:$0xf0] }
 0x20f   : > { %5142 = vmatpush.bf16.msrb.mxu1 %v8289_v24  ;;  %v9104_v24 = vld [vmem:[%s13730_s3 + $0x364] sm:$0xf]  ;;  %v8149_v23 = vor.u32 %v9124_v7, %v8146_v12  ;;  %v7688_v7 = vld [vmem:[%s13730_s3 + $0x68] sm:$0xf]  ;;  %v9011_v12 = vld [vmem:[%s13730_s3 + $0x74] sm:$0xf0] }
 0x211   : > { %5168 = vmatpush.bf16.msrb.mxu3 %v7653_v27  ;;  %v8066_v27 = vld [vmem:[%s13730_s3 + $0x370] sm:$0xf0] }
 0x212   : > { %5130 = vmatpush.bf16.msrb.mxu0 %v8145_v36  ;;  %v3706_v61 = vpop.f32.mrf.mxu0  ;;  %v8069_v31 = vor.u32 %v9104_v24, %v8066_v27  ;;  %v7753_v24 = vor.u32 %v9027_v19, %v7752_v5  ;;  %v7736_v27 = vld [vmem:[%s13730_s3 + $0xc8] sm:$0xf] }
 0x213   : > { %5143 = vmatpush.bf16.msrb.mxu1 %v8273_v47  ;;  %v3707_v18 = vadd.f32 %v3706_v61, %v3694_v43  ;;  %v3719_v50 = vpop.f32.mrf.mxu1  ;;  %v9188_v61 = vld [vmem:[%s13730_s3 + $0x604] sm:$0xf]  ;;  %v7737_v54 = vor.u32 %v9023_v28, %v7736_v27  ;;  %v7794_v27 = vld [vmem:[%s13730_s3 + $0x150] sm:$0xf0]  ;;  %v7928_v28 = vld [vmem:[%s13730_s3 + $0x248] sm:$0xf] }
 0x215   : > { %5169 = vmatpush.bf16.msrb.mxu3 %v7637_v48  ;;  %5131 = vmatmul.bf16.vlgmr.msrb.gmra.mxu0 %v12704_v62  ;;  %v3720_v30 = vadd.f32 %v3719_v50, %v3707_v18  ;;  %v7925_v48 = vor.u32 %v9068_v15, %v7922_v34  ;;  %v8021_v50 = vor.u32 %v9092_v4, %v8018_v1  ;;  %v9052_v15 = vld [vmem:[%s13730_s3 + $0x1c4] sm:$0xf]  ;;  %v9087_v34 = vld [vmem:[%s13730_s3 + $0x2d4] sm:$0xf0]  ;;  %v7826_v4 = vld [vmem:[%s13730_s3 + $0x190] sm:$0xf0] }
 0x216   : > { %5188 = vmatpush.bf16.msra.mxu0 %v8005_v40  ;;  %v9064_v40 = vld [vmem:[%s13730_s3 + $0x224] sm:$0xf]  ;;  %v7960_v1 = vld [vmem:[%s13730_s3 + $0x288] sm:$0xf] }
 0x217   : > { %5201 = vmatpush.bf16.msra.mxu1 %v8133_v49  ;;  %v7906_v49 = vld [vmem:[%s13730_s3 + $0x230] sm:$0xf0] }
 0x218   : > { %5170 = vmatmul.bf16.vlgmr.msrb.gmra.mxu3 %v12534_v21  ;;  %v7909_v2 = vor.u32 %v9064_v40, %v7906_v49  ;;  %v7842_v40 = vld [vmem:[%s13730_s3 + $0x1b0] sm:$0xf0]  ;;  %v7976_v49 = vld [vmem:[%s13730_s3 + $0x2a8] sm:$0xf] }
 0x219   : > { %5214 = vmatpush.bf16.msra.mxu3 %v8261_v41  ;;  %v9096_v41 = vld [vmem:[%s13730_s3 + $0x324] sm:$0xf] }
 0x21a   : > { %5189 = vmatpush.bf16.msra.mxu0 %v7989_v53  ;;  %v3732_v33 = vpop.f32.mrf.mxu2  ;;  %v3708_v55 = vpop.f32.mrf.mxu0  ;;  %v9060_v53 = vld [vmem:[%s13730_s3 + $0x204] sm:$0xf]  ;;  %v8037_v3 = vor.u32 %v9096_v41, %v8034_v52  ;;  %v7704_v52 = vld [vmem:[%s13730_s3 + $0x88] sm:$0xf] }
 0x21b   : > { %5202 = vmatpush.bf16.msra.mxu1 %v8117_v0  ;;  %v3733_v46 = vadd.f32 %v3732_v33, %v3720_v30  ;;  %v3745_v36 = vpop.f32.mrf.mxu3  ;;  %v3721_v59 = vpop.f32.mrf.mxu1  ;;  %v7890_v0 = vld [vmem:[%s13730_s3 + $0x210] sm:$0xf0]  ;;  %v7992_v33 = vld [vmem:[%s13730_s3 + $0x2c8] sm:$0xf]  ;;  %v9083_v55 = vld [vmem:[%s13730_s3 + $0x2b4] sm:$0xf0] }
 0x21c   : > { %v7893_v18 = vor.u32 %v9060_v53, %v7890_v0  ;;  %v9051_v53 = vld [vmem:[%s13730_s3 + $0x1b4] sm:$0xf0]  ;;  %v9044_v0 = vld [vmem:[%s13730_s3 + $0x184] sm:$0xf] }
 0x21d   : > { %5215 = vmatpush.bf16.msra.mxu3 %v8245_v58  ;;  %v3746_v47 = vadd.f32 %v3745_v36, %v3733_v46  ;;  %v7720_v46 = vld [vmem:[%s13730_s3 + $0xa8] sm:$0xf]  ;;  %v9019_v36 = vld [vmem:[%s13730_s3 + $0xb4] sm:$0xf0] }
 0x21e   : > { %5190 = vmatpush.bf16.msra.mxu0 %v7973_v6  ;;  %v7721_v41 = vor.u32 %v9019_v36, %v7720_v46  ;;  %v9039_v36 = vld [vmem:[%s13730_s3 + $0x154] sm:$0xf0] }
 0x21f   : > { %5203 = vmatpush.bf16.msra.mxu1 %v8101_v37  ;;  %vm3858_vm5 = vcmp.ge.f32.partialorder %v3746_v47, 0.0  ;;  %v3865_v60 = vmul.f32 0.01, %v3746_v47  ;;  %v8165_v37 = vor.u32 %v9128_v57, %v8162_v63  ;;  %v9015_v57 = vld [vmem:[%s13730_s3 + $0x94] sm:$0xf0]  ;;  %v7977_v63 = vor.u32 %v9083_v55, %v7976_v49 }
 0x220   : > { %v3117_v49 = vperm.slane %v12396_v8, 6  ;;  %v7640_v55 = vld [vmem:[%s13730_s3 + $0x8] sm:$0xf] }
 0x221   : > { %5216 = vmatpush.bf16.msra.mxu3 %v8229_v11  ;;  %v3872_v58 = vsel %vm3858_vm5, %v3746_v47, %v3865_v60  ;;  %v8400_v11 = vld [vmem:[%s13730_s3 + $0x600] sm:$0xf]  ;;  %v7993_v47 = vor.u32 %v9087_v34, %v7992_v33  ;;  %v7848_v60 = vld [vmem:[%s13730_s3 + $0x1a8] sm:$0xf]  ;;  %v9003_v33 = vld [vmem:[%s13730_s3 + $0x34] sm:$0xf0] }
 0x222   : > { %5191 = vmatpush.bf16.msra.mxu0 %v7957_v17  ;;  %v12821_v6 = vpack.c.bf16 %v3872_v58, %v3872_v58  ;;  %v3734_v43 = vpop.f32.mrf.mxu2  ;;  %v8401_v16 = vor.u32 %v9190_v45, %v8400_v11  ;;  %v7874_v17 = vld [vmem:[%s13730_s3 + $0x1f0] sm:$0xf0]  ;;  %v9079_v58 = vld [vmem:[%s13730_s3 + $0x294] sm:$0xf0]  ;;  %v7849_v5 = vor.u32 %v9051_v53, %v7848_v60  ;;  %v9040_v45 = vld [vmem:[%s13730_s3 + $0x164] sm:$0xf] }
 0x223   : > { %5204 = vmatpush.bf16.msra.mxu1 %v8085_v42  ;;  %v3747_v9 = vpop.f32.mrf.mxu3  ;;  %v9091_v42 = vld [vmem:[%s13730_s3 + $0x2f4] sm:$0xf0]  ;;  %v7961_v19 = vor.u32 %v9079_v58, %v7960_v1  ;;  %v7784_v8 = vld [vmem:[%s13730_s3 + $0x128] sm:$0xf]  ;;  %v7762_v53 = vld [vmem:[%s13730_s3 + $0x110] sm:$0xf0] }
 0x224   : > { %5144 = vmatmul.bf16.vlgmr.msrb.gmra.mxu1 %v12821_v6  ;;  %5156 = vmatpush.bf16.msrb.mxu2 %v8401_v16  ;;  %v8009_v30 = vor.u32 %v9091_v42, %v8008_v14  ;;  %v9047_v11 = vld [vmem:[%s13730_s3 + $0x194] sm:$0xf0]  ;;  %v7810_v14 = vld [vmem:[%s13730_s3 + $0x170] sm:$0xf0]  ;;  %v7944_v9 = vld [vmem:[%s13730_s3 + $0x268] sm:$0xf]  ;;  %v7689_v42 = vor.u32 %v9011_v12, %v7688_v7 }
 0x225   : > { %5217 = vmatpush.bf16.msra.mxu3 %v8213_v44  ;;  %v7877_v44 = vor.u32 %v9056_v10, %v7874_v17  ;;  %v9075_v16 = vld [vmem:[%s13730_s3 + $0x274] sm:$0xf0]  ;;  %v7813_v17 = vor.u32 %v9040_v45, %v7810_v14  ;;  %v9057_v45 = vld [vmem:[%s13730_s3 + $0x1ec] sm:$0xf]  ;;  %v7768_v14 = vld [vmem:[%s13730_s3 + $0x108] sm:$0xf] }
 0x226   : > { %5192 = vmatpush.bf16.msra.mxu0 %v7941_v20  ;;  %v8405_v20 = vor.u32 %v9188_v61, %v8402_v13  ;;  %v7672_v61 = vld [vmem:[%s13730_s3 + $0x48] sm:$0xf]  ;;  %v9007_v13 = vld [vmem:[%s13730_s3 + $0x54] sm:$0xf0] }
 0x227   : > { %5205 = vmatpush.bf16.msra.mxu1 %v8069_v31  ;;  %v9059_v31 = vld [vmem:[%s13730_s3 + $0x1f4] sm:$0xf0] }
 0x228   : > { %5175 = vmatpush.bf16.msra.mxu2 %v7877_v44  ;;  %v7881_v25 = vor.u32 %v9059_v31, %v7880_v29  ;;  %v9071_v29 = vld [vmem:[%s13730_s3 + $0x254] sm:$0xf0] }
 0x229   : > { %5218 = vmatpush.bf16.msra.mxu3 %v8197_v32  ;;  %v7858_v32 = vld [vmem:[%s13730_s3 + $0x1d0] sm:$0xf0]  ;;  %v9035_v60 = vld [vmem:[%s13730_s3 + $0x134] sm:$0xf0] }
 0x22a   : > { %5193 = vmatpush.bf16.msra.mxu0 %v7925_v48  ;;  %v7861_v39 = vor.u32 %v9052_v15, %v7858_v32  ;;  %v9055_v48 = vld [vmem:[%s13730_s3 + $0x1d4] sm:$0xf0]  ;;  %v7673_v15 = vor.u32 %v9007_v13, %v7672_v61  ;;  %v7656_v32 = vld [vmem:[%s13730_s3 + $0x28] sm:$0xf] }
 0x22b   : > { %5206 = vmatpush.bf16.msra.mxu1 %v8053_v38  ;;  %v9048_v38 = vld [vmem:[%s13730_s3 + $0x1a4] sm:$0xf]  ;;  %v7865_v59 = vor.u32 %v9055_v48, %v7864_v51  ;;  %v7778_v51 = vld [vmem:[%s13730_s3 + $0x130] sm:$0xf0]  ;;  %v9067_v48 = vld [vmem:[%s13730_s3 + $0x234] sm:$0xf0] }
 0x22c   : > { %5176 = vmatpush.bf16.msra.mxu2 %v7861_v39  ;;  %v7800_v39 = vld [vmem:[%s13730_s3 + $0x148] sm:$0xf]  ;;  %v9155_v1 = vld [vmem:[%s13730_s3 + $0x4f4] sm:$0xf0] }
 0x22d   : > { %5219 = vmatpush.bf16.msra.mxu3 %v8181_v56  ;;  %v7845_v56 = vor.u32 %v9048_v38, %v7842_v40  ;;  %v9191_v7 = vld [vmem:[%s13730_s3 + $0x614] sm:$0xf0]  ;;  %v8248_v61 = vld [vmem:[%s13730_s3 + $0x4c8] sm:$0xf] }
 0x22e   : > { %5194 = vmatpush.bf16.msra.mxu0 %v7909_v2  ;;  %v7829_v2 = vor.u32 %v9044_v0, %v7826_v4  ;;  %v9063_v0 = vld [vmem:[%s13730_s3 + $0x214] sm:$0xf0]  ;;  %v8264_v4 = vld [vmem:[%s13730_s3 + $0x4e8] sm:$0xf] }
 0x22f   : > { %5207 = vmatpush.bf16.msra.mxu1 %v8037_v3  ;;  %v7705_v3 = vor.u32 %v9015_v57, %v7704_v52  ;;  %v7896_v52 = vld [vmem:[%s13730_s3 + $0x208] sm:$0xf]  ;;  %v7801_v57 = vor.u32 %v9039_v36, %v7800_v39  ;;  %v9151_v13 = vld [vmem:[%s13730_s3 + $0x4d4] sm:$0xf0] }
 0x230   : > { %5177 = vmatpush.bf16.msra.mxu2 %v7845_v56  ;;  %v7657_v56 = vor.u32 %v9003_v33, %v7656_v32  ;;  %v7850_v32 = vld [vmem:[%s13730_s3 + $0x1b8] sm:$0xf0]  ;;  %v8216_v33 = vld [vmem:[%s13730_s3 + $0x488] sm:$0xf] }
 0x231   : > { %5220 = vmatpush.bf16.msra.mxu3 %v8165_v37  ;;  %v7832_v37 = vld [vmem:[%s13730_s3 + $0x188] sm:$0xf] }
 0x232   : > { %5195 = vmatpush.bf16.msra.mxu0 %v7893_v18  ;;  %v12934_v43 = vpop.f32.mrf.mxu0  ;;  %v7833_v44 = vor.u32 %v9047_v11, %v7832_v37  ;;  %v7816_v18 = vld [vmem:[%s13730_s3 + $0x168] sm:$0xf]  ;;  %v7785_v37 = vor.u32 %v9035_v60, %v7784_v8  ;;  %v8265_v11 = vor.u32 %v9155_v1, %v8264_v4  ;;  %v9037_v60 = vld [vmem:[%s13730_s3 + $0x14c] sm:$0xf]  ;;  %v7802_v4 = vld [vmem:[%s13730_s3 + $0x158] sm:$0xf0] }
 0x233   : > { %5208 = vmatpush.bf16.msra.mxu1 %v8021_v50  ;;  %v12952_v10 = vpop.f32.mrf.mxu1  ;;  %v7945_v50 = vor.u32 %v9075_v16, %v7944_v9  ;;  %v9031_v9 = vld [vmem:[%s13730_s3 + $0x114] sm:$0xf0]  ;;  %v3759_v16 = vadd.f32 %v12934_v43, %v3117_v49  ;;  %v8168_v1 = vld [vmem:[%s13730_s3 + $0x428] sm:$0xf] }
 0x234   : > { %5178 = vmatpush.bf16.msra.mxu2 %v7829_v2 }
 0x235   : > { %5221 = vmatpush.bf16.msra.mxu3 %v8149_v23  ;;  %5196 = vmatmul.bf16.vlgmr.msra.gmra.mxu0 %v12538_v35  ;;  %v9043_v23 = vld [vmem:[%s13730_s3 + $0x174] sm:$0xf0] }
 0x236   : > { %5279 = vmatpush.bf16.msrb.mxu0 %v8009_v30  ;;  %5209 = vmatmul.bf16.vlgmr.msra.gmra.mxu1 %v12541_v26  ;;  %v7817_v34 = vor.u32 %v9043_v23, %v7816_v18  ;;  %v8249_v18 = vor.u32 %v9151_v13, %v8248_v61  ;;  %v3772_v23 = vadd.f32 %v12952_v10, %v3759_v16  ;;  %v9127_v16 = vld [vmem:[%s13730_s3 + $0x414] sm:$0xf0]  ;;  %v8010_v61 = vld [vmem:[%s13730_s3 + $0x2f8] sm:$0xf0] }
 0x237   : > { %5253 = vmatpush.bf16.msrb.mxu1 %v7753_v24  ;;  %v9036_v24 = vld [vmem:[%s13730_s3 + $0x144] sm:$0xf] }
 0x238   : > { %5222 = vmatmul.bf16.vlgmr.msra.gmra.mxu3 %v12704_v62  ;;  %5179 = vmatpush.bf16.msra.mxu2 %v7813_v17 }
 0x239   : > { %5247 = vmatpush.bf16.msrb.mxu3 %v8405_v20  ;;  %v7797_v20 = vor.u32 %v9036_v24, %v7794_v27  ;;  %v7866_v24 = vld [vmem:[%s13730_s3 + $0x1d8] sm:$0xf0]  ;;  %v8232_v27 = vld [vmem:[%s13730_s3 + $0x4a8] sm:$0xf] }
 0x23a   : > { %5280 = vmatpush.bf16.msrb.mxu0 %v7993_v47  ;;  %v12978_v30 = vpop.f32.mrf.mxu2  ;;  %v3760_v46 = vpop.f32.mrf.mxu0  ;;  %v7912_v47 = vld [vmem:[%s13730_s3 + $0x228] sm:$0xf] }
 0x23b   : > { %5254 = vmatpush.bf16.msrb.mxu1 %v7737_v54  ;;  %v12980_v31 = vpop.f32.mrf.mxu3  ;;  %v7929_v54 = vor.u32 %v9071_v29, %v7928_v28  ;;  %v3773_v38 = vpop.f32.mrf.mxu1  ;;  %v9147_v28 = vld [vmem:[%s13730_s3 + $0x4b4] sm:$0xf0] }
 0x23c   : > { %5180 = vmatpush.bf16.msra.mxu2 %v7797_v20  ;;  %v8233_v29 = vor.u32 %v9147_v28, %v8232_v27  ;;  %v9049_v20 = vld [vmem:[%s13730_s3 + $0x1ac] sm:$0xf]  ;;  %v8370_v27 = vld [vmem:[%s13730_s3 + $0x5d0] sm:$0xf0] }
 0x23d   : > { %5266 = vmatpush.bf16.msra.mxu3 %v7881_v25  ;;  %v9032_v25 = vld [vmem:[%s13730_s3 + $0x124] sm:$0xf]  ;;  %v7853_v39 = vor.u32 %v9049_v20, %v7850_v32  ;;  %v8376_v20 = vld [vmem:[%s13730_s3 + $0x5c8] sm:$0xf]  ;;  %v9029_v32 = vld [vmem:[%s13730_s3 + $0x10c] sm:$0xf] }
 0x23e   : > { %5281 = vmatpush.bf16.msrb.mxu0 %v7977_v63  ;;  %v7781_v40 = vor.u32 %v9032_v25, %v7778_v51  ;;  %v9028_v63 = vld [vmem:[%s13730_s3 + $0x104] sm:$0xf]  ;;  %v7834_v25 = vld [vmem:[%s13730_s3 + $0x198] sm:$0xf0]  ;;  %v8200_v51 = vld [vmem:[%s13730_s3 + $0x468] sm:$0xf] }
 0x23f   : > { %5255 = vmatpush.bf16.msrb.mxu1 %v7721_v41  ;;  %v8999_v41 = vld [vmem:[%s13730_s3 + $0x14] sm:$0xf0]  ;;  %v7765_v2 = vor.u32 %v9028_v63, %v7762_v53 }
 0x240   : > { %5181 = vmatpush.bf16.msra.mxu2 %v7781_v40 }
 0x241   : > { %5267 = vmatpush.bf16.msra.mxu3 %v7865_v59  ;;  %v7913_v59 = vor.u32 %v9067_v48, %v7912_v47  ;;  %v9139_v47 = vld [vmem:[%s13730_s3 + $0x474] sm:$0xf0] }
 0x242   : > { %5282 = vmatpush.bf16.msrb.mxu0 %v7961_v19  ;;  %v3786_v58 = vpop.f32.mrf.mxu2  ;;  %v7897_v19 = vor.u32 %v9063_v0, %v7896_v52  ;;  %v8201_v49 = vor.u32 %v9139_v47, %v8200_v51  ;;  %v8354_v51 = vld [vmem:[%s13730_s3 + $0x5b0] sm:$0xf0] }
 0x243   : > { %5256 = vmatpush.bf16.msrb.mxu1 %v7705_v3  ;;  %v8408_v3 = vld [vmem:[%s13730_s3 + $0x608] sm:$0xf]  ;;  %v3799_v12 = vpop.f32.mrf.mxu3  ;;  %v9131_v58 = vld [vmem:[%s13730_s3 + $0x434] sm:$0xf0] }
 0x244   : > { %v8409_v17 = vor.u32 %v9191_v7, %v8408_v3  ;;  %5182 = vmatpush.bf16.msra.mxu2 %v7765_v2  ;;  %v9184_v7 = vld [vmem:[%s13730_s3 + $0x5e4] sm:$0xf]  ;;  %v8386_v12 = vld [vmem:[%s13730_s3 + $0x5f0] sm:$0xf0] }
 0x245   : > { %5268 = vmatpush.bf16.msra.mxu3 %v7849_v5  ;;  %v7641_v5 = vor.u32 %v8999_v41, %v7640_v55  ;;  %v7818_v55 = vld [vmem:[%s13730_s3 + $0x178] sm:$0xf0]  ;;  %v9135_v41 = vld [vmem:[%s13730_s3 + $0x454] sm:$0xf0] }
 0x246   : > { %5283 = vmatpush.bf16.msrb.mxu0 %v7945_v50  ;;  %v9053_v50 = vld [vmem:[%s13730_s3 + $0x1cc] sm:$0xf] }
 0x247   : > { %5257 = vmatpush.bf16.msrb.mxu1 %v7689_v42  ;;  %v7882_v42 = vld [vmem:[%s13730_s3 + $0x1f8] sm:$0xf0]  ;;  %v7869_v10 = vor.u32 %v9053_v50, %v7866_v24  ;;  %v9180_v24 = vld [vmem:[%s13730_s3 + $0x5c4] sm:$0xf] }
 0x248   : > { %v7885_v43 = vor.u32 %v9057_v45, %v7882_v42  ;;  %v9033_v45 = vld [vmem:[%s13730_s3 + $0x12c] sm:$0xf] }
 0x249   : > { %5269 = vmatpush.bf16.msra.mxu3 %v7833_v44  ;;  %v7769_v44 = vor.u32 %v9031_v9, %v7768_v14  ;;  %v8152_v14 = vld [vmem:[%s13730_s3 + $0x408] sm:$0xf]  ;;  %v9089_v42 = vld [vmem:[%s13730_s3 + $0x2ec] sm:$0xf] }
 0x24a   : > { %5284 = vmatpush.bf16.msrb.mxu0 %v7929_v54 }
 0x24b   : > { %5258 = vmatpush.bf16.msrb.mxu1 %v7673_v15  ;;  %v3785_v15 = vadd.f32 %v12978_v30, %v3772_v23  ;;  %v9045_v30 = vld [vmem:[%s13730_s3 + $0x18c] sm:$0xf]  ;;  %v8153_v23 = vor.u32 %v9127_v16, %v8152_v14  ;;  %v9171_v14 = vld [vmem:[%s13730_s3 + $0x574] sm:$0xf0] }
 0x24c   : > { %v7837_v40 = vor.u32 %v9045_v30, %v7834_v25  ;;  %v9185_v30 = vld [vmem:[%s13730_s3 + $0x5ec] sm:$0xf]  ;;  %v9176_v25 = vld [vmem:[%s13730_s3 + $0x5a4] sm:$0xf] }
 0x24d   : > { %5270 = vmatpush.bf16.msra.mxu3 %v7817_v34  ;;  %v9143_v34 = vld [vmem:[%s13730_s3 + $0x494] sm:$0xf0]  ;;  %v3798_v46 = vadd.f32 %v12980_v31, %v3785_v15  ;;  %v9041_v31 = vld [vmem:[%s13730_s3 + $0x16c] sm:$0xf] }
 0x24e   : > { %5285 = vmatpush.bf16.msrb.mxu0 %v7913_v59  ;;  %v8217_v54 = vor.u32 %v9143_v34, %v8216_v33  ;;  %v7821_v8 = vor.u32 %v9041_v31, %v7818_v55  ;;  %v9183_v15 = vld [vmem:[%s13730_s3 + $0x5d4] sm:$0xf0]  ;;  %v7770_v33 = vld [vmem:[%s13730_s3 + $0x118] sm:$0xf0]  ;;  %v9085_v34 = vld [vmem:[%s13730_s3 + $0x2cc] sm:$0xf] }
 0x24f   : > { %5259 = vmatpush.bf16.msrb.mxu1 %v7657_v56  ;;  %v8184_v56 = vld [vmem:[%s13730_s3 + $0x448] sm:$0xf]  ;;  %v7773_v47 = vor.u32 %v9029_v32, %v7770_v33  ;;  %v9081_v31 = vld [vmem:[%s13730_s3 + $0x2ac] sm:$0xf]  ;;  %v7978_v55 = vld [vmem:[%s13730_s3 + $0x2b8] sm:$0xf0] }
 0x250   : > { %v8185_v59 = vor.u32 %v9135_v41, %v8184_v56  ;;  %v8357_v56 = vor.u32 %v9176_v25, %v8354_v51  ;;  %v9181_v41 = vld [vmem:[%s13730_s3 + $0x5cc] sm:$0xf]  ;;  %v7930_v33 = vld [vmem:[%s13730_s3 + $0x258] sm:$0xf0]  ;;  %v8296_v51 = vld [vmem:[%s13730_s3 + $0x528] sm:$0xf] }
 0x251   : > { %5271 = vmatpush.bf16.msra.mxu3 %v7801_v57  ;;  %v9073_v16 = vld [vmem:[%s13730_s3 + $0x26c] sm:$0xf] }
 0x252   : > { %5286 = vmatpush.bf16.msrb.mxu0 %v7897_v19  ;;  %v3810_v36 = vpop.f32.mrf.mxu0  ;;  %v8169_v19 = vor.u32 %v9131_v58, %v8168_v1  ;;  %v9077_v1 = vld [vmem:[%s13730_s3 + $0x28c] sm:$0xf]  ;;  %v7962_v58 = vld [vmem:[%s13730_s3 + $0x298] sm:$0xf0] }
 0x253   : > { %5260 = vmatpush.bf16.msrb.mxu1 %v7641_v5  ;;  %v3823_v48 = vpop.f32.mrf.mxu1  ;;  %v3811_v38 = vadd.f32 %v3810_v36, %v3798_v46  ;;  %v8392_v5 = vld [vmem:[%s13730_s3 + $0x5e8] sm:$0xf]  ;;  %v8394_v46 = vld [vmem:[%s13730_s3 + $0x5f8] sm:$0xf0]  ;;  %v8377_v36 = vor.u32 %v9183_v15, %v8376_v20  ;;  %v9069_v32 = vld [vmem:[%s13730_s3 + $0x24c] sm:$0xf] }
 0x254   : > { %v7933_v25 = vor.u32 %v9069_v32, %v7930_v33  ;;  %v8104_v32 = vld [vmem:[%s13730_s3 + $0x3a8] sm:$0xf]  ;;  %v9115_v33 = vld [vmem:[%s13730_s3 + $0x3b4] sm:$0xf0] }
 0x255   : > { %5272 = vmatpush.bf16.msra.mxu3 %v7785_v37  ;;  %5287 = vmatmul.bf16.vlgmr.msrb.gmra.mxu0 %v12538_v35  ;;  %v3824_v52 = vadd.f32 %v3823_v48, %v3811_v38  ;;  %v7805_v37 = vor.u32 %v9037_v60, %v7802_v4  ;;  %v8360_v38 = vld [vmem:[%s13730_s3 + $0x5a8] sm:$0xf]  ;;  %v7981_v60 = vor.u32 %v9081_v31, %v7978_v55 }
 0x256   : > { %5338 = vmatpush.bf16.msra.mxu0 %v8409_v17  ;;  %5261 = vmatmul.bf16.vlgmr.msrb.gmra.mxu1 %v12534_v21  ;;  %v7786_v17 = vld [vmem:[%s13730_s3 + $0x138] sm:$0xf0] }
 0x257   : > { %5305 = vmatpush.bf16.msra.mxu1 %v8265_v11  ;;  %v9187_v11 = vld [vmem:[%s13730_s3 + $0x5f4] sm:$0xf0] }
 0x259   : > { %5273 = vmatpush.bf16.msra.mxu3 %v7769_v44  ;;  %v8389_v44 = vor.u32 %v9184_v7, %v8386_v12  ;;  %v8362_v7 = vld [vmem:[%s13730_s3 + $0x5b8] sm:$0xf0] }
 0x25a   : > { %5357 = vmatpush.bf16.msrb.mxu0 %v7885_v43  ;;  %v3836_v57 = vpop.f32.mrf.mxu2  ;;  %v3812_v0 = vpop.f32.mrf.mxu0  ;;  %v8393_v43 = vor.u32 %v9187_v11, %v8392_v5  ;;  %v7965_v11 = vor.u32 %v9077_v1, %v7962_v58  ;;  %v8136_v58 = vld [vmem:[%s13730_s3 + $0x3e8] sm:$0xf] }
 0x25b   : > { %5306 = vmatpush.bf16.msra.mxu1 %v8249_v18  ;;  %v3837_v63 = vadd.f32 %v3836_v57, %v3824_v52  ;;  %v3849_v53 = vpop.f32.mrf.mxu3  ;;  %v3825_v2 = vpop.f32.mrf.mxu1  ;;  %v8378_v52 = vld [vmem:[%s13730_s3 + $0x5d8] sm:$0xf0]  ;;  %v13235_v0 = vld [vmem:[%s13731_s4] sm:$0xf] }
 0x25c   : > { %v8381_v4 = vor.u32 %v9181_v41, %v8378_v52  ;;  %v5059_v5 = vperm.slane %v13235_v0, 0  ;;  %v9165_v52 = vld [vmem:[%s13730_s3 + $0x54c] sm:$0xf] }
 0x25d   : > { %v3850_v3 = vadd.f32 %v3849_v53, %v3837_v63  ;;  %v8344_v63 = vld [vmem:[%s13730_s3 + $0x588] sm:$0xf]  ;;  %v9175_v53 = vld [vmem:[%s13730_s3 + $0x594] sm:$0xf0] }
 0x25e   : > { %5358 = vmatpush.bf16.msrb.mxu0 %v7869_v10  ;;  %v7789_v10 = vor.u32 %v9033_v45, %v7786_v17  ;;  %v8345_v12 = vor.u32 %v9175_v53, %v8344_v63  ;;  %v8328_v45 = vld [vmem:[%s13730_s3 + $0x568] sm:$0xf]  ;;  %v7946_v17 = vld [vmem:[%s13730_s3 + $0x278] sm:$0xf0]  ;;  %v9159_v53 = vld [vmem:[%s13730_s3 + $0x514] sm:$0xf0] }
 0x25f   : > { %5307 = vmatpush.bf16.msra.mxu1 %v8233_v29  ;;  %vm3859_vm6 = vcmp.ge.f32.partialorder %v3850_v3, 0.0  ;;  %v3866_v9 = vmul.f32 0.01, %v3850_v3  ;;  %v8013_v29 = vor.u32 %v9089_v42, %v8010_v61  ;;  %v8280_v63 = vld [vmem:[%s13730_s3 + $0x508] sm:$0xf] }
 0x261   : > { %v3873_v13 = vsel %vm3859_vm6, %v3850_v3, %v3866_v9  ;;  %v9177_v3 = vld [vmem:[%s13730_s3 + $0x5ac] sm:$0xf] }
 0x262   : > { %5359 = vmatpush.bf16.msrb.mxu0 %v7853_v39  ;;  %v13157_v18 = vpack.c.bf16 %v3873_v13, %v3873_v13  ;;  %v3838_v50 = vpop.f32.mrf.mxu2  ;;  %v7994_v39 = vld [vmem:[%s13730_s3 + $0x2d8] sm:$0xf0]  ;;  %v8365_v9 = vor.u32 %v9177_v3, %v8362_v7  ;;  %v9121_v3 = vld [vmem:[%s13730_s3 + $0x3ec] sm:$0xf] }
 0x263   : > { %5308 = vmatpush.bf16.msra.mxu1 %v8217_v54  ;;  %v3851_v28 = vpop.f32.mrf.mxu3  ;;  %v8373_v54 = vor.u32 %v9180_v24, %v8370_v27  ;;  %v7997_v48 = vor.u32 %v9085_v34, %v7994_v39  ;;  %v9164_v24 = vld [vmem:[%s13730_s3 + $0x544] sm:$0xf]  ;;  %v8306_v27 = vld [vmem:[%s13730_s3 + $0x550] sm:$0xf0]  ;;  %v9169_v39 = vld [vmem:[%s13730_s3 + $0x56c] sm:$0xf] }
 0x264   : > { %8414 = vmatmul.msk.bf16.vlgmr.msrb.gmra.mxu2 %vm5067_vm7, %v13157_v18  ;;  %8415 = vmatmul.msk.bf16.vlgmr.msrb.gmra.mxu3 %vm5067_vm7, %v13157_v18  ;;  %v7949_v28 = vor.u32 %v9073_v16, %v7946_v17  ;;  %v8309_v34 = vor.u32 %v9164_v24, %v8306_v27  ;;  %v9189_v16 = vld [vmem:[%s13730_s3 + $0x60c] sm:$0xf]  ;;  %v8410_v17 = vld [vmem:[%s13730_s3 + $0x618] sm:$0xf0] }
 0x265   : > { %5227 = vmatpush.bf16.msrb.mxu2 %v8389_v44  ;;  %5318 = vmatpush.bf16.msrb.mxu3 %v8393_v43  ;;  %v9173_v44 = vld [vmem:[%s13730_s3 + $0x58c] sm:$0xf]  ;;  %v8346_v43 = vld [vmem:[%s13730_s3 + $0x598] sm:$0xf0] }
 0x266   : > { %5360 = vmatpush.bf16.msrb.mxu0 %v7837_v40  ;;  %v9179_v40 = vld [vmem:[%s13730_s3 + $0x5b4] sm:$0xf0]  ;;  %v8349_v15 = vor.u32 %v9173_v44, %v8346_v43  ;;  %v9117_v24 = vld [vmem:[%s13730_s3 + $0x3cc] sm:$0xf]  ;;  %v8122_v27 = vld [vmem:[%s13730_s3 + $0x3d8] sm:$0xf0] }
 0x267   : > { %5309 = vmatpush.bf16.msra.mxu1 %v8201_v49  ;;  %8416 = vmatmul.msk.bf16.vlgmr.msra.gmra.mxu0 %vm5067_vm7, %v13157_v18  ;;  %v8397_v49 = vor.u32 %v9185_v30, %v8394_v46  ;;  %v8361_v57 = vor.u32 %v9179_v40, %v8360_v38  ;;  %v9160_v46 = vld [vmem:[%s13730_s3 + $0x524] sm:$0xf]  ;;  %v9065_v40 = vld [vmem:[%s13730_s3 + $0x22c] sm:$0xf]  ;;  %v9119_v44 = vld [vmem:[%s13730_s3 + $0x3d4] sm:$0xf0] }
 0x269   : > { %5228 = vmatpush.bf16.msrb.mxu2 %v8373_v54  ;;  %5319 = vmatpush.bf16.msrb.mxu3 %v8377_v36  ;;  %v8330_v54 = vld [vmem:[%s13730_s3 + $0x578] sm:$0xf0]  ;;  %v8290_v36 = vld [vmem:[%s13730_s3 + $0x530] sm:$0xf0] }
 0x26a   : > { %5361 = vmatpush.bf16.msrb.mxu0 %v7821_v8  ;;  %v9172_v8 = vld [vmem:[%s13730_s3 + $0x584] sm:$0xf]  ;;  %v8333_v38 = vor.u32 %v9169_v39, %v8330_v54  ;;  %v8293_v41 = vor.u32 %v9160_v46, %v8290_v36  ;;  %v9113_v39 = vld [vmem:[%s13730_s3 + $0x3ac] sm:$0xf]  ;;  %v8106_v54 = vld [vmem:[%s13730_s3 + $0x3b8] sm:$0xf0] }
 0x26b   : > { %5310 = vmatpush.bf16.msra.mxu1 %v8185_v59  ;;  %v8338_v59 = vld [vmem:[%s13730_s3 + $0x590] sm:$0xf0]  ;;  %v8109_v46 = vor.u32 %v9113_v39, %v8106_v54  ;;  %v8088_v36 = vld [vmem:[%s13730_s3 + $0x388] sm:$0xf]  ;;  %v9001_v39 = vld [vmem:[%s13730_s3 + $0x2c] sm:$0xf] }
 0x26c   : > { %v8341_v2 = vor.u32 %v9172_v8, %v8338_v59  ;;  %v9156_v8 = vld [vmem:[%s13730_s3 + $0x504] sm:$0xf]  ;;  %v7658_v54 = vld [vmem:[%s13730_s3 + $0x38] sm:$0xf0] }
 0x26d   : > { %5229 = vmatpush.bf16.msrb.mxu2 %v8357_v56  ;;  %5320 = vmatpush.bf16.msrb.mxu3 %v8361_v57  ;;  %v8314_v57 = vld [vmem:[%s13730_s3 + $0x558] sm:$0xf0] }
 0x26e   : > { %5362 = vmatpush.bf16.msrb.mxu0 %v7805_v37  ;;  %v9168_v37 = vld [vmem:[%s13730_s3 + $0x564] sm:$0xf]  ;;  %v8317_v7 = vor.u32 %v9165_v52, %v8314_v57  ;;  %v9103_v52 = vld [vmem:[%s13730_s3 + $0x354] sm:$0xf0]  ;;  %v9101_v57 = vld [vmem:[%s13730_s3 + $0x34c] sm:$0xf] }
 0x26f   : > { %5311 = vmatpush.bf16.msra.mxu1 %v8169_v19  ;;  %v8322_v19 = vld [vmem:[%s13730_s3 + $0x570] sm:$0xf0] }
 0x270   : > { %v8325_v13 = vor.u32 %v9168_v37, %v8322_v19  ;;  %v7898_v37 = vld [vmem:[%s13730_s3 + $0x218] sm:$0xf0] }
 0x271   : > { %5230 = vmatpush.bf16.msrb.mxu2 %v8341_v2  ;;  %5321 = vmatpush.bf16.msrb.mxu3 %v8345_v12  ;;  %v9123_v2 = vld [vmem:[%s13730_s3 + $0x3f4] sm:$0xf0]  ;;  %v8138_v12 = vld [vmem:[%s13730_s3 + $0x3f8] sm:$0xf0] }
 0x272   : > { %5363 = vmatpush.bf16.msrb.mxu0 %v7789_v10  ;;  %v5080_v42 = vpop.f32.mrf.mxu0  ;;  %v8312_v10 = vld [vmem:[%s13730_s3 + $0x548] sm:$0xf] }
 0x273   : > { %5312 = vmatpush.bf16.msra.mxu1 %v8153_v23  ;;  %v5093_v61 = vpop.f32.mrf.mxu1  ;;  %v5081_v50 = vadd.f32 %v5080_v42, %v5059_v5  ;;  %v8329_v23 = vor.u32 %v9171_v14, %v8328_v45  ;;  %v9061_v5 = vld [vmem:[%s13730_s3 + $0x20c] sm:$0xf]  ;;  %v8298_v45 = vld [vmem:[%s13730_s3 + $0x538] sm:$0xf0]  ;;  %v8281_v14 = vor.u32 %v9159_v53, %v8280_v63  ;;  %v8141_v42 = vor.u32 %v9121_v3, %v8138_v12  ;;  %v8040_v63 = vld [vmem:[%s13730_s3 + $0x328] sm:$0xf] }
 0x274   : > { %5183 = vmatmul.bf16.vlgmr.msra.gmra.mxu2 %v12536_v22  ;;  %5274 = vmatmul.bf16.vlgmr.msra.gmra.mxu3 %v12536_v22  ;;  %v9099_v53 = vld [vmem:[%s13730_s3 + $0x334] sm:$0xf0]  ;;  %v8024_v12 = vld [vmem:[%s13730_s3 + $0x308] sm:$0xf] }
 0x275   : > { %v5094_v20 = vadd.f32 %v5093_v61, %v5081_v50  ;;  %5231 = vmatpush.bf16.msrb.mxu2 %v8325_v13  ;;  %5322 = vmatpush.bf16.msrb.mxu3 %v8329_v23  ;;  %v7901_v61 = vor.u32 %v9061_v5, %v7898_v37  ;;  %v8120_v13 = vld [vmem:[%s13730_s3 + $0x3c8] sm:$0xf]  ;;  %v8041_v3 = vor.u32 %v9099_v53, %v8040_v63  ;;  %v9095_v5 = vld [vmem:[%s13730_s3 + $0x314] sm:$0xf0]  ;;  %v9093_v37 = vld [vmem:[%s13730_s3 + $0x30c] sm:$0xf] }
 0x276   : > { %5313 = vmatmul.bf16.vlgmr.msra.gmra.mxu1 %v12704_v62  ;;  %5364 = vmatpush.bf16.msrb.mxu0 %v7773_v47  ;;  %v9163_v47 = vld [vmem:[%s13730_s3 + $0x534] sm:$0xf0]  ;;  %v9141_v53 = vld [vmem:[%s13730_s3 + $0x48c] sm:$0xf] }
 0x277   : > { %5370 = vmatpush.bf16.msrb.mxu1 %v8013_v29  ;;  %v9167_v29 = vld [vmem:[%s13730_s3 + $0x554] sm:$0xf0]  ;;  %v8297_v59 = vor.u32 %v9163_v47, %v8296_v51  ;;  %v9109_v51 = vld [vmem:[%s13730_s3 + $0x38c] sm:$0xf] }
 0x278   : > { %v8313_v30 = vor.u32 %v9167_v29, %v8312_v10  ;;  %v8282_v10 = vld [vmem:[%s13730_s3 + $0x518] sm:$0xf0]  ;;  %v8413_v29 = vor.u32 %v9189_v16, %v8410_v17  ;;  %v9021_v16 = vld [vmem:[%s13730_s3 + $0xcc] sm:$0xf] }
 0x279   : > { %5365 = vmatmul.bf16.vlgmr.msrb.gmra.mxu0 %v12536_v22  ;;  %5232 = vmatpush.bf16.msrb.mxu2 %v8309_v34  ;;  %v7738_v17 = vld [vmem:[%s13730_s3 + $0xd8] sm:$0xf0] }
 0x27a   : > { %5409 = vmatpush.bf16.msra.mxu0 %v8397_v49  ;;  %v5106_v22 = vpop.f32.mrf.mxu2  ;;  %v7914_v49 = vld [vmem:[%s13730_s3 + $0x238] sm:$0xf0]  ;;  %v5082_v55 = vpop.f32.mrf.mxu0  ;;  %5323 = vmatpush.bf16.msrb.mxu3 %v8313_v30  ;;  %v8105_v30 = vor.u32 %v9115_v33, %v8104_v32  ;;  %v9005_v32 = vld [vmem:[%s13730_s3 + $0x4c] sm:$0xf] }
 0x27b   : > { %5371 = vmatpush.bf16.msrb.mxu1 %v7997_v48  ;;  %v5119_v48 = vpop.f32.mrf.mxu3  ;;  %v5107_v31 = vadd.f32 %v5106_v22, %v5094_v20  ;;  %v5095_v56 = vpop.f32.mrf.mxu1  ;;  %v7917_v1 = vor.u32 %v9065_v40, %v7914_v49  ;;  %v8121_v20 = vor.u32 %v9119_v44, %v8120_v13  ;;  %v9105_v40 = vld [vmem:[%s13730_s3 + $0x36c] sm:$0xf]  ;;  %v8074_v49 = vld [vmem:[%s13730_s3 + $0x378] sm:$0xf0] }
 0x27c   : > { %v8077_v56 = vor.u32 %v9105_v40, %v8074_v49  ;;  %v9017_v13 = vld [vmem:[%s13730_s3 + $0xac] sm:$0xf]  ;;  %v7722_v44 = vld [vmem:[%s13730_s3 + $0xb8] sm:$0xf0] }
 0x27d   : > { %5233 = vmatpush.bf16.msrb.mxu2 %v8293_v41  ;;  %v8056_v41 = vld [vmem:[%s13730_s3 + $0x348] sm:$0xf]  ;;  %v7674_v33 = vld [vmem:[%s13730_s3 + $0x58] sm:$0xf0] }
 0x27e   : > { %5410 = vmatpush.bf16.msra.mxu0 %v8381_v4  ;;  %v13337_v4 = vadd.f32 %v5119_v48, %v5107_v31  ;;  %5324 = vmatpush.bf16.msrb.mxu3 %v8297_v59  ;;  %v8072_v48 = vld [vmem:[%s13730_s3 + $0x368] sm:$0xf]  ;;  %v8057_v59 = vor.u32 %v9103_v52, %v8056_v41  ;;  %v9196_v41 = vld [vmem:[%s13732_s5 + $0x20] sm:$0xff] }
 0x27f   : > { %5372 = vmatpush.bf16.msrb.mxu1 %v7981_v60  ;;  %v8274_v60 = vld [vmem:[%s13730_s3 + $0x510] sm:$0xf0] }
 0x280   : > { %v8277_v19 = vor.u32 %v9156_v8, %v8274_v60  ;;  %v8058_v8 = vld [vmem:[%s13730_s3 + $0x358] sm:$0xf0] }
 0x281   : > { %v8061_v60 = vor.u32 %v9101_v57, %v8058_v8  ;;  %v9145_v8 = vld [vmem:[%s13730_s3 + $0x4ac] sm:$0xf] }
 0x282   : > { %5411 = vmatpush.bf16.msra.mxu0 %v8365_v9  ;;  %v8137_v9 = vor.u32 %v9123_v2, %v8136_v58  ;;  %v5108_v43 = vpop.f32.mrf.mxu2  ;;  %5234 = vmatpush.bf16.msrb.mxu2 %v8277_v19  ;;  %v9025_v19 = vld [vmem:[%s13730_s3 + $0xec] sm:$0xf] }
 0x283   : > { %5373 = vmatpush.bf16.msrb.mxu1 %v7965_v11  ;;  %v9161_v11 = vld [vmem:[%s13730_s3 + $0x52c] sm:$0xf]  ;;  %v5121_v50 = vpop.f32.mrf.mxu3  ;;  %5325 = vmatpush.bf16.msrb.mxu3 %v8281_v14  ;;  %v7725_v43 = vor.u32 %v9017_v13, %v7722_v44  ;;  %v9207_v44 = vld [vmem:[%s13732_s5 + $0x78] sm:$0xff] }
 0x284   : > { %v8301_v23 = vor.u32 %v9161_v11, %v8298_v45  ;;  %v7754_v11 = vld [vmem:[%s13730_s3 + $0xf8] sm:$0xf0]  ;;  %v8025_v45 = vor.u32 %v9095_v5, %v8024_v12  ;;  %v9133_v5 = vld [vmem:[%s13730_s3 + $0x44c] sm:$0xf] }
 0x285   : > { %5235 = vmatmul.bf16.vlgmr.msrb.gmra.mxu2 %v12821_v6 }
 0x286   : > { %5412 = vmatpush.bf16.msra.mxu0 %v8349_v15  ;;  %5292 = vmatpush.bf16.msra.mxu2 %v8137_v9  ;;  %v8125_v15 = vor.u32 %v9117_v24, %v8122_v27  ;;  %v7757_v9 = vor.u32 %v9025_v19, %v7754_v11  ;;  %v7706_v24 = vld [vmem:[%s13730_s3 + $0x98] sm:$0xf0] }
 0x287   : > { %5374 = vmatpush.bf16.msrb.mxu1 %v7949_v28  ;;  %v9157_v28 = vld [vmem:[%s13730_s3 + $0x50c] sm:$0xf]  ;;  %5383 = vmatpush.bf16.msra.mxu3 %v8141_v42 }
 0x288   : > { %v8285_v34 = vor.u32 %v9157_v28, %v8282_v10  ;;  %5326 = vmatmul.bf16.vlgmr.msrb.gmra.mxu3 %v12821_v6  ;;  %v9009_v10 = vld [vmem:[%s13730_s3 + $0x6c] sm:$0xf] }
 0x28a   : > { %5413 = vmatpush.bf16.msra.mxu0 %v8333_v38  ;;  %5293 = vmatpush.bf16.msra.mxu2 %v8121_v20  ;;  %v9107_v38 = vld [vmem:[%s13730_s3 + $0x374] sm:$0xf0] }
 0x28b   : > { %5375 = vmatpush.bf16.msrb.mxu1 %v7933_v25  ;;  %5384 = vmatpush.bf16.msra.mxu3 %v8125_v15  ;;  %v9111_v25 = vld [vmem:[%s13730_s3 + $0x394] sm:$0xf0]  ;;  %v8073_v31 = vor.u32 %v9107_v38, %v8072_v48  ;;  %v9153_v48 = vld [vmem:[%s13730_s3 + $0x4ec] sm:$0xf]  ;;  %v8266_v38 = vld [vmem:[%s13730_s3 + $0x4f8] sm:$0xf0] }
 0x28c   : > { %v8089_v47 = vor.u32 %v9111_v25, %v8088_v36  ;;  %v7661_v36 = vor.u32 %v9001_v39, %v7658_v54  ;;  %v8269_v49 = vor.u32 %v9153_v48, %v8266_v38  ;;  %v9201_v39 = vld [vmem:[%s13732_s5 + $0x48] sm:$0xff]  ;;  %v9215_v38 = vld [vmem:[%s13732_s5 + $0xb8] sm:$0xff] }
 0x28e   : > { %5414 = vmatpush.bf16.msra.mxu0 %v8317_v7  ;;  %5294 = vmatpush.bf16.msra.mxu2 %v8105_v30  ;;  %v9199_v30 = vld [vmem:[%s13732_s5 + $0x38] sm:$0xff] }
 0x28f   : > { %5376 = vmatpush.bf16.msrb.mxu1 %v7917_v1  ;;  %5385 = vmatpush.bf16.msra.mxu3 %v8109_v46  ;;  %v8042_v1 = vld [vmem:[%s13730_s3 + $0x338] sm:$0xf0] }
 0x292   : > { %5415 = vmatpush.bf16.msra.mxu0 %v8301_v23  ;;  %5295 = vmatpush.bf16.msra.mxu2 %v8089_v47  ;;  %v9013_v23 = vld [vmem:[%s13730_s3 + $0x8c] sm:$0xf]  ;;  %v7642_v47 = vld [vmem:[%s13730_s3 + $0x18] sm:$0xf0] }
 0x293   : > { %5377 = vmatpush.bf16.msrb.mxu1 %v7901_v61  ;;  %v7741_v61 = vor.u32 %v9021_v16, %v7738_v17  ;;  %v7709_v28 = vor.u32 %v9013_v23, %v7706_v24  ;;  %v9205_v23 = vld [vmem:[%s13732_s5 + $0x68] sm:$0xff]  ;;  %v9204_v24 = vld [vmem:[%s13732_s5 + $0x60] sm:$0xff] }
 0x296   : > { %5378 = vmatmul.bf16.vlgmr.msrb.gmra.mxu1 %v12538_v35  ;;  %5416 = vmatpush.bf16.msra.mxu0 %v8285_v34  ;;  %v8090_v35 = vld [vmem:[%s13730_s3 + $0x398] sm:$0xf0]  ;;  %v7677_v34 = vor.u32 %v9005_v32, %v7674_v33 }
 0x297   : > { %5429 = vmatpush.bf16.msra.mxu1 %v8413_v29  ;;  %v8093_v22 = vor.u32 %v9109_v51, %v8090_v35  ;;  %5296 = vmatpush.bf16.msra.mxu2 %v8073_v31  ;;  %v8997_v35 = vld [vmem:[%s13730_s3 + $0xc] sm:$0xf] }
 0x298   : > { %v7645_v40 = vor.u32 %v8997_v35, %v7642_v47  ;;  %v9149_v31 = vld [vmem:[%s13730_s3 + $0x4cc] sm:$0xf]  ;;  %v9200_v47 = vld [vmem:[%s13732_s5 + $0x40] sm:$0xff] }
 0x299   : > { %5417 = vmatmul.bf16.vlgmr.msra.gmra.mxu0 %v12821_v6  ;;  %v5132_v6 = vpop.f32.mrf.mxu0  ;;  %5386 = vmatpush.bf16.msra.mxu3 %v8093_v22  ;;  %v9198_v22 = vld [vmem:[%s13732_s5 + $0x30] sm:$0xff] }
 0x29a   : > { %v5133_v55 = vadd.f32 %v5132_v6, %v13337_v4  ;;  %v9097_v4 = vld [vmem:[%s13730_s3 + $0x32c] sm:$0xf] }
 0x29b   : > { %v13452_v58 = vpop.f32.mrf.mxu3  ;;  %5297 = vmatpush.bf16.msra.mxu2 %v8057_v59  ;;  %v8045_v7 = vor.u32 %v9097_v4, %v8042_v1  ;;  %v9197_v6 = vld [vmem:[%s13732_s5 + $0x28] sm:$0xff]  ;;  %v8234_v59 = vld [vmem:[%s13730_s3 + $0x4b8] sm:$0xf0]  ;;  %5721 = vmatpush.bf16.msrb.mxu1 %v9207_v44 }
 0x29c   : > { %v8237_v63 = vor.u32 %v9145_v8, %v8234_v59  ;;  %v8218_v4 = vld [vmem:[%s13730_s3 + $0x498] sm:$0xf0]  ;;  %v9213_v8 = vld [vmem:[%s13732_s5 + $0xa8] sm:$0xff] }
 0x29d   : > { %5387 = vmatpush.bf16.msra.mxu3 %v8077_v56  ;;  %v8221_v1 = vor.u32 %v9141_v53, %v8218_v4 }
 0x29f   : > { %5298 = vmatpush.bf16.msra.mxu2 %v8041_v3  ;;  %v8202_v3 = vld [vmem:[%s13730_s3 + $0x478] sm:$0xf0] }
 0x2a1   : > { %v5134_v2 = vpop.f32.mrf.mxu0  ;;  %5388 = vmatpush.bf16.msra.mxu3 %v8061_v60  ;;  %v5145_v50 = vpop.f32.mrf.mxu1  ;;  %v9195_v60 = vld [vmem:[%s13732_s5 + $0x18] sm:$0xff] }
 0x2a2   : > { %v13494_v27 = vadd.f32 %v5145_v50, %v5133_v55  ;;  %v8250_v55 = vld [vmem:[%s13730_s3 + $0x4d8] sm:$0xf0]  ;;  %v9137_v2 = vld [vmem:[%s13730_s3 + $0x46c] sm:$0xf]  ;;  %v9206_v50 = vld [vmem:[%s13732_s5 + $0x70] sm:$0xff] }
 0x2a3   : > { %v5173_v42 = vpop.f32.mrf.mxu3  ;;  %5299 = vmatpush.bf16.msra.mxu2 %v8025_v45  ;;  %v8253_v57 = vor.u32 %v9149_v31, %v8250_v55  ;;  %v9129_v45 = vld [vmem:[%s13730_s3 + $0x42c] sm:$0xf]  ;;  %5722 = vmatpush.bf16.msrb.mxu1 %v9206_v50  ;;  %v9223_v50 = vld [vmem:[%s13732_s5 + $0xf8] sm:$0xff] }
 0x2a4   : > { %v9125_v42 = vld [vmem:[%s13730_s3 + $0x40c] sm:$0xf]  ;;  %5747 = vmatpush.bf16.msrb.mxu0 %v9223_v50 }
 0x2a5   : > { %5389 = vmatpush.bf16.msra.mxu3 %v8045_v7  ;;  %v8205_v7 = vor.u32 %v9137_v2, %v8202_v3 }
 0x2a6   : > { %8417 = vmatmul.msk.bf16.vlgmr.msra.gmra.mxu1 %vm5067_vm7, %v13157_v18  ;;  %v8026_v18 = vld [vmem:[%s13730_s3 + $0x318] sm:$0xf0]  ;;  %5300 = vmatmul.bf16.vlgmr.msra.gmra.mxu2 %v12541_v26 }
 0x2a7   : > { %v8029_v14 = vor.u32 %v9093_v37, %v8026_v18  ;;  %5344 = vmatpush.bf16.msrb.mxu2 %v7757_v9  ;;  %v8186_v37 = vld [vmem:[%s13730_s3 + $0x458] sm:$0xf0]  ;;  %v9193_v18 = vld [vmem:[%s13732_s5 + $0x8] sm:$0xff]  ;;  %v9192_v9 = vld [vmem:[%s13732_s5] sm:$0xff]  ;;  %5723 = vmatpush.bf16.msrb.mxu1 %v9205_v23 }
 0x2a8   : > { %v8189_v11 = vor.u32 %v9133_v5, %v8186_v37  ;;  %v9209_v37 = vld [vmem:[%s13732_s5 + $0x88] sm:$0xff] }
 0x2a9   : > { %5390 = vmatpush.bf16.msra.mxu3 %v8029_v14  ;;  %v5147_v15 = vpop.f32.mrf.mxu1  ;;  %v8170_v14 = vld [vmem:[%s13730_s3 + $0x438] sm:$0xf0] }
 0x2aa   : > { %v8173_v16 = vor.u32 %v9129_v45, %v8170_v14  ;;  %v9202_v15 = vld [vmem:[%s13732_s5 + $0x50] sm:$0xff]  ;;  %v9208_v45 = vld [vmem:[%s13732_s5 + $0x80] sm:$0xff] }
 0x2ab   : > { %5345 = vmatpush.bf16.msrb.mxu2 %v7741_v61  ;;  %v8154_v61 = vld [vmem:[%s13730_s3 + $0x418] sm:$0xf0]  ;;  %5724 = vmatpush.bf16.msrb.mxu1 %v9204_v24  ;;  %v9222_v24 = vld [vmem:[%s13732_s5 + $0xf0] sm:$0xff] }
 0x2ac   : > { %5391 = vmatmul.bf16.vlgmr.msra.gmra.mxu3 %v12541_v26  ;;  %v7690_v26 = vld [vmem:[%s13730_s3 + $0x78] sm:$0xf0]  ;;  %5748 = vmatpush.bf16.msrb.mxu0 %v9222_v24 }
 0x2ad   : > { %v7693_v29 = vor.u32 %v9009_v10, %v7690_v26  ;;  %5708 = vmatpush.bf16.msrb.mxu3 %v9199_v30  ;;  %v9203_v10 = vld [vmem:[%s13732_s5 + $0x58] sm:$0xff] }
 0x2af   : > { %5346 = vmatpush.bf16.msrb.mxu2 %v7725_v43  ;;  %v8157_v43 = vor.u32 %v9125_v42, %v8154_v61  ;;  %5725 = vmatpush.bf16.msrb.mxu1 %v9203_v10 }
 0x2b1   : > { %5709 = vmatpush.bf16.msrb.mxu3 %v9198_v22  ;;  %v5061_v22 = vperm.slane %v13235_v0, 2 }
 0x2b2   : > { %v13502_v20 = vpop.f32.mrf.mxu0 }
 0x2b3   : > { %5347 = vmatpush.bf16.msrb.mxu2 %v7709_v28  ;;  %v13521_v51 = vpop.f32.mrf.mxu1  ;;  %5726 = vmatpush.bf16.msrb.mxu1 %v9202_v15 }
 0x2b5   : > { %5710 = vmatpush.bf16.msrb.mxu3 %v9197_v6 }
 0x2b7   : > { %5348 = vmatpush.bf16.msrb.mxu2 %v7693_v29  ;;  %5727 = vmatpush.bf16.msrb.mxu1 %v9201_v39 }
 0x2b9   : > { %5711 = vmatpush.bf16.msrb.mxu3 %v9196_v41 }
 0x2ba   : > { %v5199_v25 = vpop.f32.mrf.mxu0 }
 0x2bb   : > { %v13519_v46 = vpop.f32.mrf.mxu3  ;;  %5349 = vmatpush.bf16.msrb.mxu2 %v7677_v34  ;;  %v5212_v52 = vpop.f32.mrf.mxu1  ;;  %5728 = vmatpush.bf16.msrb.mxu1 %v9200_v47 }
 0x2bd   : > { %5712 = vmatpush.bf16.msrb.mxu3 %v9195_v60 }
 0x2bf   : > { %5350 = vmatpush.bf16.msrb.mxu2 %v7661_v36 }
 0x2c3   : > { %v5225_v56 = vpop.f32.mrf.mxu3  ;;  %5351 = vmatpush.bf16.msrb.mxu2 %v7645_v40  ;;  %v9214_v40 = vld [vmem:[%s13732_s5 + $0xb0] sm:$0xff] }
 0x2c6   : > { %5352 = vmatmul.bf16.vlgmr.msrb.gmra.mxu2 %v12534_v21  ;;  %v9194_v21 = vld [vmem:[%s13732_s5 + $0x10] sm:$0xff] }
 0x2c7   : > { %5396 = vmatpush.bf16.msra.mxu2 %v8269_v49  ;;  %5713 = vmatpush.bf16.msrb.mxu3 %v9194_v21 }
 0x2cb   : > { %5397 = vmatpush.bf16.msra.mxu2 %v8253_v57  ;;  %5714 = vmatpush.bf16.msrb.mxu3 %v9193_v18 }
 0x2cf   : > { %5398 = vmatpush.bf16.msra.mxu2 %v8237_v63  ;;  %5715 = vmatpush.bf16.msrb.mxu3 %v9192_v9 }
 0x2d2   : > { %v13584_v19 = vpop.f32.mrf.mxu0 }
 0x2d3   : > { %5399 = vmatpush.bf16.msra.mxu2 %v8221_v1  ;;  %v5262_v12 = vpop.f32.mrf.mxu1 }
 0x2d4   : > { %v5263_v6 = vadd.f32 %v5262_v12, %v5061_v22 }
 0x2d7   : > { %5400 = vmatpush.bf16.msra.mxu2 %v8205_v7 }
 0x2da   : > { %v5290_v13 = vpop.f32.mrf.mxu0 }
 0x2db   : > { %5401 = vmatpush.bf16.msra.mxu2 %v8189_v11  ;;  %v5264_v17 = vpop.f32.mrf.mxu1 }
 0x2df   : > { %5402 = vmatpush.bf16.msra.mxu2 %v8173_v16 }
 0x2e3   : > { %5403 = vmatpush.bf16.msra.mxu2 %v8157_v43 }
 0x2e4   : > { %v13614_v28 = vpop.f32.mrf.mxu0 }
 0x2e6   : > { %5404 = vmatmul.bf16.vlgmr.msra.gmra.mxu2 %v12704_v62 }
 0x2e7   : > { %v5158_v62 = vpop.f32.mrf.mxu2  ;;  %v5249_v29 = vpop.f32.mrf.mxu3  ;;  %5734 = vmatpush.bf16.msrb.mxu2 %v9215_v38 }
 0x2e8   : > { %v5159_v32 = vadd.f32 %v5158_v62, %v13494_v27  ;;  %v5060_v27 = vperm.slane %v13235_v0, 1 }
 0x2ea   : > { %vm5435_vm8 = vcmp.ge.f32.partialorder %v5159_v32, 0.0  ;;  %v5439_v33 = vmul.f32 0.01, %v5159_v32  ;;  %v5172_v49 = vadd.f32 %v13452_v58, %v5060_v27  ;;  %v9212_v58 = vld [vmem:[%s13732_s5 + $0xa0] sm:$0xff] }
 0x2eb   : > { %5735 = vmatpush.bf16.msrb.mxu2 %v9214_v40 }
 0x2ec   : > { %v5342_v34 = vpop.f32.mrf.mxu0  ;;  %v5443_v54 = vsel %vm5435_vm8, %v5159_v32, %v5439_v33  ;;  %v9219_v33 = vld [vmem:[%s13732_s5 + $0xd8] sm:$0xff] }
 0x2ed   : > { %v5447_v30 = vpack.c.bf16 %v5443_v54, %v5443_v54  ;;  %v9218_v34 = vld [vmem:[%s13732_s5 + $0xd0] sm:$0xff]  ;;  %v9217_v54 = vld [vmem:[%s13732_s5 + $0xc8] sm:$0xff] }
 0x2ef   : > { %v5160_v25 = vpop.f32.mrf.mxu2  ;;  %v5251_v35 = vpop.f32.mrf.mxu3  ;;  %5716 = vmatmul.bf16.vlgmr.msrb.gmra.mxu3 %v5447_v30  ;;  %5736 = vmatpush.bf16.msrb.mxu2 %v9213_v8  ;;  %v9216_v30 = vld [vmem:[%s13732_s5 + $0xc0] sm:$0xff] }
 0x2f0   : > { %v5062_v25 = vperm.slane %v13235_v0, 3  ;;  %v5515_v0 = vld [vmem:[%s13733_s6] sm:$0x1] }
 0x2f3   : > { %v13619_v26 = vpop.f32.mrf.mxu1  ;;  %5737 = vmatpush.bf16.msrb.mxu2 %v9212_v58 }
 0x2f6   : > { %v13633_v48 = vpop.f32.mrf.mxu0 }
 0x2f7   : > { %v5184_v31 = vpop.f32.mrf.mxu2  ;;  %v5275_v56 = vpop.f32.mrf.mxu3 }
 0x2f8   : > { %v5185_v55 = vadd.f32 %v5184_v31, %v5172_v49  ;;  %v5276_v41 = vadd.f32 %v5275_v56, %v5263_v6 }
 0x2fa   : > { %v5198_v52 = vadd.f32 %v13502_v20, %v5185_v55  ;;  %v5289_v59 = vadd.f32 %v13584_v19, %v5276_v41  ;;  %v9211_v20 = vld [vmem:[%s13732_s5 + $0x98] sm:$0xff] }
 0x2fb   : > { %v5316_v36 = vpop.f32.mrf.mxu1  ;;  %5738 = vmatpush.bf16.msrb.mxu2 %v9211_v20 }
 0x2fc   : > { %v5211_v60 = vadd.f32 %v13521_v51, %v5198_v52  ;;  %v9210_v51 = vld [vmem:[%s13732_s5 + $0x90] sm:$0xff] }
 0x2fe   : > { %v5368_v57 = vpop.f32.mrf.mxu0  ;;  %v5224_v21 = vadd.f32 %v13519_v46, %v5211_v60 }
 0x2ff   : > { %v5186_v63 = vpop.f32.mrf.mxu2  ;;  %v5277_v53 = vpop.f32.mrf.mxu3  ;;  %5739 = vmatpush.bf16.msrb.mxu2 %v9210_v51 }
 0x303   : > { %5740 = vmatpush.bf16.msrb.mxu2 %v9209_v37 }
 0x307   : > { %5741 = vmatpush.bf16.msrb.mxu2 %v9208_v45 }
 0x308   : > { %v5236_v1 = vpop.f32.mrf.mxu2 }
 0x309   : > { %v5237_v3 = vadd.f32 %v5236_v1, %v5224_v21 }
 0x30b   : > { %v5327_v7 = vpop.f32.mrf.mxu3  ;;  %v5250_v12 = vadd.f32 %v5249_v29, %v5237_v3 }
 0x30d   : > { %vm5436_vm9 = vcmp.ge.f32.partialorder %v5250_v12, 0.0  ;;  %v5440_v18 = vmul.f32 0.01, %v5250_v12 }
 0x30f   : > { %v5444_v19 = vsel %vm5436_vm9, %v5250_v12, %v5440_v18 }
 0x310   : > { %v5448_v46 = vpack.c.bf16 %v5444_v19, %v5444_v19  ;;  %v5238_v11 = vpop.f32.mrf.mxu2 }
 0x312   : > { %5729 = vmatmul.bf16.vlgmr.msrb.gmra.mxu1 %v5448_v46 }
 0x313   : > { %v5379_v4 = vpop.f32.mrf.mxu1  ;;  %v5329_v9 = vpop.f32.mrf.mxu3 }
 0x316   : > { %v5418_v2 = vpop.f32.mrf.mxu0 }
 0x31b   : > { %v5381_v5 = vpop.f32.mrf.mxu1 }
 0x31e   : > { %v5420_v14 = vpop.f32.mrf.mxu0 }
 0x323   : > { %v5431_v16 = vpop.f32.mrf.mxu1 }
 0x329   : > { %v5301_v42 = vpop.f32.mrf.mxu2 }
 0x32a   : > { %v5302_v61 = vadd.f32 %v5301_v42, %v5289_v59 }
 0x32b   : > { %v5433_v17 = vpop.f32.mrf.mxu1 }
 0x32c   : > { %v5315_v44 = vadd.f32 %v13619_v26, %v5302_v61  ;;  %v9221_v26 = vld [vmem:[%s13732_s5 + $0xe8] sm:$0xff] }
 0x32d   : > { %5749 = vmatpush.bf16.msrb.mxu0 %v9221_v26 }
 0x32e   : > { %v5328_v43 = vadd.f32 %v5327_v7, %v5315_v44 }
 0x32f   : > { %v5392_v13 = vpop.f32.mrf.mxu3 }
 0x330   : > { %v5341_v23 = vadd.f32 %v13614_v28, %v5328_v43  ;;  %v9220_v28 = vld [vmem:[%s13732_s5 + $0xe0] sm:$0xff] }
 0x331   : > { %v5303_v10 = vpop.f32.mrf.mxu2  ;;  %5750 = vmatpush.bf16.msrb.mxu0 %v9220_v28 }
 0x332   : > { %vm5437_vm10 = vcmp.ge.f32.partialorder %v5341_v23, 0.0  ;;  %v5441_v62 = vmul.f32 0.01, %v5341_v23 }
 0x334   : > { %v5445_v15 = vsel %vm5437_vm10, %v5341_v23, %v5441_v62 }
 0x335   : > { %v5449_v32 = vpack.c.bf16 %v5445_v15, %v5445_v15  ;;  %5751 = vmatpush.bf16.msrb.mxu0 %v9219_v33 }
 0x337   : > { %v5394_v29 = vpop.f32.mrf.mxu3  ;;  %5742 = vmatmul.bf16.vlgmr.msrb.gmra.mxu2 %v5449_v32 }
 0x339   : > { %5752 = vmatpush.bf16.msrb.mxu0 %v9218_v34 }
 0x33d   : > { %5753 = vmatpush.bf16.msrb.mxu0 %v9217_v54 }
 0x341   : > { %5754 = vmatpush.bf16.msrb.mxu0 %v9216_v30 }
 0x349   : > { %v5353_v39 = vpop.f32.mrf.mxu2 }
 0x34a   : > { %v5354_v35 = vadd.f32 %v5353_v39, %v5062_v25 }
 0x34c   : > { %v5367_v47 = vadd.f32 %v13633_v48, %v5354_v35 }
 0x34e   : > { %v5380_v27 = vadd.f32 %v5379_v4, %v5367_v47 }
 0x350   : > { %v5393_v22 = vadd.f32 %v5392_v13, %v5380_v27 }
 0x351   : > { %v5355_v36 = vpop.f32.mrf.mxu2 }
 0x369   : > { %v5405_v38 = vpop.f32.mrf.mxu2 }
 0x36a   : > { %v5406_v40 = vadd.f32 %v5405_v38, %v5393_v22 }
 0x36c   : > { %v5419_v49 = vadd.f32 %v5418_v2, %v5406_v40 }
 0x36e   : > { %v5432_v6 = vadd.f32 %v5431_v16, %v5419_v49 }
 0x370   : > { %vm5438_vm11 = vcmp.ge.f32.partialorder %v5432_v6, 0.0  ;;  %v5442_v31 = vmul.f32 0.01, %v5432_v6 }
 0x371   : > { %v5407_v55 = vpop.f32.mrf.mxu2 }
 0x372   : > { %v5446_v56 = vsel %vm5438_vm11, %v5432_v6, %v5442_v31  ;;  %v5717_v52 = vpop.f32.mrf.mxu3 }
 0x373   : > { %v5450_v41 = vpack.c.bf16 %v5446_v56, %v5446_v56  ;;  %v5718_v48 = vadd.f32 %v5717_v52, %v5515_v0 }
 0x375   : > { %5755 = vmatmul.bf16.vlgmr.msrb.gmra.mxu0 %v5450_v41 }
 0x37a   : > { %v5719_v57 = vpop.f32.mrf.mxu3 }
 0x38f   : > { %v5730_v8 = vpop.f32.mrf.mxu1 }
 0x390   : > { %v5731_v59 = vadd.f32 %v5730_v8, %v5718_v48 }
 0x397   : > { %v5732_v60 = vpop.f32.mrf.mxu1 }
 0x3ba   : > { %v5743_v58 = vpop.f32.mrf.mxu2 }
 0x3bb   : > { %v5744_v53 = vadd.f32 %v5743_v58, %v5731_v59 }
 0x3c2   : > { %v5745_v63 = vpop.f32.mrf.mxu2 }
 0x3f2   : > { %v5756_v20 = vpop.f32.mrf.mxu0 }
 0x3f3   : > { %v5757_v4 = vadd.f32 %v5756_v20, %v5744_v53 }
 0x3f5   : > { %vm5760_vm12 = vcmp.ge.f32.partialorder %v5757_v4, 0.0  ;;  %v5761_v21 = vmul.f32 0.01, %v5757_v4 }
 0x3f7   : > { %v5762_v1 = vsel %vm5760_vm12, %v5757_v4, %v5761_v21 }
 0x3f8   : > { %5764 = vst.msk [vmem:[%s268_s9] sm:$0x1] %vm5763_vm13, %v5762_v1 }
 0x3f9   : > { %9312 = shalt.err (!%p9309_p3)
}
 0x3fa   : > { %9224 = dma.vmem_to_hbm [thread:$0]  (%p9427_p5), %s5777_s13, 16, %s5779_s15, %s5766_s16   ;;  %v5758_v51 = vpop.f32.mrf.mxu0 }
 0x3fb PF: > { %p9230_p4 = scmp.ge.s32.totalorder %s9347_s27, 2  ;;  %s5790_s23 = sand.u32 1, %s9335_s24  }
 0x3fc   : > { %s5791_s29 = scalar_lea.sflag [#allocation3], %s5790_s23 }
 0x3fd   : > { %p9227_p7 = pnand %p9230_p4, %p9431_p6 }
 0x3ff   : > { %p9228_p8 = pneg %p9227_p7 }
 0x401   : > { %9330 = dma.done.wait (%p9228_p8), %s5791_s29, 16  }
 0x402   : > { %9332 = vsyncadd (%p9228_p8), %s5791_s29, 4294967280  ;;  %p17_p9 = scmp.ge.s32.totalorder %s9414_s30, 4   ;;  %s13737_s24 = smov %s9339_s25 }
 0x403   : > { %s13738_s25 = smov %s9343_s26  ;;  %s13739_s26 = smov %s9425_s10 }
 0x404   : > { %s13740_s27 = smov %s9414_s30  ;;  %19 = sbr.rel (!%p17_p9) target bundleno = 3 (0x3), region = 83 }
 0x409   :  { %5796 = vsyncpa [#allocation3], 1 }
 0x40a   :  { %5798 = vsyncpa [#allocation3 + $0x1], 1 }

</bundles_post_ra>
